<compile_context>
chip_gen: v7x
topology: tpu7x:2x2x1
jax: 0.10.0
libtpu: 0.0.40
codegen_flags: <defaults>
</compile_context>

<pallas_src>
import jax
import jax.numpy as jnp
from jax.experimental import pallas as pl
from jax.experimental.pallas import tpu as pltpu

LEAK = 0.2


def _leaky_relu(x):
    return jnp.where(x > 0, x, LEAK * x)


def encoder_kernel(x_ref, w1_ref, w2_ref, w3_ref, w4_ref, w5_ref,
                   mf1, ml1, mf2, ml2, mf3, ml3, mf4, ml4,
                   o_ref, s1, s2, s3, s4):
    """One grid step = Bt batch elements, flattened to (Bt*L_cur, C) tiles."""

    def conv3_act(x, w_ref, mf_ref, ml_ref):
        # x: (M, Cin) f32.  w_ref: (3*Cin, Cout) bf16, tap-major rows.
        # mf/ml: (M, 1) f32 masks zeroing the +-1 taps at batch boundaries.
        x_m1 = jnp.concatenate([x[:1], x[:-1]], axis=0) * mf_ref[...]   # x[l-1]
        x_p1 = jnp.concatenate([x[1:], x[-1:]], axis=0) * ml_ref[...]   # x[l+1]
        x3 = jnp.concatenate([x_m1, x, x_p1], axis=1).astype(jnp.bfloat16)
        y = jnp.dot(x3, w_ref[...], preferred_element_type=jnp.float32)
        return _leaky_relu(y)

    def avgpool2(h, s_ref):
        # AvgPool1d(2) along rows: store once, read two sublane-strided views.
        s_ref[...] = h
        half = h.shape[0] // 2
        return 0.5 * (s_ref[pl.ds(0, half, stride=2), :]
                      + s_ref[pl.ds(1, half, stride=2), :])

    h = x_ref[...]
    h = avgpool2(conv3_act(h, w1_ref, mf1, ml1), s1)
    h = avgpool2(conv3_act(h, w2_ref, mf2, ml2), s2)
    h = avgpool2(conv3_act(h, w3_ref, mf3, ml3), s3)
    h = avgpool2(conv3_act(h, w4_ref, mf4, ml4), s4)

    # conv5: kernel 2, stride 1, no padding.  Computed densely on all rows;
    # each batch element's last row is invalid and sliced off in the wrapper.
    h_p1 = jnp.concatenate([h[1:], h[-1:]], axis=0)
    x2 = jnp.concatenate([h, h_p1], axis=1).astype(jnp.bfloat16)
    o_ref[...] = jnp.dot(x2, w5_ref[...],
                         preferred_element_type=jnp.float32).astype(o_ref.dtype)


def encoder_forward(x_ncl, weights, batch_tile=None):
    """x_ncl: (B, 2, L) float32 (torch NCL).  Returns (B, embed, L//16 - 1)."""
    w1, w2, w3, w4, w5 = weights            # each (K, Cin, Cout)
    B, c_in, L = x_ncl.shape
    assert c_in == 2 and L % 16 == 0 and L >= 32
    embed = w5.shape[-1]
    L4 = L // 16
    l_out = L4 - 1

    # ---- batch-tile choice: keep the deepest-layer M around ~256 rows ------
    if batch_tile is None:
        bt = max(1, min(B, 2048 // L))
        if bt < B and (bt * L4) % 8 != 0:      # keep output block 8-row tileable
            bt = B
    else:
        bt = batch_tile
    b_pad = ((B + bt - 1) // bt) * bt
    grid = b_pad // bt
    if grid > 1:
        assert (bt * L4) % 8 == 0, "batch_tile * (L//16) must be a multiple of 8"

    # ---- input: NCL -> flattened (B_pad*L, 2), length on sublanes ----------
    x_nlc = jnp.transpose(x_ncl, (0, 2, 1)).astype(jnp.float32)
    if b_pad != B:
        x_nlc = jnp.pad(x_nlc, ((0, b_pad - B), (0, 0), (0, 0)))
    x_flat = x_nlc.reshape(b_pad * L, c_in)

    # ---- weights: (K, Cin, Cout) -> (K*Cin, Cout) bf16 (MXU-native) --------
    w2d = tuple(w.reshape(-1, w.shape[-1]).astype(jnp.bfloat16)
                for w in (w1, w2, w3, w4, w5))

    # ---- per-layer batch-boundary masks for the +-1 conv taps --------------
    def tap_masks(seg):
        pos = jnp.arange(bt * seg, dtype=jnp.int32) % seg
        not_first = (pos != 0).astype(jnp.float32)[:, None]        # (M, 1)
        not_last = (pos != seg - 1).astype(jnp.float32)[:, None]   # (M, 1)
        return not_first, not_last

    mask_args = []
    for i in range(4):
        mask_args.extend(tap_masks(L >> i))
    mask_args = tuple(mask_args)

    weight_specs = [pl.BlockSpec(w.shape, lambda b: (0, 0)) for w in w2d]
    mask_specs = [pl.BlockSpec(m.shape, lambda b: (0, 0)) for m in mask_args]

    out_flat = pl.pallas_call(
        encoder_kernel,
        out_shape=jax.ShapeDtypeStruct((b_pad * L4, embed), jnp.float32),
        grid_spec=pltpu.PrefetchScalarGridSpec(
            num_scalar_prefetch=0,
            grid=(grid,),
            in_specs=[pl.BlockSpec((bt * L, c_in), lambda b: (b, 0))]
                     + weight_specs + mask_specs,
            out_specs=pl.BlockSpec((bt * L4, embed), lambda b: (b, 0)),
            scratch_shapes=[
                pltpu.VMEM((bt * L, w1.shape[-1]), jnp.float32),
                pltpu.VMEM((bt * L // 2, w2.shape[-1]), jnp.float32),
                pltpu.VMEM((bt * L // 4, w3.shape[-1]), jnp.float32),
                pltpu.VMEM((bt * L // 8, w4.shape[-1]), jnp.float32),
            ],
        ),
        compiler_params=pltpu.CompilerParams(
            dimension_semantics=("parallel",)),
    )(x_flat, *w2d, *mask_args)

    # Drop per-batch-element invalid conv5 row, back to torch NCL layout.
    out = out_flat.reshape(b_pad, L4, embed)[:B, :l_out, :]
    return jnp.transpose(out, (0, 2, 1))   # (B, embed, l_out)


def encoder_reference(x_ncl, weights):
    """Pure-JAX f32 reference (mirrors the PyTorch module) for verification."""
    w1, w2, w3, w4, w5 = weights

    def conv(x, w, pad):
        # our w: (K, Cin, Cout) -> torch/OIH: (Cout, Cin, K)
        w_oik = jnp.transpose(w, (2, 1, 0))
        return jax.lax.conv_general_dilated(
            x, w_oik, window_strides=(1,), padding=[(pad, pad)],
            dimension_numbers=("NCH", "OIH", "NCH"))

    def pool(x):
        b, c, l = x.shape
        return x.reshape(b, c, l // 2, 2).mean(axis=-1)

    act = lambda v: jnp.where(v > 0, v, LEAK * v)
    h = pool(act(conv(x_ncl, w1, 1)))
    h = pool(act(conv(h, w2, 1)))
    h = pool(act(conv(h, w3, 1)))
    h = pool(act(conv(h, w4, 1)))
    return conv(h, w5, 0)


def make_weights(key, ndfs, embed_dim):
    ndf1, ndf2, ndf3, ndf4 = ndfs
    shapes = [
        (3, 2, ndf1),         # conv1
        (3, ndf1, ndf2),      # conv2
        (3, ndf2, ndf3),      # conv3
        (3, ndf3, ndf4),      # conv4
        (2, ndf4, embed_dim)  # conv5
    ]
    keys = jax.random.split(key, len(shapes))
    return tuple(
        (0.1 * jax.random.normal(k, s, dtype=jnp.float32))
        for k, s in zip(keys, shapes)
    )


if __name__ == "__main__":
    key = jax.random.PRNGKey(0)
    k_x, k_w = jax.random.split(key)

    B, L = 6, 64                     # small; L must be a multiple of 16, >= 32
    ndfs = (8, 16, 32, 64)
    embed_dim = 16

    x = jax.random.normal(k_x, (B, 2, L), dtype=jnp.float32)   # torch NCL
    weights = make_weights(k_w, ndfs, embed_dim)

    # batch_tile=4 -> padded to 8 elements, 2 grid steps: exercises batch
    # packing, batch-boundary masking and the padded-batch path.
    out = jax.block_until_ready(encoder_forward(x, weights, batch_tile=4))
    ref = jax.block_until_ready(encoder_reference(x, weights))

    assert out.shape == (B, embed_dim, L // 16 - 1), out.shape
    err = float(jnp.max(jnp.abs(out - ref)))
    # bf16 dot operands (f32 accumulation) vs f32 reference -> loose tolerance.
    assert jnp.allclose(out, ref, atol=2e-3, rtol=2e-2), (
        f"mismatch vs reference: max abs err {err}")

    print("KERNEL_OK")
</pallas_src>

<mosaic_0001>
module attributes {stable_mosaic.version = 11 : i64} {
  func.func @encoder_kernel(%arg0: i32, %arg1: memref<256x2xf32, #tpu.memory_space<vmem>>, %arg2: memref<6x8xbf16, #tpu.memory_space<vmem>>, %arg3: memref<24x16xbf16, #tpu.memory_space<vmem>>, %arg4: memref<48x32xbf16, #tpu.memory_space<vmem>>, %arg5: memref<96x64xbf16, #tpu.memory_space<vmem>>, %arg6: memref<128x16xbf16, #tpu.memory_space<vmem>>, %arg7: memref<256x1xf32, #tpu.memory_space<vmem>>, %arg8: memref<256x1xf32, #tpu.memory_space<vmem>>, %arg9: memref<128x1xf32, #tpu.memory_space<vmem>>, %arg10: memref<128x1xf32, #tpu.memory_space<vmem>>, %arg11: memref<64x1xf32, #tpu.memory_space<vmem>>, %arg12: memref<64x1xf32, #tpu.memory_space<vmem>>, %arg13: memref<32x1xf32, #tpu.memory_space<vmem>>, %arg14: memref<32x1xf32, #tpu.memory_space<vmem>>, %arg15: memref<16x16xf32, #tpu.memory_space<vmem>>, %arg16: memref<256x8xf32, #tpu.memory_space<vmem>>, %arg17: memref<128x16xf32, #tpu.memory_space<vmem>>, %arg18: memref<64x32xf32, #tpu.memory_space<vmem>>, %arg19: memref<32x64xf32, #tpu.memory_space<vmem>>) attributes {dimension_semantics = [#tpu.dimension_semantics<parallel>], iteration_bounds = array<i64: 2>, scalar_prefetch = 0 : i64, scratch_operands = 4 : i64, tpu.core_type = #tpu.core_type<tc>, window_params = [{transform_indices = @transform_0, window_bounds = array<i64: 256, 2>}, {pipeline_mode = #tpu.pipeline_mode<synchronous>, transform_indices = @transform_1, window_bounds = array<i64: 6, 8>}, {pipeline_mode = #tpu.pipeline_mode<synchronous>, transform_indices = @transform_2, window_bounds = array<i64: 24, 16>}, {pipeline_mode = #tpu.pipeline_mode<synchronous>, transform_indices = @transform_3, window_bounds = array<i64: 48, 32>}, {pipeline_mode = #tpu.pipeline_mode<synchronous>, transform_indices = @transform_4, window_bounds = array<i64: 96, 64>}, {pipeline_mode = #tpu.pipeline_mode<synchronous>, transform_indices = @transform_5, window_bounds = array<i64: 128, 16>}, {pipeline_mode = #tpu.pipeline_mode<synchronous>, transform_indices = @transform_6, window_bounds = array<i64: 256, 1>}, {pipeline_mode = #tpu.pipeline_mode<synchronous>, transform_indices = @transform_7, window_bounds = array<i64: 256, 1>}, {pipeline_mode = #tpu.pipeline_mode<synchronous>, transform_indices = @transform_8, window_bounds = array<i64: 128, 1>}, {pipeline_mode = #tpu.pipeline_mode<synchronous>, transform_indices = @transform_9, window_bounds = array<i64: 128, 1>}, {pipeline_mode = #tpu.pipeline_mode<synchronous>, transform_indices = @transform_10, window_bounds = array<i64: 64, 1>}, {pipeline_mode = #tpu.pipeline_mode<synchronous>, transform_indices = @transform_11, window_bounds = array<i64: 64, 1>}, {pipeline_mode = #tpu.pipeline_mode<synchronous>, transform_indices = @transform_12, window_bounds = array<i64: 32, 1>}, {pipeline_mode = #tpu.pipeline_mode<synchronous>, transform_indices = @transform_13, window_bounds = array<i64: 32, 1>}, {transform_indices = @transform_14, window_bounds = array<i64: 16, 16>}]} {
    %c0 = arith.constant 0 : index
    %c0_0 = arith.constant 0 : index
    %0 = vector.load %arg1[%c0, %c0_0] : memref<256x2xf32, #tpu.memory_space<vmem>>, vector<256x2xf32>
    %1 = vector.extract_strided_slice %0 {offsets = [0, 0], sizes = [1, 2], strides = [1, 1]} : vector<256x2xf32> to vector<1x2xf32>
    %2 = vector.extract_strided_slice %0 {offsets = [0, 0], sizes = [255, 2], strides = [1, 1]} : vector<256x2xf32> to vector<255x2xf32>
    %3 = tpu.concatenate %1, %2 in 0 : vector<1x2xf32>, vector<255x2xf32> -> vector<256x2xf32>
    %c0_1 = arith.constant 0 : index
    %c0_2 = arith.constant 0 : index
    %4 = vector.load %arg7[%c0_1, %c0_2] : memref<256x1xf32, #tpu.memory_space<vmem>>, vector<256x1xf32>
    %5 = vector.broadcast %4 : vector<256x1xf32> to vector<256x2xf32>
    %6 = arith.mulf %3, %5 : vector<256x2xf32>
    %7 = vector.extract_strided_slice %0 {offsets = [1, 0], sizes = [255, 2], strides = [1, 1]} : vector<256x2xf32> to vector<255x2xf32>
    %8 = vector.extract_strided_slice %0 {offsets = [255, 0], sizes = [1, 2], strides = [1, 1]} : vector<256x2xf32> to vector<1x2xf32>
    %9 = tpu.concatenate %7, %8 in 0 : vector<255x2xf32>, vector<1x2xf32> -> vector<256x2xf32>
    %c0_3 = arith.constant 0 : index
    %c0_4 = arith.constant 0 : index
    %10 = vector.load %arg8[%c0_3, %c0_4] : memref<256x1xf32, #tpu.memory_space<vmem>>, vector<256x1xf32>
    %11 = vector.broadcast %10 : vector<256x1xf32> to vector<256x2xf32>
    %12 = arith.mulf %9, %11 : vector<256x2xf32>
    %13 = tpu.concatenate %6, %0, %12 in 1 : vector<256x2xf32>, vector<256x2xf32>, vector<256x2xf32> -> vector<256x6xf32>
    %14 = arith.truncf %13 : vector<256x6xf32> to vector<256x6xbf16>
    %c0_5 = arith.constant 0 : index
    %c0_6 = arith.constant 0 : index
    %15 = vector.load %arg2[%c0_5, %c0_6] : memref<6x8xbf16, #tpu.memory_space<vmem>>, vector<6x8xbf16>
    %cst = arith.constant dense<0.000000e+00> : vector<256x8xf32>
    %16 = tpu.matmul %14, %15, %cst {dimension_numbers = #tpu.dot_dimension_numbers<[1], [0], [0], [1], [0, 0, 1, 1], [], []>} : vector<256x6xbf16>, vector<6x8xbf16>, vector<256x8xf32> -> vector<256x8xf32>
    %cst_7 = arith.constant 0.000000e+00 : f32
    %17 = vector.broadcast %cst_7 : f32 to vector<256x8xf32>
    %18 = arith.cmpf ogt, %16, %17 : vector<256x8xf32>
    %cst_8 = arith.constant 2.000000e-01 : f32
    %19 = vector.broadcast %cst_8 : f32 to vector<256x8xf32>
    %20 = arith.mulf %19, %16 : vector<256x8xf32>
    %21 = arith.select %18, %16, %20 : vector<256x8xi1>, vector<256x8xf32>
    %c0_9 = arith.constant 0 : index
    %c0_10 = arith.constant 0 : index
    %22 = vector.load %arg16[%c0_9, %c0_10] : memref<256x8xf32, #tpu.memory_space<vmem>>, vector<256x8xf32>
    tpu.vector_store %arg16[%c0_9, %c0_10], %21 {strides = array<i32>} : memref<256x8xf32, #tpu.memory_space<vmem>>, vector<256x8xf32>,
    %c0_11 = arith.constant 0 : index
    %c0_12 = arith.constant 0 : index
    %23 = tpu.strided_load %arg16[%c0_11, %c0_12] {strides = array<i32: 2, 1>} : memref<256x8xf32, #tpu.memory_space<vmem>>, vector<128x8xf32>
    %c1 = arith.constant 1 : index
    %c0_13 = arith.constant 0 : index
    %24 = tpu.strided_load %arg16[%c1, %c0_13] {strides = array<i32: 2, 1>} : memref<256x8xf32, #tpu.memory_space<vmem>>, vector<128x8xf32>
    %25 = arith.addf %23, %24 : vector<128x8xf32>
    %cst_14 = arith.constant 5.000000e-01 : f32
    %26 = vector.broadcast %cst_14 : f32 to vector<128x8xf32>
    %27 = arith.mulf %26, %25 : vector<128x8xf32>
    %28 = vector.extract_strided_slice %27 {offsets = [0, 0], sizes = [1, 8], strides = [1, 1]} : vector<128x8xf32> to vector<1x8xf32>
    %29 = vector.extract_strided_slice %27 {offsets = [0, 0], sizes = [127, 8], strides = [1, 1]} : vector<128x8xf32> to vector<127x8xf32>
    %30 = tpu.concatenate %28, %29 in 0 : vector<1x8xf32>, vector<127x8xf32> -> vector<128x8xf32>
    %c0_15 = arith.constant 0 : index
    %c0_16 = arith.constant 0 : index
    %31 = vector.load %arg9[%c0_15, %c0_16] : memref<128x1xf32, #tpu.memory_space<vmem>>, vector<128x1xf32>
    %32 = vector.broadcast %31 : vector<128x1xf32> to vector<128x8xf32>
    %33 = arith.mulf %30, %32 : vector<128x8xf32>
    %34 = vector.extract_strided_slice %27 {offsets = [1, 0], sizes = [127, 8], strides = [1, 1]} : vector<128x8xf32> to vector<127x8xf32>
    %35 = vector.extract_strided_slice %27 {offsets = [127, 0], sizes = [1, 8], strides = [1, 1]} : vector<128x8xf32> to vector<1x8xf32>
    %36 = tpu.concatenate %34, %35 in 0 : vector<127x8xf32>, vector<1x8xf32> -> vector<128x8xf32>
    %c0_17 = arith.constant 0 : index
    %c0_18 = arith.constant 0 : index
    %37 = vector.load %arg10[%c0_17, %c0_18] : memref<128x1xf32, #tpu.memory_space<vmem>>, vector<128x1xf32>
    %38 = vector.broadcast %37 : vector<128x1xf32> to vector<128x8xf32>
    %39 = arith.mulf %36, %38 : vector<128x8xf32>
    %40 = tpu.concatenate %33, %27, %39 in 1 : vector<128x8xf32>, vector<128x8xf32>, vector<128x8xf32> -> vector<128x24xf32>
    %41 = arith.truncf %40 : vector<128x24xf32> to vector<128x24xbf16>
    %c0_19 = arith.constant 0 : index
    %c0_20 = arith.constant 0 : index
    %42 = vector.load %arg3[%c0_19, %c0_20] : memref<24x16xbf16, #tpu.memory_space<vmem>>, vector<24x16xbf16>
    %cst_21 = arith.constant dense<0.000000e+00> : vector<128x16xf32>
    %43 = tpu.matmul %41, %42, %cst_21 {dimension_numbers = #tpu.dot_dimension_numbers<[1], [0], [0], [1], [0, 0, 1, 1], [], []>} : vector<128x24xbf16>, vector<24x16xbf16>, vector<128x16xf32> -> vector<128x16xf32>
    %cst_22 = arith.constant 0.000000e+00 : f32
    %44 = vector.broadcast %cst_22 : f32 to vector<128x16xf32>
    %45 = arith.cmpf ogt, %43, %44 : vector<128x16xf32>
    %cst_23 = arith.constant 2.000000e-01 : f32
    %46 = vector.broadcast %cst_23 : f32 to vector<128x16xf32>
    %47 = arith.mulf %46, %43 : vector<128x16xf32>
    %48 = arith.select %45, %43, %47 : vector<128x16xi1>, vector<128x16xf32>
    %c0_24 = arith.constant 0 : index
    %c0_25 = arith.constant 0 : index
    %49 = vector.load %arg17[%c0_24, %c0_25] : memref<128x16xf32, #tpu.memory_space<vmem>>, vector<128x16xf32>
    tpu.vector_store %arg17[%c0_24, %c0_25], %48 {strides = array<i32>} : memref<128x16xf32, #tpu.memory_space<vmem>>, vector<128x16xf32>,
    %c0_26 = arith.constant 0 : index
    %c0_27 = arith.constant 0 : index
    %50 = tpu.strided_load %arg17[%c0_26, %c0_27] {strides = array<i32: 2, 1>} : memref<128x16xf32, #tpu.memory_space<vmem>>, vector<64x16xf32>
    %c1_28 = arith.constant 1 : index
    %c0_29 = arith.constant 0 : index
    %51 = tpu.strided_load %arg17[%c1_28, %c0_29] {strides = array<i32: 2, 1>} : memref<128x16xf32, #tpu.memory_space<vmem>>, vector<64x16xf32>
    %52 = arith.addf %50, %51 : vector<64x16xf32>
    %cst_30 = arith.constant 5.000000e-01 : f32
    %53 = vector.broadcast %cst_30 : f32 to vector<64x16xf32>
    %54 = arith.mulf %53, %52 : vector<64x16xf32>
    %55 = vector.extract_strided_slice %54 {offsets = [0, 0], sizes = [1, 16], strides = [1, 1]} : vector<64x16xf32> to vector<1x16xf32>
    %56 = vector.extract_strided_slice %54 {offsets = [0, 0], sizes = [63, 16], strides = [1, 1]} : vector<64x16xf32> to vector<63x16xf32>
    %57 = tpu.concatenate %55, %56 in 0 : vector<1x16xf32>, vector<63x16xf32> -> vector<64x16xf32>
    %c0_31 = arith.constant 0 : index
    %c0_32 = arith.constant 0 : index
    %58 = vector.load %arg11[%c0_31, %c0_32] : memref<64x1xf32, #tpu.memory_space<vmem>>, vector<64x1xf32>
    %59 = vector.broadcast %58 : vector<64x1xf32> to vector<64x16xf32>
    %60 = arith.mulf %57, %59 : vector<64x16xf32>
    %61 = vector.extract_strided_slice %54 {offsets = [1, 0], sizes = [63, 16], strides = [1, 1]} : vector<64x16xf32> to vector<63x16xf32>
    %62 = vector.extract_strided_slice %54 {offsets = [63, 0], sizes = [1, 16], strides = [1, 1]} : vector<64x16xf32> to vector<1x16xf32>
    %63 = tpu.concatenate %61, %62 in 0 : vector<63x16xf32>, vector<1x16xf32> -> vector<64x16xf32>
    %c0_33 = arith.constant 0 : index
    %c0_34 = arith.constant 0 : index
    %64 = vector.load %arg12[%c0_33, %c0_34] : memref<64x1xf32, #tpu.memory_space<vmem>>, vector<64x1xf32>
    %65 = vector.broadcast %64 : vector<64x1xf32> to vector<64x16xf32>
    %66 = arith.mulf %63, %65 : vector<64x16xf32>
    %67 = tpu.concatenate %60, %54, %66 in 1 : vector<64x16xf32>, vector<64x16xf32>, vector<64x16xf32> -> vector<64x48xf32>
    %68 = arith.truncf %67 : vector<64x48xf32> to vector<64x48xbf16>
    %c0_35 = arith.constant 0 : index
    %c0_36 = arith.constant 0 : index
    %69 = vector.load %arg4[%c0_35, %c0_36] : memref<48x32xbf16, #tpu.memory_space<vmem>>, vector<48x32xbf16>
    %cst_37 = arith.constant dense<0.000000e+00> : vector<64x32xf32>
    %70 = tpu.matmul %68, %69, %cst_37 {dimension_numbers = #tpu.dot_dimension_numbers<[1], [0], [0], [1], [0, 0, 1, 1], [], []>} : vector<64x48xbf16>, vector<48x32xbf16>, vector<64x32xf32> -> vector<64x32xf32>
    %cst_38 = arith.constant 0.000000e+00 : f32
    %71 = vector.broadcast %cst_38 : f32 to vector<64x32xf32>
    %72 = arith.cmpf ogt, %70, %71 : vector<64x32xf32>
    %cst_39 = arith.constant 2.000000e-01 : f32
    %73 = vector.broadcast %cst_39 : f32 to vector<64x32xf32>
    %74 = arith.mulf %73, %70 : vector<64x32xf32>
    %75 = arith.select %72, %70, %74 : vector<64x32xi1>, vector<64x32xf32>
    %c0_40 = arith.constant 0 : index
    %c0_41 = arith.constant 0 : index
    %76 = vector.load %arg18[%c0_40, %c0_41] : memref<64x32xf32, #tpu.memory_space<vmem>>, vector<64x32xf32>
    tpu.vector_store %arg18[%c0_40, %c0_41], %75 {strides = array<i32>} : memref<64x32xf32, #tpu.memory_space<vmem>>, vector<64x32xf32>,
    %c0_42 = arith.constant 0 : index
    %c0_43 = arith.constant 0 : index
    %77 = tpu.strided_load %arg18[%c0_42, %c0_43] {strides = array<i32: 2, 1>} : memref<64x32xf32, #tpu.memory_space<vmem>>, vector<32x32xf32>
    %c1_44 = arith.constant 1 : index
    %c0_45 = arith.constant 0 : index
    %78 = tpu.strided_load %arg18[%c1_44, %c0_45] {strides = array<i32: 2, 1>} : memref<64x32xf32, #tpu.memory_space<vmem>>, vector<32x32xf32>
    %79 = arith.addf %77, %78 : vector<32x32xf32>
    %cst_46 = arith.constant 5.000000e-01 : f32
    %80 = vector.broadcast %cst_46 : f32 to vector<32x32xf32>
    %81 = arith.mulf %80, %79 : vector<32x32xf32>
    %82 = vector.extract_strided_slice %81 {offsets = [0, 0], sizes = [1, 32], strides = [1, 1]} : vector<32x32xf32> to vector<1x32xf32>
    %83 = vector.extract_strided_slice %81 {offsets = [0, 0], sizes = [31, 32], strides = [1, 1]} : vector<32x32xf32> to vector<31x32xf32>
    %84 = tpu.concatenate %82, %83 in 0 : vector<1x32xf32>, vector<31x32xf32> -> vector<32x32xf32>
    %c0_47 = arith.constant 0 : index
    %c0_48 = arith.constant 0 : index
    %85 = vector.load %arg13[%c0_47, %c0_48] : memref<32x1xf32, #tpu.memory_space<vmem>>, vector<32x1xf32>
    %86 = vector.broadcast %85 : vector<32x1xf32> to vector<32x32xf32>
    %87 = arith.mulf %84, %86 : vector<32x32xf32>
    %88 = vector.extract_strided_slice %81 {offsets = [1, 0], sizes = [31, 32], strides = [1, 1]} : vector<32x32xf32> to vector<31x32xf32>
    %89 = vector.extract_strided_slice %81 {offsets = [31, 0], sizes = [1, 32], strides = [1, 1]} : vector<32x32xf32> to vector<1x32xf32>
    %90 = tpu.concatenate %88, %89 in 0 : vector<31x32xf32>, vector<1x32xf32> -> vector<32x32xf32>
    %c0_49 = arith.constant 0 : index
    %c0_50 = arith.constant 0 : index
    %91 = vector.load %arg14[%c0_49, %c0_50] : memref<32x1xf32, #tpu.memory_space<vmem>>, vector<32x1xf32>
    %92 = vector.broadcast %91 : vector<32x1xf32> to vector<32x32xf32>
    %93 = arith.mulf %90, %92 : vector<32x32xf32>
    %94 = tpu.concatenate %87, %81, %93 in 1 : vector<32x32xf32>, vector<32x32xf32>, vector<32x32xf32> -> vector<32x96xf32>
    %95 = arith.truncf %94 : vector<32x96xf32> to vector<32x96xbf16>
    %c0_51 = arith.constant 0 : index
    %c0_52 = arith.constant 0 : index
    %96 = vector.load %arg5[%c0_51, %c0_52] : memref<96x64xbf16, #tpu.memory_space<vmem>>, vector<96x64xbf16>
    %cst_53 = arith.constant dense<0.000000e+00> : vector<32x64xf32>
    %97 = tpu.matmul %95, %96, %cst_53 {dimension_numbers = #tpu.dot_dimension_numbers<[1], [0], [0], [1], [0, 0, 1, 1], [], []>} : vector<32x96xbf16>, vector<96x64xbf16>, vector<32x64xf32> -> vector<32x64xf32>
    %cst_54 = arith.constant 0.000000e+00 : f32
    %98 = vector.broadcast %cst_54 : f32 to vector<32x64xf32>
    %99 = arith.cmpf ogt, %97, %98 : vector<32x64xf32>
    %cst_55 = arith.constant 2.000000e-01 : f32
    %100 = vector.broadcast %cst_55 : f32 to vector<32x64xf32>
    %101 = arith.mulf %100, %97 : vector<32x64xf32>
    %102 = arith.select %99, %97, %101 : vector<32x64xi1>, vector<32x64xf32>
    %c0_56 = arith.constant 0 : index
    %c0_57 = arith.constant 0 : index
    %103 = vector.load %arg19[%c0_56, %c0_57] : memref<32x64xf32, #tpu.memory_space<vmem>>, vector<32x64xf32>
    tpu.vector_store %arg19[%c0_56, %c0_57], %102 {strides = array<i32>} : memref<32x64xf32, #tpu.memory_space<vmem>>, vector<32x64xf32>,
    %c0_58 = arith.constant 0 : index
    %c0_59 = arith.constant 0 : index
    %104 = tpu.strided_load %arg19[%c0_58, %c0_59] {strides = array<i32: 2, 1>} : memref<32x64xf32, #tpu.memory_space<vmem>>, vector<16x64xf32>
    %c1_60 = arith.constant 1 : index
    %c0_61 = arith.constant 0 : index
    %105 = tpu.strided_load %arg19[%c1_60, %c0_61] {strides = array<i32: 2, 1>} : memref<32x64xf32, #tpu.memory_space<vmem>>, vector<16x64xf32>
    %106 = arith.addf %104, %105 : vector<16x64xf32>
    %cst_62 = arith.constant 5.000000e-01 : f32
    %107 = vector.broadcast %cst_62 : f32 to vector<16x64xf32>
    %108 = arith.mulf %107, %106 : vector<16x64xf32>
    %109 = vector.extract_strided_slice %108 {offsets = [1, 0], sizes = [15, 64], strides = [1, 1]} : vector<16x64xf32> to vector<15x64xf32>
    %110 = vector.extract_strided_slice %108 {offsets = [15, 0], sizes = [1, 64], strides = [1, 1]} : vector<16x64xf32> to vector<1x64xf32>
    %111 = tpu.concatenate %109, %110 in 0 : vector<15x64xf32>, vector<1x64xf32> -> vector<16x64xf32>
    %112 = tpu.concatenate %108, %111 in 1 : vector<16x64xf32>, vector<16x64xf32> -> vector<16x128xf32>
    %113 = arith.truncf %112 : vector<16x128xf32> to vector<16x128xbf16>
    %c0_63 = arith.constant 0 : index
    %c0_64 = arith.constant 0 : index
    %114 = vector.load %arg6[%c0_63, %c0_64] : memref<128x16xbf16, #tpu.memory_space<vmem>>, vector<128x16xbf16>
    %cst_65 = arith.constant dense<0.000000e+00> : vector<16x16xf32>
    %115 = tpu.matmul %113, %114, %cst_65 {dimension_numbers = #tpu.dot_dimension_numbers<[1], [0], [0], [1], [0, 0, 1, 1], [], []>} : vector<16x128xbf16>, vector<128x16xbf16>, vector<16x16xf32> -> vector<16x16xf32>
    %c0_66 = arith.constant 0 : index
    %c0_67 = arith.constant 0 : index
    %116 = vector.load %arg15[%c0_66, %c0_67] : memref<16x16xf32, #tpu.memory_space<vmem>>, vector<16x16xf32>
    tpu.vector_store %arg15[%c0_66, %c0_67], %115 {strides = array<i32>} : memref<16x16xf32, #tpu.memory_space<vmem>>, vector<16x16xf32>,
    return
  }
  func.func @transform_0(%arg0: i32) -> (i32, i32) {
    %c0_i32 = arith.constant 0 : i32
    %c0_i32_0 = arith.constant 0 : i32
    return %arg0, %c0_i32 : i32, i32
  }
  func.func @transform_1(%arg0: i32) -> (i32, i32) {
    %c0_i32 = arith.constant 0 : i32
    %c0_i32_0 = arith.constant 0 : i32
    %c0_i32_1 = arith.constant 0 : i32
    return %c0_i32, %c0_i32_0 : i32, i32
  }
  func.func @transform_2(%arg0: i32) -> (i32, i32) {
    %c0_i32 = arith.constant 0 : i32
    %c0_i32_0 = arith.constant 0 : i32
    %c0_i32_1 = arith.constant 0 : i32
    return %c0_i32, %c0_i32_0 : i32, i32
  }
  func.func @transform_3(%arg0: i32) -> (i32, i32) {
    %c0_i32 = arith.constant 0 : i32
    %c0_i32_0 = arith.constant 0 : i32
    %c0_i32_1 = arith.constant 0 : i32
    return %c0_i32, %c0_i32_0 : i32, i32
  }
  func.func @transform_4(%arg0: i32) -> (i32, i32) {
    %c0_i32 = arith.constant 0 : i32
    %c0_i32_0 = arith.constant 0 : i32
    %c0_i32_1 = arith.constant 0 : i32
    return %c0_i32, %c0_i32_0 : i32, i32
  }
  func.func @transform_5(%arg0: i32) -> (i32, i32) {
    %c0_i32 = arith.constant 0 : i32
    %c0_i32_0 = arith.constant 0 : i32
    %c0_i32_1 = arith.constant 0 : i32
    return %c0_i32, %c0_i32_0 : i32, i32
  }
  func.func @transform_6(%arg0: i32) -> (i32, i32) {
    %c0_i32 = arith.constant 0 : i32
    %c0_i32_0 = arith.constant 0 : i32
    %c0_i32_1 = arith.constant 0 : i32
    return %c0_i32, %c0_i32_0 : i32, i32
  }
  func.func @transform_7(%arg0: i32) -> (i32, i32) {
    %c0_i32 = arith.constant 0 : i32
    %c0_i32_0 = arith.constant 0 : i32
    %c0_i32_1 = arith.constant 0 : i32
    return %c0_i32, %c0_i32_0 : i32, i32
  }
  func.func @transform_8(%arg0: i32) -> (i32, i32) {
    %c0_i32 = arith.constant 0 : i32
    %c0_i32_0 = arith.constant 0 : i32
    %c0_i32_1 = arith.constant 0 : i32
    return %c0_i32, %c0_i32_0 : i32, i32
  }
  func.func @transform_9(%arg0: i32) -> (i32, i32) {
    %c0_i32 = arith.constant 0 : i32
    %c0_i32_0 = arith.constant 0 : i32
    %c0_i32_1 = arith.constant 0 : i32
    return %c0_i32, %c0_i32_0 : i32, i32
  }
  func.func @transform_10(%arg0: i32) -> (i32, i32) {
    %c0_i32 = arith.constant 0 : i32
    %c0_i32_0 = arith.constant 0 : i32
    %c0_i32_1 = arith.constant 0 : i32
    return %c0_i32, %c0_i32_0 : i32, i32
  }
  func.func @transform_11(%arg0: i32) -> (i32, i32) {
    %c0_i32 = arith.constant 0 : i32
    %c0_i32_0 = arith.constant 0 : i32
    %c0_i32_1 = arith.constant 0 : i32
    return %c0_i32, %c0_i32_0 : i32, i32
  }
  func.func @transform_12(%arg0: i32) -> (i32, i32) {
    %c0_i32 = arith.constant 0 : i32
    %c0_i32_0 = arith.constant 0 : i32
    %c0_i32_1 = arith.constant 0 : i32
    return %c0_i32, %c0_i32_0 : i32, i32
  }
  func.func @transform_13(%arg0: i32) -> (i32, i32) {
    %c0_i32 = arith.constant 0 : i32
    %c0_i32_0 = arith.constant 0 : i32
    %c0_i32_1 = arith.constant 0 : i32
    return %c0_i32, %c0_i32_0 : i32, i32
  }
  func.func @transform_14(%arg0: i32) -> (i32, i32) {
    %c0_i32 = arith.constant 0 : i32
    %c0_i32_0 = arith.constant 0 : i32
    return %arg0, %c0_i32 : i32, i32
  }
}

</mosaic_0001>

<bundles_post_ra>
// kernel: tpu_custom_call.1
= control target key start
LH: loop header
LB: loop body
LE: loop exit
PB: predicated region body
PF: predicated region fallthrough
CT: control target
= control target key end

     0   :  { %s4149_s29 = smov 0   ;;  %s5556_s0 = inlined_call_operand.vmem [shape: f32[512,2], index: 0, kind: input, shape index: {}]   ;;  %s5557_s1 = inlined_call_operand.vmem [shape: bf16[6,8], index: 1, kind: input, shape index: {}]   ;;  %s5558_s2 = inlined_call_operand.vmem [shape: bf16[24,16], index: 2, kind: input, shape index: {}]   ;;  %s5559_s3 = inlined_call_operand.vmem [shape: bf16[48,32], index: 3, kind: input, shape index: {}]   ;;  %s5560_s4 = inlined_call_operand.vmem [shape: bf16[96,64], index: 4, kind: input, shape index: {}]   ;;  %s5561_s5 = inlined_call_operand.vmem [shape: bf16[128,16], index: 5, kind: input, shape index: {}]   ;;  %s5562_s6 = inlined_call_operand.vmem [shape: f32[256,1], index: 6, kind: input, shape index: {}]   ;;  %s5563_s7 = inlined_call_operand.vmem [shape: f32[256,1], index: 7, kind: input, shape index: {}]   ;;  %s5564_s8 = inlined_call_operand.vmem [shape: f32[128,1], index: 8, kind: input, shape index: {}]   ;;  %s5565_s9 = inlined_call_operand.vmem [shape: f32[128,1], index: 9, kind: input, shape index: {}]   ;;  %s5566_s10 = inlined_call_operand.vmem [shape: f32[64,1], index: 10, kind: input, shape index: {}]   ;;  %s5567_s11 = inlined_call_operand.vmem [shape: f32[64,1], index: 11, kind: input, shape index: {}]   ;;  %s5568_s12 = inlined_call_operand.vmem [shape: f32[32,1], index: 12, kind: input, shape index: {}]   ;;  %s5569_s13 = inlined_call_operand.vmem [shape: f32[32,1], index: 13, kind: input, shape index: {}]   ;;  %s5570_s14 = inlined_call_operand.vmem [shape: f32[32,16], index: 14, kind: output, shape index: {}]  }
   0x1 LB: > { %s3497_s30 = sadd.s32 4294967295, %s4063_s29   ;;  %p3501_p0 = scmp.ge.s32.totalorder %s4063_s29, 1  ;;  %s4063_s29 = sphi %s4149_s29, %s24_s29  }
   0x2   : > { %p413_p1 = scmp.lt.s32.totalorder %s4063_s29, 3 }
   0x4   : > { %p414_p2 = pnand %p3501_p0, %p413_p1 }
   0x6   : > { %417 = sbr.rel (%p414_p2) target bundleno = 2008 (0x7d8), region = 76 }
   0xd   : > { %v956_v0 = vld [vmem:[%s5563_s7 + $0x10] sm:$0xff]  ;;  %v954_v1 = vld [vmem:[%s5563_s7] sm:$0xff]  ;;  %v4065_v2 = vmov 0   ;;  %v957_v3 = vld [vmem:[%s5563_s7 + $0x18] sm:$0xff]  ;;  %s3502_s17 = sshll.u32 %s3497_s30, 5  ;;  %vm536_vm0 = vcmask 1040384  }
   0xe   : > { %3732 = vset.pattern.permute.xlu1 %v4065_v2  ;;  %3731 = vset.pattern.permute.xlu0 %v4065_v2  ;;  %v955_v4 = vld [vmem:[%s5563_s7 + $0x8] sm:$0xff]  ;;  %v958_v6 = vld [vmem:[%s5563_s7 + $0x20] sm:$0xff]  ;;  %v961_v7 = vld [vmem:[%s5563_s7 + $0x38] sm:$0xff]  ;;  %p460_p3 = scmp.lt.s32.totalorder %s3502_s17, 63  ;;  %s4066_s18 = smov 2   ;;  %vm1534_vm1 = vcmask 1042432  }
   0xf   : > { %998 = vperm.xlu1 %3732, %v956_v0   ;;  %988 = vperm.xlu0 %3731, %v954_v1   ;;  %v959_v5 = vld [vmem:[%s5563_s7 + $0x28] sm:$0xff]  ;;  %v960_v8 = vld [vmem:[%s5563_s7 + $0x30] sm:$0xff]  ;;  %v962_v10 = vld [vmem:[%s5563_s7 + $0x40] sm:$0xff]  ;;  %vm857_vm2 = vcmask 1046528   ;;  %s4067_s21 = smov 4   ;;  %vm1402_vm3 = vcmask 15360  }
  0x10   : > { %v963_v9 = vld [vmem:[%s5563_s7 + $0x48] sm:$0xff]  ;;  %v965_v11 = vld [vmem:[%s5563_s7 + $0x58] sm:$0xff]  ;;  %v964_v12 = vld [vmem:[%s5563_s7 + $0x50] sm:$0xff]  ;;  %s5609_s17 = smov (!%p460_p3, %s3502_s17), 63  ;;  %vm1435_vm4 = vcmask 31744   ;;  %vm1485_vm5 = vcmask 48128  }
  0x11   : > { %v967_v13 = vld [vmem:[%s5563_s7 + $0x68] sm:$0xff]  ;;  %v966_v14 = vld [vmem:[%s5563_s7 + $0x60] sm:$0xff]  ;;  %v969_v15 = vld [vmem:[%s5563_s7 + $0x78] sm:$0xff]  ;;  %s3503_s16 = sshll.u32 %s5609_s17, 3  ;;  %vm1795_vm7 = vcmask 64512   ;;  %s4069_s23 = smov 16  }
  0x12   : > { %v968_v16 = vld [vmem:[%s5563_s7 + $0x70] sm:$0xff]  ;;  %v971_v17 = vld [vmem:[%s5563_s7 + $0x88] sm:$0xff]  ;;  %v970_v18 = vld [vmem:[%s5563_s7 + $0x80] sm:$0xff]  ;;  %s4252_s24 = scalar_lea.vmem %s5556_s0, %s3503_s16  ;;  %s4070_s19 = smov 32  }
  0x13   : > { %1003 = vperm.xlu1 %3732, %v957_v3   ;;  %993 = vperm.xlu0 %3731, %v955_v4   ;;  %v973_v19 = vld [vmem:[%s5563_s7 + $0x98] sm:$0xff]  ;;  %v972_v20 = vld [vmem:[%s5563_s7 + $0x90] sm:$0xff]  ;;  %v975_v21 = vld [vmem:[%s5563_s7 + $0xa8] sm:$0xff]  ;;  %s4071_s17 = smov 64   ;;  %s3504_s27 = sshll.u32 %s3497_s30, 1 }
  0x14   : > { %v974_v22 = vld [vmem:[%s5563_s7 + $0xa0] sm:$0xff]  ;;  %v977_v23 = vld [vmem:[%s5563_s7 + $0xb8] sm:$0xff]  ;;  %v976_v24 = vld [vmem:[%s5563_s7 + $0xb0] sm:$0xff]  ;;  %p466_p4 = scmp.lt.s32.totalorder %s3504_s27, 3 }
  0x15   : > { %v979_v25 = vld [vmem:[%s5563_s7 + $0xc8] sm:$0xff]  ;;  %v978_v26 = vld [vmem:[%s5563_s7 + $0xc0] sm:$0xff]  ;;  %v981_v27 = vld [vmem:[%s5563_s7 + $0xd8] sm:$0xff] }
  0x16   : > { %v980_v28 = vld [vmem:[%s5563_s7 + $0xd0] sm:$0xff]  ;;  %v983_v29 = vld [vmem:[%s5563_s7 + $0xe8] sm:$0xff]  ;;  %v982_v30 = vld [vmem:[%s5563_s7 + $0xe0] sm:$0xff]  ;;  %s5611_s27 = smov (!%p466_p4, %s3504_s27), 3 }
  0x17   : > { %1013 = vperm.xlu1 %3732, %v959_v5   ;;  %1008 = vperm.xlu0 %3731, %v958_v6   ;;  %v4255_v31 = vld [vmem:[%s4252_s24] sm:$0xff]  ;;  %v4258_v32 = vld [vmem:[%s4252_s24 + $0x8] sm:$0xff]  ;;  %v985_v38 = vld [vmem:[%s5563_s7 + $0xf8] sm:$0xff] }
  0x18   : > { %v634_v33 = vld [vmem:[%s5562_s6 + $0x8] sm:$0xff]  ;;  %v633_v34 = vld [vmem:[%s5562_s6] sm:$0xff]  ;;  %v5572_v35 = vrot.slane %v4255_v31, 7  ;;  %v538_v36 = vrot.slane %v4258_v32, 7  ;;  %v984_v39 = vld [vmem:[%s5563_s7 + $0xf0] sm:$0xff]  ;;  %v3733_v1 = vpack.i.bf16 %v4258_v32, %v4255_v31 }
  0x19   : > { %v4280_v40 = vld [vmem:[%s4252_s24 + $0x10] sm:$0xff]  ;;  %v4283_v41 = vld [vmem:[%s4252_s24 + $0x18] sm:$0xff]  ;;  %v4300_v48 = vld [vmem:[%s4252_s24 + $0x20] sm:$0xff] }
  0x1a   : > { %v4271_v37 = vsel %vm536_vm0, %v5572_v35, %v538_v36  ;;  %v636_v42 = vld [vmem:[%s5562_s6 + $0x18] sm:$0xff]  ;;  %v635_v43 = vld [vmem:[%s5562_s6 + $0x10] sm:$0xff]  ;;  %v540_v44 = vrot.slane %v4280_v40, 7  ;;  %v542_v45 = vrot.slane %v4283_v41, 7  ;;  %v4303_v49 = vld [vmem:[%s4252_s24 + $0x28] sm:$0xff]  ;;  %v544_v52 = vrot.slane %v4300_v48, 7 }
  0x1b   : > { %1023 = vperm.xlu1 %3732, %v961_v7   ;;  %1018 = vperm.xlu0 %3731, %v960_v8   ;;  %v638_v50 = vld [vmem:[%s5562_s6 + $0x28] sm:$0xff]  ;;  %v637_v51 = vld [vmem:[%s5562_s6 + $0x20] sm:$0xff]  ;;  %v546_v53 = vrot.slane %v4303_v49, 7  ;;  %v4320_v56 = vld [vmem:[%s4252_s24 + $0x30] sm:$0xff]  ;;  %v3738_v0 = vpack.i.bf16 %v4283_v41, %v4280_v40 }
  0x1c   : > { %v4294_v46 = vsel %vm536_vm0, %v540_v44, %v542_v45  ;;  %v4297_v47 = vsel %vm536_vm0, %v538_v36, %v540_v44  ;;  %v4317_v55 = vsel %vm536_vm0, %v542_v45, %v544_v52  ;;  %v4323_v57 = vld [vmem:[%s4252_s24 + $0x38] sm:$0xff]  ;;  %v639_v59 = vld [vmem:[%s5562_s6 + $0x30] sm:$0xff]  ;;  %v548_v60 = vrot.slane %v4320_v56, 7  ;;  %v4346_v2 = vld [vmem:[%s4252_s24 + $0x40] sm:$0xff] }
  0x1d   : > { %v4314_v54 = vsel %vm536_vm0, %v544_v52, %v546_v53  ;;  %v640_v58 = vld [vmem:[%s5562_s6 + $0x38] sm:$0xff]  ;;  %v550_v61 = vrot.slane %v4323_v57, 7  ;;  %v4349_v3 = vld [vmem:[%s4252_s24 + $0x48] sm:$0xff]  ;;  %v641_v5 = vld [vmem:[%s5562_s6 + $0x40] sm:$0xff]  ;;  %v552_v6 = vrot.slane %v4346_v2, 7  ;;  %v863_v36 = vrot.slane %v4283_v41, 1 }
  0x1e   : > { %v4337_v63 = vsel %vm536_vm0, %v546_v53, %v548_v60  ;;  %v642_v4 = vld [vmem:[%s5562_s6 + $0x48] sm:$0xff]  ;;  %v5571_v7 = vrot.slane %v4349_v3, 7  ;;  %v867_v52 = vrot.slane %v4303_v49, 1  ;;  %v869_v53 = vrot.slane %v4320_v56, 1 }
  0x1f   : > { %1033 = vperm.xlu1 %3732, %v963_v9   ;;  %1028 = vperm.xlu0 %3731, %v962_v10   ;;  %v4334_v62 = vsel %vm536_vm0, %v548_v60, %v550_v61  ;;  %v4365_v9 = vsel %vm536_vm0, %v550_v61, %v552_v6  ;;  %v644_v10 = vld [vmem:[%s5562_s6 + $0x58] sm:$0xff]  ;;  %v2160_v35 = vld [vmem:[%s5565_s9 + $0x68] sm:$0xff] }
  0x20   : > { %v4362_v8 = vsel %vm536_vm0, %v552_v6, %v5571_v7  ;;  %v873_v6 = vrot.slane %v4346_v2, 1 }
  0x23   : > { %1043 = vperm.xlu1 %3732, %v965_v11   ;;  %1038 = vperm.xlu0 %3731, %v964_v12   ;;  %v643_v11 = vld [vmem:[%s5562_s6 + $0x50] sm:$0xff]  ;;  %v3748_v12 = vpack.i.bf16 %v4323_v57, %v4320_v56 }
  0x27   : > { %1053 = vperm.xlu1 %3732, %v967_v13   ;;  %1048 = vperm.xlu0 %3731, %v966_v14   ;;  %v3743_v13 = vpack.i.bf16 %v4303_v49, %v4300_v48  ;;  %v646_v14 = vld [vmem:[%s5562_s6 + $0x68] sm:$0xff] }
  0x2b   : > { %1063 = vperm.xlu1 %3732, %v969_v15   ;;  %1058 = vperm.xlu0 %3731, %v968_v16   ;;  %v645_v15 = vld [vmem:[%s5562_s6 + $0x60] sm:$0xff]  ;;  %v648_v16 = vld [vmem:[%s5562_s6 + $0x78] sm:$0xff] }
  0x2f   : > { %1073 = vperm.xlu1 %3732, %v971_v17   ;;  %1068 = vperm.xlu0 %3731, %v970_v18   ;;  %v647_v17 = vld [vmem:[%s5562_s6 + $0x70] sm:$0xff] }
  0x30   : > { %v4392_v18 = vld [vmem:[%s4252_s24 + $0x50] sm:$0xff] }
  0x33   : > { %1083 = vperm.xlu1 %3732, %v973_v19   ;;  %1078 = vperm.xlu0 %3731, %v972_v20   ;;  %v4395_v19 = vld [vmem:[%s4252_s24 + $0x58] sm:$0xff] }
  0x34   : > { %v3758_v20 = vpack.i.bf16 %v4395_v19, %v4392_v18 }
  0x37   : > { %1093 = vperm.xlu1 %3732, %v975_v21   ;;  %1088 = vperm.xlu0 %3731, %v974_v22   ;;  %v3753_v21 = vpack.i.bf16 %v4349_v3, %v4346_v2  ;;  %v650_v22 = vld [vmem:[%s5562_s6 + $0x88] sm:$0xff] }
  0x3b   : > { %1103 = vperm.xlu1 %3732, %v977_v23   ;;  %1098 = vperm.xlu0 %3731, %v976_v24   ;;  %v649_v23 = vld [vmem:[%s5562_s6 + $0x80] sm:$0xff]  ;;  %v652_v24 = vld [vmem:[%s5562_s6 + $0x98] sm:$0xff] }
  0x3f   : > { %1113 = vperm.xlu1 %3732, %v979_v25   ;;  %1108 = vperm.xlu0 %3731, %v978_v26   ;;  %v651_v25 = vld [vmem:[%s5562_s6 + $0x90] sm:$0xff] }
  0x40   : > { %v4416_v26 = vld [vmem:[%s4252_s24 + $0x70] sm:$0xff] }
  0x43   : > { %1123 = vperm.xlu1 %3732, %v981_v27   ;;  %1118 = vperm.xlu0 %3731, %v980_v28   ;;  %v4419_v27 = vld [vmem:[%s4252_s24 + $0x78] sm:$0xff]  ;;  %v4422_v28 = vld [vmem:[%s4252_s24 + $0x60] sm:$0xff] }
  0x47   : > { %1133 = vperm.xlu1 %3732, %v983_v29   ;;  %1128 = vperm.xlu0 %3731, %v982_v30   ;;  %v4425_v29 = vld [vmem:[%s4252_s24 + $0x68] sm:$0xff]  ;;  %v3768_v30 = vpack.i.bf16 %v4419_v27, %v4416_v26 }
  0x4b   : > { %672 = vperm.xlu1 %3732, %v634_v33   ;;  %667 = vperm.xlu0 %3731, %v633_v34   ;;  %v3763_v33 = vpack.i.bf16 %v4425_v29, %v4422_v28  ;;  %v861_v34 = vrot.slane %v4280_v40, 1 }
  0x4d   : > { %v864_v40 = vsel %vm857_vm2, %v861_v34, %v863_v36 }
  0x4f   : > { %1143 = vperm.xlu1 %3732, %v985_v38   ;;  %1138 = vperm.xlu0 %3731, %v984_v39   ;;  %v858_v38 = vrot.slane %v4255_v31, 1  ;;  %v859_v39 = vrot.slane %v4258_v32, 1 }
  0x51   : > { %v860_v41 = vsel %vm857_vm2, %v858_v38, %v859_v39  ;;  %v862_v32 = vsel %vm857_vm2, %v859_v39, %v861_v34 }
  0x53   : > { %682 = vperm.xlu1 %3732, %v636_v42   ;;  %677 = vperm.xlu0 %3731, %v635_v43   ;;  %v1484_v42 = vld [vmem:[%s5557_s1] sm:$0x7]  ;;  %v865_v43 = vrot.slane %v4300_v48, 1 }
  0x54   : > { %3712 = vmatprep.subr.msk.bf16.mxu0 %vm1534_vm1, %v1484_v42  ;;  %v1536_v44 = vsel %vm1534_vm1, %v1484_v42, 0 }
  0x55   : > { %3609 = vmatpush3.bf16.msra.mxu0 %v1536_v44  ;;  %v883_v44 = vrot.slane %v4425_v29, 1 }
  0x57   : > { %692 = vperm.xlu1 %3732, %v638_v50   ;;  %687 = vperm.xlu0 %3731, %v637_v51   ;;  %v866_v51 = vsel %vm857_vm2, %v863_v36, %v865_v43 }
  0x5b   : > { %702 = vperm.xlu1 %3732, %v640_v58   ;;  %697 = vperm.xlu0 %3731, %v639_v59  }
  0x5f   : > { %3739 = vrot.lane.b32.xlu1 %v3738_v0, %s4066_s18  ;;  %3734 = vrot.lane.b32.xlu0 %v3733_v1, %s4066_s18  ;;  %v870_v1 = vsel %vm857_vm2, %v867_v52, %v869_v53 }
  0x63   : > { %712 = vperm.xlu1 %3732, %v642_v4   ;;  %707 = vperm.xlu0 %3731, %v641_v5   ;;  %v868_v4 = vsel %vm857_vm2, %v865_v43, %v867_v52  ;;  %v871_v5 = vrot.slane %v4323_v57, 1  ;;  %v877_v57 = vrot.slane %v4392_v18, 1 }
  0x67   : > { %722 = vperm.xlu1 %3732, %v644_v10   ;;  %717 = vperm.xlu0 %3731, %v643_v11  }
  0x6b   : > { %3749 = vrot.lane.b32.xlu1 %v3748_v12, %s4066_s18  ;;  %3744 = vrot.lane.b32.xlu0 %v3743_v13, %s4066_s18 }
  0x6f   : > { %732 = vperm.xlu1 %3732, %v646_v14   ;;  %727 = vperm.xlu0 %3731, %v645_v15   ;;  %v874_v14 = vsel %vm857_vm2, %v871_v5, %v873_v6  ;;  %v872_v15 = vsel %vm857_vm2, %v869_v53, %v871_v5 }
  0x73   : > { %742 = vperm.xlu1 %3732, %v648_v16   ;;  %737 = vperm.xlu0 %3731, %v647_v17   ;;  %v875_v16 = vrot.slane %v4349_v3, 1 }
  0x77   : > { %3759 = vrot.lane.b32.xlu1 %v3758_v20, %s4066_s18  ;;  %3754 = vrot.lane.b32.xlu0 %v3753_v21, %s4066_s18 }
  0x7b   : > { %752 = vperm.xlu1 %3732, %v650_v22   ;;  %747 = vperm.xlu0 %3731, %v649_v23   ;;  %v878_v23 = vsel %vm857_vm2, %v875_v16, %v877_v57 }
  0x7f   : > { %762 = vperm.xlu1 %3732, %v652_v24   ;;  %757 = vperm.xlu0 %3731, %v651_v25   ;;  %v876_v24 = vsel %vm857_vm2, %v873_v6, %v875_v16  ;;  %v879_v25 = vrot.slane %v4395_v19, 1 }
  0x81   : > { %v880_v43 = vsel %vm857_vm2, %v877_v57, %v879_v25 }
  0x83   : > { %3769 = vrot.lane.b32.xlu1 %v3768_v30, %s4066_s18  ;;  %3764 = vrot.lane.b32.xlu0 %v3763_v33, %s4066_s18  ;;  %v881_v30 = vrot.slane %v4422_v28, 1 }
  0x85   : > { %v882_v42 = vsel %vm857_vm2, %v879_v25, %v881_v30 }
  0x8e   : > { %v999_v45 = vpop.permute.xlu1 %998  ;;  %v989_v50 = vpop.permute.xlu0 %988 }
  0x8f   : > { %v1148_v48 = vmul.f32 %v999_v45, %v864_v40  ;;  %v1146_v60 = vmul.f32 %v989_v50, %v860_v41  ;;  %v885_v45 = vrot.slane %v4416_v26, 1  ;;  %v4468_v40 = vld [vmem:[%s4252_s24 + $0x80] sm:$0xff] }
  0x91   : > { %v886_v53 = vsel %vm857_vm2, %v883_v44, %v885_v45 }
  0x92   : > { %v1004_v58 = vpop.permute.xlu1 %1003  ;;  %v994_v59 = vpop.permute.xlu0 %993 }
  0x93   : > { %v1149_v61 = vmul.f32 %v1004_v58, %v866_v51  ;;  %v1147_v0 = vmul.f32 %v994_v59, %v862_v32  ;;  %v884_v58 = vsel %vm857_vm2, %v881_v30, %v883_v44  ;;  %v887_v59 = vrot.slane %v4419_v27, 1 }
  0x95   : > { %v3778_v10 = vpack.i.bf16 %v1149_v61, %v1148_v48  ;;  %v3773_v11 = vpack.i.bf16 %v1147_v0, %v1146_v60  ;;  %v889_v48 = vrot.slane %v4468_v40, 1  ;;  %v888_v6 = vsel %vm857_vm2, %v885_v45, %v887_v59 }
  0x96   : > { %v1014_v12 = vpop.permute.xlu1 %1013  ;;  %v1009_v49 = vpop.permute.xlu0 %1008 }
  0x97   : > { %v1151_v13 = vmul.f32 %v1014_v12, %v870_v1  ;;  %v1150_v56 = vmul.f32 %v1009_v49, %v868_v4  ;;  %3779 = vrot.lane.b32.xlu1 %v3778_v10, %s4067_s21  ;;  %3774 = vrot.lane.b32.xlu0 %v3773_v11, %s4067_s21  ;;  %v890_v5 = vsel %vm857_vm2, %v887_v59, %v889_v48 }
  0x99   : > { %v3783_v2 = vpack.i.bf16 %v1151_v13, %v1150_v56  ;;  %v4480_v56 = vld [vmem:[%s4252_s24 + $0x88] sm:$0xff] }
  0x9a   : > { %v1024_v17 = vpop.permute.xlu1 %1023  ;;  %v1019_v20 = vpop.permute.xlu0 %1018 }
  0x9b   : > { %v1153_v21 = vmul.f32 %v1024_v17, %v874_v14  ;;  %v1152_v22 = vmul.f32 %v1019_v20, %v872_v15  ;;  %3784 = vrot.lane.b32.xlu0 %v3783_v2, %s4067_s21  ;;  %v4483_v14 = vld [vmem:[%s4252_s24 + $0x90] sm:$0xff]  ;;  %v653_v15 = vld [vmem:[%s5562_s6 + $0xa0] sm:$0xff]  ;;  %v891_v2 = vrot.slane %v4480_v56, 1 }
  0x9c   : > { %v893_v17 = vrot.slane %v4483_v14, 1 }
  0x9d   : > { %v3788_v33 = vpack.i.bf16 %v1153_v21, %v1152_v22  ;;  %v4492_v21 = vld [vmem:[%s4252_s24 + $0x98] sm:$0xff]  ;;  %v4495_v22 = vld [vmem:[%s4252_s24 + $0xa0] sm:$0xff]  ;;  %v892_v30 = vsel %vm857_vm2, %v889_v48, %v891_v2 }
  0x9e   : > { %v1034_v34 = vpop.permute.xlu1 %1033  ;;  %v1029_v36 = vpop.permute.xlu0 %1028  ;;  %v894_v25 = vsel %vm857_vm2, %v891_v2, %v893_v17 }
  0x9f   : > { %v1155_v38 = vmul.f32 %v1034_v34, %v878_v23  ;;  %v1154_v39 = vmul.f32 %v1029_v36, %v876_v24  ;;  %3789 = vrot.lane.b32.xlu1 %v3788_v33, %s4067_s21  ;;  %v654_v23 = vld [vmem:[%s5562_s6 + $0xa8] sm:$0xff]  ;;  %v655_v24 = vld [vmem:[%s5562_s6 + $0xb0] sm:$0xff]  ;;  %v895_v34 = vrot.slane %v4492_v21, 1  ;;  %v897_v36 = vrot.slane %v4495_v22, 1 }
  0xa1   : > { %v3793_v50 = vpack.i.bf16 %v1155_v38, %v1154_v39  ;;  %v3813_v39 = vpack.i.bf16 %v4480_v56, %v4468_v40  ;;  %v898_v45 = vsel %vm857_vm2, %v895_v34, %v897_v36 }
  0xa2   : > { %v1044_v41 = vpop.permute.xlu1 %1043  ;;  %v1039_v51 = vpop.permute.xlu0 %1038 }
  0xa3   : > { %v1157_v32 = vmul.f32 %v1044_v41, %v882_v42  ;;  %v1156_v52 = vmul.f32 %v1039_v51, %v880_v43  ;;  %3794 = vrot.lane.b32.xlu0 %v3793_v50, %s4067_s21  ;;  %v656_v42 = vld [vmem:[%s5562_s6 + $0xb8] sm:$0xff]  ;;  %v896_v50 = vsel %vm857_vm2, %v893_v17, %v895_v34 }
  0xa5   : > { %v3798_v60 = vpack.i.bf16 %v1157_v32, %v1156_v52  ;;  %v3818_v32 = vpack.i.bf16 %v4492_v21, %v4483_v14 }
  0xa6   : > { %v1054_v61 = vpop.permute.xlu1 %1053  ;;  %v1049_v0 = vpop.permute.xlu0 %1048 }
  0xa7   : > { %v1159_v1 = vmul.f32 %v1054_v61, %v886_v53  ;;  %v1158_v4 = vmul.f32 %v1049_v0, %v884_v58  ;;  %3799 = vrot.lane.b32.xlu1 %v3798_v60, %s4067_s21  ;;  %v4518_v60 = vld [vmem:[%s4252_s24 + $0xa8] sm:$0xff]  ;;  %v4521_v61 = vld [vmem:[%s4252_s24 + $0xb0] sm:$0xff]  ;;  %v657_v0 = vld [vmem:[%s5562_s6 + $0xc0] sm:$0xff] }
  0xa8   : > { %5584 = vst [vmem:[#allocation6_spill] sm:$0xff] %v4518_v60  ;;  %5585 = vst [vmem:[#allocation7_spill] sm:$0xff] %v4521_v61 }
  0xa9   : > { %v3803_v10 = vpack.i.bf16 %v1159_v1, %v1158_v4  ;;  %v899_v4 = vrot.slane %v4518_v60, 1 }
  0xaa   : > { %v1064_v11 = vpop.permute.xlu1 %1063  ;;  %v1059_v12 = vpop.permute.xlu0 %1058 }
  0xab   : > { %v1161_v49 = vmul.f32 %v1064_v11, %v890_v5  ;;  %v1160_v13 = vmul.f32 %v1059_v12, %v888_v6  ;;  %3804 = vrot.lane.b32.xlu0 %v3803_v10, %s4067_s21  ;;  %v901_v5 = vrot.slane %v4521_v61, 1  ;;  %v4531_v11 = vld [vmem:[%s4252_s24 + $0xb8] sm:$0xff]  ;;  %v4534_v12 = vld [vmem:[%s4252_s24 + $0xc0] sm:$0xff] }
  0xac   : > { %5586 = vst [vmem:[#allocation8_spill] sm:$0xff] %v4531_v11  ;;  %5587 = vst [vmem:[#allocation9_spill] sm:$0xff] %v4534_v12  ;;  %v905_v2 = vrot.slane %v4534_v12, 1 }
  0xad   : > { %v3808_v16 = vpack.i.bf16 %v1161_v49, %v1160_v13  ;;  %v658_v49 = vld [vmem:[%s5562_s6 + $0xc8] sm:$0xff]  ;;  %v659_v13 = vld [vmem:[%s5562_s6 + $0xd0] sm:$0xff] }
  0xae   : > { %v1074_v57 = vpop.permute.xlu1 %1073  ;;  %v1069_v20 = vpop.permute.xlu0 %1068 }
  0xaf   : > { %3809 = vrot.lane.b32.xlu1 %v3808_v16, %s4067_s21  ;;  %767 = vperm.xlu0 %3731, %v653_v15   ;;  %v1163_v43 = vmul.f32 %v1074_v57, %v894_v25  ;;  %v1162_v44 = vmul.f32 %v1069_v20, %v892_v30  ;;  %v902_v15 = vsel %vm857_vm2, %v899_v4, %v901_v5  ;;  %v903_v57 = vrot.slane %v4531_v11, 1 }
  0xb0   : > { %v900_v16 = vsel %vm857_vm2, %v897_v36, %v899_v4  ;;  %v662_v4 = vld [vmem:[%s5562_s6 + $0xe8] sm:$0xff] }
  0xb1   : > { %v3823_v52 = vpack.i.bf16 %v1163_v43, %v1162_v44  ;;  %v904_v34 = vsel %vm857_vm2, %v901_v5, %v903_v57  ;;  %v663_v5 = vld [vmem:[%s5562_s6 + $0xf0] sm:$0xff] }
  0xb2   : > { %v1084_v33 = vpop.permute.xlu1 %1083  ;;  %v1079_v38 = vpop.permute.xlu0 %1078 }
  0xb3   : > { %772 = vperm.xlu1 %3732, %v654_v23   ;;  %777 = vperm.xlu0 %3731, %v655_v24   ;;  %v1165_v53 = vmul.f32 %v1084_v33, %v898_v45  ;;  %v1164_v58 = vmul.f32 %v1079_v38, %v896_v50  ;;  %v3833_v23 = vpack.i.bf16 %v4518_v60, %v4495_v22  ;;  %v660_v24 = vld [vmem:[%s5562_s6 + $0xd8] sm:$0xff] }
  0xb4   : > { %v906_v33 = vsel %vm857_vm2, %v903_v57, %v905_v2 }
  0xb5   : > { %v3828_v1 = vpack.i.bf16 %v1165_v53, %v1164_v58 }
  0xb6   : > { %v1094_v41 = vpop.permute.xlu1 %1093  ;;  %v1089_v51 = vpop.permute.xlu0 %1088 }
  0xb7   : > { %782 = vperm.xlu1 %3732, %v656_v42   ;;  %3814 = vrot.lane.b32.xlu0 %v3813_v39, %s4066_s18  ;;  %v1167_v25 = vmul.f32 %v1094_v41, %v902_v15  ;;  %v1166_v30 = vmul.f32 %v1089_v51, %v900_v16  ;;  %v3838_v39 = vpack.i.bf16 %v4531_v11, %v4521_v61  ;;  %v4562_v41 = vld [vmem:[%s4252_s24 + $0xc8] sm:$0xff]  ;;  %v4565_v51 = vld [vmem:[%s4252_s24 + $0xd0] sm:$0xff] }
  0xb8   : > { %5588 = vst [vmem:[#allocation10_spill] sm:$0xff] %v4562_v41  ;;  %5589 = vst [vmem:[#allocation11_spill] sm:$0xff] %v4565_v51  ;;  %v907_v53 = vrot.slane %v4562_v41, 1  ;;  %v909_v58 = vrot.slane %v4565_v51, 1 }
  0xb9   : > { %v3843_v42 = vpack.i.bf16 %v1167_v25, %v1166_v30  ;;  %v4599_v25 = vld [vmem:[%s4252_s24 + $0xf0] sm:$0xff]  ;;  %v3853_v30 = vpack.i.bf16 %v4562_v41, %v4534_v12  ;;  %v1988_v41 = vld [vmem:[%s5564_s8 + $0x8] sm:$0xff] }
  0xba   : > { %v1104_v59 = vpop.permute.xlu1 %1103  ;;  %v1099_v48 = vpop.permute.xlu0 %1098  ;;  %5593 = vst [vmem:[#allocation15_spill] sm:$0xff] %v4599_v25 }
  0xbb   : > { %3819 = vrot.lane.b32.xlu1 %v3818_v32, %s4066_s18  ;;  %3824 = vrot.lane.b32.xlu0 %v3823_v52, %s4067_s21  ;;  %v1169_v43 = vmul.f32 %v1104_v59, %v906_v33  ;;  %v1168_v44 = vmul.f32 %v1099_v48, %v904_v34  ;;  %v661_v32 = vld [vmem:[%s5562_s6 + $0xe0] sm:$0xff] }
  0xbd   : > { %v3848_v52 = vpack.i.bf16 %v1169_v43, %v1168_v44  ;;  %v917_v44 = vrot.slane %v4599_v25, 1 }
  0xbe   : > { %v1114_v6 = vpop.permute.xlu1 %1113  ;;  %v1109_v10 = vpop.permute.xlu0 %1108 }
  0xbf   : > { %3829 = vrot.lane.b32.xlu1 %v3828_v1, %s4067_s21  ;;  %787 = vperm.xlu0 %3731, %v657_v0   ;;  %v4575_v0 = vld [vmem:[%s4252_s24 + $0xd8] sm:$0xff]  ;;  %v4578_v1 = vld [vmem:[%s4252_s24 + $0xe0] sm:$0xff] }
  0xc0   : > { %5590 = vst [vmem:[#allocation12_spill] sm:$0xff] %v4575_v0  ;;  %5591 = vst [vmem:[#allocation13_spill] sm:$0xff] %v4578_v1  ;;  %v911_v15 = vrot.slane %v4575_v0, 1  ;;  %v913_v16 = vrot.slane %v4578_v1, 1 }
  0xc2   : > { %v1124_v17 = vpop.permute.xlu1 %1123  ;;  %v1119_v20 = vpop.permute.xlu0 %1118 }
  0xc3   : > { %792 = vperm.xlu1 %3732, %v658_v49   ;;  %797 = vperm.xlu0 %3731, %v659_v13   ;;  %v910_v49 = vsel %vm857_vm2, %v907_v53, %v909_v58  ;;  %v908_v13 = vsel %vm857_vm2, %v905_v2, %v907_v53  ;;  %v664_v2 = vld [vmem:[%s5562_s6 + $0xf8] sm:$0xff] }
  0xc4   : > { %v1171_v33 = vmul.f32 %v1114_v6, %v910_v49  ;;  %v1170_v34 = vmul.f32 %v1109_v10, %v908_v13  ;;  %v4615_v53 = vld [vmem:[%s4252_s24 + $0xf8] sm:$0xff]  ;;  %v3858_v6 = vpack.i.bf16 %v4575_v0, %v4565_v51 }
  0xc5   : > { %5594 = vst [vmem:[#allocation16_spill] sm:$0xff] %v4615_v53  ;;  %v919_v13 = vrot.slane %v4615_v53, 1 }
  0xc6   : > { %v1134_v36 = vpop.permute.xlu1 %1133  ;;  %v1129_v38 = vpop.permute.xlu0 %1128  ;;  %v3863_v10 = vpack.i.bf16 %v1171_v33, %v1170_v34 }
  0xc7   : > { %802 = vperm.xlu1 %3732, %v660_v24   ;;  %3834 = vrot.lane.b32.xlu0 %v3833_v23, %s4066_s18  ;;  %v4596_v24 = vld [vmem:[%s4252_s24 + $0xe8] sm:$0xff]  ;;  %v953_v33 = vsel %vm857_vm2, %v919_v13, %v4615_v53 }
  0xc8   : > { %5592 = vst [vmem:[#allocation14_spill] sm:$0xff] %v4596_v24  ;;  %v915_v43 = vrot.slane %v4596_v24, 1 }
  0xca   : > { %v4557_v45 = vpop.permute.xlu1 %672  ;;  %v4559_v50 = vpop.permute.xlu0 %667  ;;  %v916_v49 = vsel %vm857_vm2, %v913_v16, %v915_v43 }
  0xcb   : > { %3839 = vrot.lane.b32.xlu1 %v3838_v39, %s4066_s18  ;;  %3844 = vrot.lane.b32.xlu0 %v3843_v42, %s4067_s21  ;;  %v914_v39 = vsel %vm857_vm2, %v911_v15, %v913_v16  ;;  %v912_v42 = vsel %vm857_vm2, %v909_v58, %v911_v15  ;;  %v918_v58 = vsel %vm857_vm2, %v915_v43, %v917_v44 }
  0xcc   : > { %v920_v16 = vsel %vm857_vm2, %v917_v44, %v919_v13  ;;  %v2147_v44 = vld [vmem:[%s5565_s9] sm:$0xff] }
  0xce   : > { %v1144_v59 = vpop.permute.xlu1 %1143  ;;  %v1139_v48 = vpop.permute.xlu0 %1138 }
  0xcf   : > { %3849 = vrot.lane.b32.xlu1 %v3848_v52, %s4067_s21  ;;  %807 = vperm.xlu0 %3731, %v661_v32  }
  0xd2   : > { %v4591_v57 = vpop.permute.xlu1 %682  ;;  %v4593_v23 = vpop.permute.xlu0 %677 }
  0xd3   : > { %812 = vperm.xlu1 %3732, %v662_v4   ;;  %817 = vperm.xlu0 %3731, %v663_v5   ;;  %v1173_v4 = vmul.f32 %v1124_v17, %v914_v39  ;;  %v1172_v5 = vmul.f32 %v1119_v20, %v912_v42  ;;  %v1175_v17 = vmul.f32 %v1134_v36, %v918_v58 }
  0xd4   : > { %v1174_v20 = vmul.f32 %v1129_v38, %v916_v49  ;;  %v3878_v42 = vpack.i.bf16 %v4615_v53, %v4599_v25  ;;  %v1176_v36 = vmul.f32 %v1139_v48, %v920_v16  ;;  %v2149_v48 = vld [vmem:[%s5565_s9 + $0x10] sm:$0xff]  ;;  %v1987_v53 = vld [vmem:[%s5564_s8] sm:$0xff]  ;;  %v827_v0 = vmul.f32 %v4593_v23, %v4297_v47 }
  0xd5   : > { %v2153_v16 = vld [vmem:[%s5565_s9 + $0x30] sm:$0xff] }
  0xd6   : > { %v4610_v32 = vpop.permute.xlu1 %692  ;;  %v4612_v52 = vpop.permute.xlu0 %687  ;;  %v3883_v43 = vpack.i.bf16 %v1175_v17, %v1174_v20 }
  0xd7   : > { %822 = vperm.xlu1 %3732, %v664_v2   ;;  %3854 = vrot.lane.b32.xlu0 %v3853_v30, %s4066_s18  ;;  %v3873_v30 = vpack.i.bf16 %v4596_v24, %v4578_v1  ;;  %v3868_v2 = vpack.i.bf16 %v1173_v4, %v1172_v5  ;;  %v5595_v1 = vrot.slane %v4255_v31, 7 }
  0xda   : > { %v4623_v15 = vpop.permute.xlu1 %702  ;;  %v4625_v7 = vpop.permute.xlu0 %697 }
  0xdb   : > { %3859 = vrot.lane.b32.xlu1 %v3858_v6, %s4066_s18  ;;  %3864 = vrot.lane.b32.xlu0 %v3863_v10, %s4067_s21  ;;  %v1177_v6 = vmul.f32 %v1144_v59, %v953_v33  ;;  %v2148_v59 = vld [vmem:[%s5565_s9 + $0x8] sm:$0xff] }
  0xdc   : > { %v2152_v33 = vld [vmem:[%s5565_s9 + $0x28] sm:$0xff] }
  0xdd   : > { %v3888_v4 = vpack.i.bf16 %v1177_v6, %v1176_v36  ;;  %v2154_v6 = vld [vmem:[%s5565_s9 + $0x38] sm:$0xff]  ;;  %v2155_v36 = vld [vmem:[%s5565_s9 + $0x40] sm:$0xff] }
  0xde   : > { %v4634_v34 = vpop.permute.xlu1 %3739  ;;  %v4636_v39 = vpop.permute.xlu0 %3734 }
  0xdf   : > { %3869 = vrot.lane.b32.xlu1 %v3868_v2, %s4067_s21  ;;  %3874 = vrot.lane.b32.xlu0 %v3873_v30, %s4066_s18  ;;  %v2150_v30 = vld [vmem:[%s5565_s9 + $0x18] sm:$0xff]  ;;  %v2151_v2 = vld [vmem:[%s5565_s9 + $0x20] sm:$0xff]  ;;  %v3737_v51 = vunpack.i.h.bf16 %v4636_v39 }
  0xe2   : > { %v4642_v38 = vpop.permute.xlu1 %712  ;;  %v4644_v10 = vpop.permute.xlu0 %707 }
  0xe3   : > { %3879 = vrot.lane.b32.xlu1 %v3878_v42, %s4066_s18  ;;  %3884 = vrot.lane.b32.xlu0 %v3883_v43, %s4067_s21  ;;  %s3505_s18 = sshll.u32 %s5611_s27, 3 }
  0xe6   : > { %v4651_v5 = vpop.permute.xlu1 %722  ;;  %v4653_v58 = vpop.permute.xlu0 %717 }
  0xe7   : > { %3889 = vrot.lane.b32.xlu1 %v3888_v4, %s4067_s21  ;;  %2165 = vperm.xlu0 %3731, %v2147_v44   ;;  %s4068_s21 = smov 8  }
  0xea   : > { %v4662_v49 = vpop.permute.xlu1 %3749  ;;  %v4664_v13 = vpop.permute.xlu0 %3744 }
  0xeb   : > { %2170 = vperm.xlu1 %3732, %v2148_v59   ;;  %2175 = vperm.xlu0 %3731, %v2149_v48   ;;  %v2156_v59 = vld [vmem:[%s5565_s9 + $0x48] sm:$0xff]  ;;  %v2157_v48 = vld [vmem:[%s5565_s9 + $0x50] sm:$0xff]  ;;  %v3747_v61 = vunpack.i.h.bf16 %v4664_v13  ;;  %v3746_v60 = vunpack.i.l.bf16 %v4664_v13 }
  0xee   : > { %v4672_v17 = vpop.permute.xlu1 %732  ;;  %v4674_v20 = vpop.permute.xlu0 %727 }
  0xef   : > { %2180 = vperm.xlu1 %3732, %v2150_v30   ;;  %2185 = vperm.xlu0 %3731, %v2151_v2  }
  0xf2   : > { %v4682_v42 = vpop.permute.xlu1 %742  ;;  %v4684_v43 = vpop.permute.xlu0 %737 }
  0xf3   : > { %2190 = vperm.xlu1 %3732, %v2152_v33   ;;  %2195 = vperm.xlu0 %3731, %v2153_v16   ;;  %v2158_v33 = vld [vmem:[%s5565_s9 + $0x58] sm:$0xff]  ;;  %v2159_v16 = vld [vmem:[%s5565_s9 + $0x60] sm:$0xff] }
  0xf6   : > { %v4692_v44 = vpop.permute.xlu1 %3759  ;;  %v4694_v4 = vpop.permute.xlu0 %3754 }
  0xf7   : > { %2200 = vperm.xlu1 %3732, %v2154_v6   ;;  %2205 = vperm.xlu0 %3731, %v2155_v36  }
  0xfa   : > { %v4702_v30 = vpop.permute.xlu1 %752  ;;  %v4704_v2 = vpop.permute.xlu0 %747 }
  0xfb   : > { %2210 = vperm.xlu1 %3732, %v2156_v59   ;;  %2215 = vperm.xlu0 %3731, %v2157_v48   ;;  %v2161_v59 = vld [vmem:[%s5565_s9 + $0x70] sm:$0xff]  ;;  %v2162_v48 = vld [vmem:[%s5565_s9 + $0x78] sm:$0xff] }
  0xfe   : > { %v4712_v6 = vpop.permute.xlu1 %762  ;;  %v4714_v36 = vpop.permute.xlu0 %757 }
  0xff   : > { %2220 = vperm.xlu1 %3732, %v2158_v33   ;;  %2225 = vperm.xlu0 %3731, %v2159_v16   ;;  %v3742_v33 = vunpack.i.h.bf16 %v4634_v34  ;;  %v3741_v16 = vunpack.i.l.bf16 %v4634_v34  ;;  %v3736_v34 = vunpack.i.l.bf16 %v4636_v39 }
 0x102   : > { %v4730_v25 = vpop.permute.xlu1 %3769  ;;  %v4732_v24 = vpop.permute.xlu0 %3764 }
 0x103   : > { %2230 = vperm.xlu1 %3732, %v2160_v35   ;;  %2235 = vperm.xlu0 %3731, %v2161_v59   ;;  %v632_v35 = vsel %vm536_vm0, %v4255_v31, %v5595_v1  ;;  %v828_v59 = vmul.f32 %v4591_v57, %v4294_v46  ;;  %v1989_v31 = vld [vmem:[%s5564_s8 + $0x10] sm:$0xff]  ;;  %v826_v46 = vmul.f32 %v4557_v45, %v4271_v37 }
 0x104   : > { %v825_v47 = vmul.f32 %v4559_v50, %v632_v35  ;;  %v1405_v1 = vsel %vm1402_vm3, %v827_v0, %v3741_v16  ;;  %v1991_v16 = vld [vmem:[%s5564_s8 + $0x20] sm:$0xff]  ;;  %v830_v35 = vmul.f32 %v4610_v32, %v4314_v54  ;;  %v1993_v32 = vld [vmem:[%s5564_s8 + $0x30] sm:$0xff] }
 0x105   : > { %v1406_v57 = vsel %vm1402_vm3, %v828_v59, %v3742_v33  ;;  %v1404_v45 = vsel %vm1402_vm3, %v826_v46, %v3737_v51  ;;  %v1990_v33 = vld [vmem:[%s5564_s8 + $0x18] sm:$0xff]  ;;  %v829_v51 = vmul.f32 %v4612_v52, %v4317_v55  ;;  %v1992_v55 = vld [vmem:[%s5564_s8 + $0x28] sm:$0xff] }
 0x106   : > { %v1403_v37 = vsel %vm1402_vm3, %v825_v47, %v3736_v34 }
 0x107   : > { %2240 = vperm.xlu1 %3732, %v2162_v48   ;;  %2005 = vperm.xlu0 %3731, %v1987_v53  }
 0x109   : > { %v3780_v23 = vpop.permute.xlu1 %3779  ;;  %v3775_v53 = vpop.permute.xlu0 %3774 }
 0x10a   : > { %v3782_v39 = vunpack.i.h.bf16 %v3780_v23  ;;  %v3781_v48 = vunpack.i.l.bf16 %v3780_v23  ;;  %v3777_v12 = vunpack.i.h.bf16 %v3775_v53  ;;  %v3776_v11 = vunpack.i.l.bf16 %v3775_v53 }
 0x10b   : > { %2010 = vperm.xlu1 %3732, %v1988_v41   ;;  %2015 = vperm.xlu0 %3731, %v1989_v31   ;;  %v1408_v23 = vsel %vm1402_vm3, %v830_v35, %v3747_v61  ;;  %v832_v61 = vmul.f32 %v4623_v15, %v4334_v62  ;;  %v556_v53 = vrot.slane %v4392_v18, 7  ;;  %v3756_v62 = vunpack.i.l.bf16 %v4694_v4  ;;  %v1994_v15 = vld [vmem:[%s5564_s8 + $0x38] sm:$0xff] }
 0x10c   : > { %v1438_v50 = vsel %vm1435_vm4, %v1405_v1, %v3781_v48  ;;  %v1439_v0 = vsel %vm1435_vm4, %v1406_v57, %v3782_v39  ;;  %v1436_v13 = vsel %vm1435_vm4, %v1403_v37, %v3776_v11  ;;  %v1437_v41 = vsel %vm1435_vm4, %v1404_v45, %v3777_v12 }
 0x10d   : > { %v3785_v59 = vpop.permute.xlu0 %3784  ;;  %v1468_v34 = vpack.c.bf16 %v1437_v41, %v1436_v13  ;;  %v1469_v31 = vpack.c.bf16 %v1439_v0, %v1438_v50  ;;  %v3752_v1 = vunpack.i.h.bf16 %v4662_v49  ;;  %v3751_v57 = vunpack.i.l.bf16 %v4662_v49 }
 0x10e   : > { %v3787_v46 = vunpack.i.h.bf16 %v3785_v59  ;;  %v3786_v47 = vunpack.i.l.bf16 %v3785_v59  ;;  %v1407_v11 = vsel %vm1402_vm3, %v829_v51, %v3746_v60  ;;  %v831_v60 = vmul.f32 %v4625_v7, %v4337_v63 }
 0x10f   : > { %2020 = vperm.xlu1 %3732, %v1990_v33   ;;  %2025 = vperm.xlu0 %3731, %v1991_v16   ;;  %v558_v39 = vrot.slane %v4395_v19, 7  ;;  %v1410_v45 = vsel %vm1402_vm3, %v832_v61, %v3752_v1  ;;  %v3757_v0 = vunpack.i.h.bf16 %v4694_v4  ;;  %v560_v63 = vrot.slane %v4422_v28, 7  ;;  %v1995_v4 = vld [vmem:[%s5564_s8 + $0x40] sm:$0xff] }
 0x110   : > { %v1441_v54 = vsel %vm1435_vm4, %v1408_v23, %v3787_v46  ;;  %v1440_v12 = vsel %vm1435_vm4, %v1407_v11, %v3786_v47  ;;  %3610 = vmatprep.mubr.msk.bf16.mxu0 %vm1485_vm5, %v1468_v34  ;;  %v1409_v50 = vsel %vm1402_vm3, %v831_v60, %v3751_v57  ;;  %v562_v7 = vrot.slane %v4425_v29, 7 }
 0x111   : > { %3611 = vmatmul.mubr.msk.bf16.vlgmr.msra.gmra.mrb[0].mxu0 %vm1485_vm5, %v1469_v31  ;;  %v3790_v52 = vpop.permute.xlu1 %3789  ;;  %v1470_v49 = vpack.c.bf16 %v1441_v54, %v1440_v12  ;;  %v834_v33 = vmul.f32 %v4642_v38, %v4362_v8  ;;  %v833_v28 = vmul.f32 %v4644_v10, %v4365_v9  ;;  %v559_v13 = vsel %vm536_vm0, %v556_v53, %v558_v39  ;;  %v1996_v10 = vld [vmem:[%s5564_s8 + $0x48] sm:$0xff] }
 0x112   : > { %v3792_v48 = vunpack.i.h.bf16 %v3790_v52  ;;  %v3791_v37 = vunpack.i.l.bf16 %v3790_v52  ;;  %v5596_v41 = vrot.slane %v4349_v3, 7  ;;  %v3762_v34 = vunpack.i.h.bf16 %v4692_v44 }
 0x113   : > { %2030 = vperm.xlu1 %3732, %v1992_v55   ;;  %2035 = vperm.xlu0 %3731, %v1993_v32   ;;  %v3761_v31 = vunpack.i.l.bf16 %v4692_v44  ;;  %v1412_v46 = vsel %vm1402_vm3, %v834_v33, %v3757_v0  ;;  %v1411_v8 = vsel %vm1402_vm3, %v833_v28, %v3756_v62  ;;  %v563_v9 = vsel %vm536_vm0, %v560_v63, %v562_v7  ;;  %v1997_v44 = vld [vmem:[%s5564_s8 + $0x50] sm:$0xff] }
 0x114   : > { %v1443_v18 = vsel %vm1435_vm4, %v1410_v45, %v3792_v48  ;;  %v1442_v19 = vsel %vm1435_vm4, %v1409_v50, %v3791_v37  ;;  %3614 = vmatprep.mubr.msk.bf16.mxu0 %vm1485_vm5, %v1470_v49  ;;  %v557_v35 = vsel %vm536_vm0, %v5596_v41, %v556_v53  ;;  %v836_v47 = vmul.f32 %v4651_v5, %v559_v13 }
 0x115   : > { %v3795_v29 = vpop.permute.xlu0 %3794  ;;  %v1471_v16 = vpack.c.bf16 %v1443_v18, %v1442_v19  ;;  %v835_v1 = vmul.f32 %v4653_v58, %v557_v35  ;;  %v561_v57 = vsel %vm536_vm0, %v558_v39, %v560_v63  ;;  %v564_v54 = vrot.slane %v4416_v26, 7  ;;  %v1998_v26 = vld [vmem:[%s5564_s8 + $0x58] sm:$0xff] }
 0x116   : > { %v3797_v51 = vunpack.i.h.bf16 %v3795_v29  ;;  %v3796_v59 = vunpack.i.l.bf16 %v3795_v29  ;;  %v566_v12 = vrot.slane %v4419_v27, 7  ;;  %v1414_v61 = vsel %vm1402_vm3, %v836_v47, %v3762_v34  ;;  %v1999_v27 = vld [vmem:[%s5564_s8 + $0x60] sm:$0xff] }
 0x117   : > { %2040 = vperm.xlu1 %3732, %v1994_v15   ;;  %2045 = vperm.xlu0 %3731, %v1995_v4   ;;  %v1413_v60 = vsel %vm1402_vm3, %v835_v1, %v3761_v31  ;;  %v3767_v5 = vunpack.i.h.bf16 %v4732_v24  ;;  %v3766_v58 = vunpack.i.l.bf16 %v4732_v24  ;;  %v838_v53 = vmul.f32 %v4672_v17, %v563_v9  ;;  %v2001_v15 = vld [vmem:[%s5564_s8 + $0x70] sm:$0xff] }
 0x118   : > { %v1445_v38 = vsel %vm1435_vm4, %v1412_v46, %v3797_v51  ;;  %v1444_v3 = vsel %vm1435_vm4, %v1411_v8, %v3796_v59  ;;  %v837_v24 = vmul.f32 %v4674_v20, %v561_v57  ;;  %v567_v37 = vsel %vm536_vm0, %v564_v54, %v566_v12 }
 0x119   : > { %3615 = vmatmul.mubr.msk.bf16.gmra.mrb[4].mxu0 %vm1485_vm5, %v1471_v16  ;;  %v3800_v23 = vpop.permute.xlu1 %3799  ;;  %v1472_v11 = vpack.c.bf16 %v1445_v38, %v1444_v3  ;;  %v565_v45 = vsel %vm536_vm0, %v562_v7, %v564_v54  ;;  %v3772_v62 = vunpack.i.h.bf16 %v4730_v25  ;;  %v3771_v63 = vunpack.i.l.bf16 %v4730_v25  ;;  %v2000_v7 = vld [vmem:[%s5564_s8 + $0x68] sm:$0xff] }
 0x11a   : > { %v3802_v55 = vunpack.i.h.bf16 %v3800_v23  ;;  %v3801_v32 = vunpack.i.l.bf16 %v3800_v23  ;;  %v1416_v18 = vsel %vm1402_vm3, %v838_v53, %v3767_v5  ;;  %v1415_v19 = vsel %vm1402_vm3, %v837_v24, %v3766_v58 }
 0x11b   : > { %2050 = vperm.xlu1 %3732, %v1996_v10   ;;  %2055 = vperm.xlu0 %3731, %v1997_v44   ;;  %v840_v25 = vmul.f32 %v4682_v42, %v567_v37  ;;  %v839_v4 = vmul.f32 %v4684_v43, %v565_v45  ;;  %v2002_v42 = vld [vmem:[%s5564_s8 + $0x78] sm:$0xff]  ;;  %v568_v46 = vrot.slane %v4468_v40, 7  ;;  %v570_v8 = vrot.slane %v4480_v56, 7 }
 0x11c   : > { %v1447_v52 = vsel %vm1435_vm4, %v1414_v61, %v3802_v55  ;;  %v1446_v49 = vsel %vm1435_vm4, %v1413_v60, %v3801_v32  ;;  %3618 = vmatprep.mubr.msk.bf16.mxu0 %vm1485_vm5, %v1472_v11  ;;  %v572_v44 = vrot.slane %v4483_v14, 7  ;;  %v574_v47 = vrot.slane %v4492_v21, 7 }
 0x11d   : > { %v3805_v39 = vpop.permute.xlu0 %3804  ;;  %v1473_v48 = vpack.c.bf16 %v1447_v52, %v1446_v49  ;;  %v1418_v13 = vsel %vm1402_vm3, %v840_v25, %v3772_v62  ;;  %v1417_v41 = vsel %vm1402_vm3, %v839_v4, %v3771_v63  ;;  %v571_v3 = vsel %vm536_vm0, %v568_v46, %v570_v8 }
 0x11e   : > { %v3807_v50 = vunpack.i.h.bf16 %v3805_v39  ;;  %v3806_v0 = vunpack.i.l.bf16 %v3805_v39  ;;  %v569_v10 = vsel %vm536_vm0, %v566_v12, %v568_v46  ;;  %v842_v23 = vmul.f32 %v4702_v30, %v571_v3 }
 0x11f   : > { %2060 = vperm.xlu1 %3732, %v1998_v26   ;;  %2065 = vperm.xlu0 %3731, %v1999_v27   ;;  %v841_v11 = vmul.f32 %v4704_v2, %v569_v10  ;;  %v575_v56 = vsel %vm536_vm0, %v572_v44, %v574_v47  ;;  %v573_v55 = vsel %vm536_vm0, %v570_v8, %v572_v44 }
 0x120   : > { %v1449_v17 = vsel %vm1435_vm4, %v1416_v18, %v3807_v50  ;;  %v1448_v20 = vsel %vm1435_vm4, %v1415_v19, %v3806_v0  ;;  %v844_v2 = vmul.f32 %v4712_v6, %v575_v56  ;;  %v843_v58 = vmul.f32 %v4714_v36, %v573_v55  ;;  %v5597_v0 = vld [vmem:[#allocation6_spill] sm:$0xff] }
 0x121   : > { %3619 = vmatmul.mubr.msk.bf16.gmra.mrb[8].mxu0 %vm1485_vm5, %v1473_v48  ;;  %v3810_v33 = vpop.permute.xlu1 %3809  ;;  %v1474_v28 = vpack.c.bf16 %v1449_v17, %v1448_v20  ;;  %v576_v50 = vrot.slane %v4495_v22, 7  ;;  %v578_v62 = vrot.slane %v5597_v0, 7  ;;  %v5598_v20 = vld [vmem:[#allocation7_spill] sm:$0xff] }
 0x122   : > { %v3812_v29 = vunpack.i.h.bf16 %v3810_v33  ;;  %v3811_v16 = vunpack.i.l.bf16 %v3810_v33 }
 0x123   : > { %2070 = vperm.xlu1 %3732, %v2000_v7   ;;  %2075 = vperm.xlu0 %3731, %v2001_v15   ;;  %v577_v19 = vsel %vm536_vm0, %v574_v47, %v576_v50  ;;  %v579_v17 = vsel %vm536_vm0, %v576_v50, %v578_v62  ;;  %v580_v7 = vrot.slane %v5598_v20, 7  ;;  %v5599_v15 = vld [vmem:[#allocation8_spill] sm:$0xff] }
 0x124   : > { %v1451_v35 = vsel %vm1435_vm4, %v1418_v13, %v3812_v29  ;;  %v1450_v51 = vsel %vm1435_vm4, %v1417_v41, %v3811_v16  ;;  %3622 = vmatprep.mubr.msk.bf16.mxu0 %vm1485_vm5, %v1474_v28  ;;  %v582_v25 = vrot.slane %v5599_v15, 7 }
 0x125   : > { %v1475_v43 = vpack.c.bf16 %v1451_v35, %v1450_v51  ;;  %v581_v13 = vsel %vm536_vm0, %v578_v62, %v580_v7  ;;  %v5605_v62 = vld [vmem:[#allocation14_spill] sm:$0xff] }
 0x126   : > { %v583_v41 = vsel %vm536_vm0, %v580_v7, %v582_v25 }
 0x127   : > { %2080 = vperm.xlu1 %3732, %v2002_v42  }
 0x129   : > { %3623 = vmatmul.mubr.msk.bf16.gmra.mrb[12].mxu0 %vm1485_vm5, %v1475_v43 }
 0x12e   : > { %v768_v59 = vpop.permute.xlu0 %767 }
 0x12f   : > { %v845_v28 = vmul.f32 %v768_v59, %v577_v19 }
 0x132   : > { %v773_v34 = vpop.permute.xlu1 %772  ;;  %v4876_v31 = vpop.permute.xlu0 %777 }
 0x133   : > { %v846_v29 = vmul.f32 %v773_v34, %v579_v17  ;;  %v847_v59 = vmul.f32 %v4876_v31, %v581_v13 }
 0x136   : > { %v4880_v9 = vpop.permute.xlu1 %782  ;;  %v3815_v38 = vpop.permute.xlu0 %3814 }
 0x137   : > { %v3817_v1 = vunpack.i.h.bf16 %v3815_v38  ;;  %v3816_v57 = vunpack.i.l.bf16 %v3815_v38  ;;  %v848_v34 = vmul.f32 %v4880_v9, %v583_v41  ;;  %v5600_v9 = vld [vmem:[#allocation9_spill] sm:$0xff] }
 0x139   : > { %v1420_v12 = vsel %vm1402_vm3, %v842_v23, %v3817_v1  ;;  %v1419_v14 = vsel %vm1402_vm3, %v841_v11, %v3816_v57 }
 0x13a   : > { %v3820_v40 = vpop.permute.xlu1 %3819  ;;  %v3825_v54 = vpop.permute.xlu0 %3824 }
 0x13b   : > { %v3827_v32 = vunpack.i.h.bf16 %v3825_v54  ;;  %v3826_v61 = vunpack.i.l.bf16 %v3825_v54  ;;  %v3822_v60 = vunpack.i.h.bf16 %v3820_v40  ;;  %v3821_v21 = vunpack.i.l.bf16 %v3820_v40 }
 0x13d   : > { %v1452_v5 = vsel %vm1435_vm4, %v1419_v14, %v3826_v61  ;;  %v1453_v30 = vsel %vm1435_vm4, %v1420_v12, %v3827_v32  ;;  %v1422_v24 = vsel %vm1402_vm3, %v844_v2, %v3822_v60  ;;  %v1421_v39 = vsel %vm1402_vm3, %v843_v58, %v3821_v21  ;;  %v5601_v61 = vld [vmem:[#allocation10_spill] sm:$0xff]  ;;  %v5602_v14 = vld [vmem:[#allocation11_spill] sm:$0xff]  ;;  %v5603_v58 = vld [vmem:[#allocation12_spill] sm:$0xff] }
 0x13e   : > { %v3830_v52 = vpop.permute.xlu1 %3829  ;;  %v4896_v49 = vpop.permute.xlu0 %787  ;;  %v1476_v26 = vpack.c.bf16 %v1453_v30, %v1452_v5  ;;  %v584_v32 = vrot.slane %v5600_v9, 7  ;;  %v586_v12 = vrot.slane %v5601_v61, 7  ;;  %v588_v60 = vrot.slane %v5602_v14, 7 }
 0x13f   : > { %v3832_v27 = vunpack.i.h.bf16 %v3830_v52  ;;  %v3831_v53 = vunpack.i.l.bf16 %v3830_v52  ;;  %v590_v52 = vrot.slane %v5603_v58, 7 }
 0x140   : > { %3626 = vmatprep.mubr.msk.bf16.mxu0 %vm1485_vm5, %v1476_v26  ;;  %v585_v30 = vsel %vm536_vm0, %v582_v25, %v584_v32  ;;  %v587_v2 = vsel %vm536_vm0, %v584_v32, %v586_v12 }
 0x141   : > { %v1454_v48 = vsel %vm1435_vm4, %v1421_v39, %v3831_v53  ;;  %v1455_v37 = vsel %vm1435_vm4, %v1422_v24, %v3832_v27  ;;  %v5604_v53 = vld [vmem:[#allocation13_spill] sm:$0xff]  ;;  %v849_v39 = vmul.f32 %v4896_v49, %v585_v30  ;;  %v591_v0 = vsel %vm536_vm0, %v588_v60, %v590_v52 }
 0x142   : > { %v793_v45 = vpop.permute.xlu1 %792  ;;  %v4903_v6 = vpop.permute.xlu0 %797  ;;  %v1477_v36 = vpack.c.bf16 %v1455_v37, %v1454_v48  ;;  %v592_v24 = vrot.slane %v5604_v53, 7  ;;  %v589_v37 = vsel %vm536_vm0, %v586_v12, %v588_v60 }
 0x143   : > { %v850_v48 = vmul.f32 %v793_v45, %v587_v2 }
 0x144   : > { %3627 = vmatmul.mubr.msk.bf16.gmra.mrb[16].mxu0 %vm1485_vm5, %v1477_v36 }
 0x146   : > { %v4908_v63 = vpop.permute.xlu1 %802  ;;  %v3835_v18 = vpop.permute.xlu0 %3834 }
 0x147   : > { %v3837_v4 = vunpack.i.h.bf16 %v3835_v18  ;;  %v3836_v33 = vunpack.i.l.bf16 %v3835_v18  ;;  %v594_v18 = vrot.slane %v5605_v62, 7 }
 0x149   : > { %v1424_v42 = vsel %vm1402_vm3, %v846_v29, %v3837_v4  ;;  %v1423_v43 = vsel %vm1402_vm3, %v845_v28, %v3836_v33  ;;  %v593_v4 = vsel %vm536_vm0, %v590_v52, %v592_v24  ;;  %v851_v33 = vmul.f32 %v4903_v6, %v589_v37  ;;  %v5606_v29 = vld [vmem:[#allocation15_spill] sm:$0xff] }
 0x14a   : > { %v3840_v22 = vpop.permute.xlu1 %3839  ;;  %v3845_v16 = vpop.permute.xlu0 %3844  ;;  %v852_v28 = vmul.f32 %v4908_v63, %v591_v0 }
 0x14b   : > { %v3847_v35 = vunpack.i.h.bf16 %v3845_v16  ;;  %v3846_v51 = vunpack.i.l.bf16 %v3845_v16  ;;  %v3842_v46 = vunpack.i.h.bf16 %v3840_v22  ;;  %v3841_v8 = vunpack.i.l.bf16 %v3840_v22 }
 0x14c   : > { %v596_v22 = vrot.slane %v5606_v29, 7 }
 0x14d   : > { %v1456_v38 = vsel %vm1435_vm4, %v1423_v43, %v3846_v51  ;;  %v1457_v3 = vsel %vm1435_vm4, %v1424_v42, %v3847_v35  ;;  %v1426_v23 = vsel %vm1402_vm3, %v848_v34, %v3842_v46  ;;  %v1425_v11 = vsel %vm1402_vm3, %v847_v59, %v3841_v8  ;;  %v5607_v51 = vld [vmem:[#allocation16_spill] sm:$0xff] }
 0x14e   : > { %v3850_v10 = vpop.permute.xlu1 %3849  ;;  %v808_v44 = vpop.permute.xlu0 %807  ;;  %v1478_v47 = vpack.c.bf16 %v1457_v3, %v1456_v38  ;;  %v595_v35 = vsel %vm536_vm0, %v592_v24, %v594_v18  ;;  %v598_v42 = vrot.slane %v5607_v51, 7 }
 0x14f   : > { %v3852_v1 = vunpack.i.h.bf16 %v3850_v10  ;;  %v3851_v57 = vunpack.i.l.bf16 %v3850_v10  ;;  %v853_v34 = vmul.f32 %v808_v44, %v593_v4 }
 0x150   : > { %3630 = vmatprep.mubr.msk.bf16.mxu0 %vm1485_vm5, %v1478_v47 }
 0x151   : > { %v1458_v40 = vsel %vm1435_vm4, %v1425_v11, %v3851_v57  ;;  %v1459_v54 = vsel %vm1435_vm4, %v1426_v23, %v3852_v1  ;;  %v597_v23 = vsel %vm536_vm0, %v594_v18, %v596_v22  ;;  %v599_v11 = vsel %vm536_vm0, %v596_v22, %v598_v42 }
 0x152   : > { %v1479_v56 = vpack.c.bf16 %v1459_v54, %v1458_v40  ;;  %v813_v55 = vpop.permute.xlu1 %812  ;;  %v4927_v31 = vpop.permute.xlu0 %817 }
 0x153   : > { %v854_v10 = vmul.f32 %v813_v55, %v595_v35  ;;  %v855_v12 = vmul.f32 %v4927_v31, %v597_v23 }
 0x154   : > { %3631 = vmatmul.mubr.msk.bf16.gmra.mrb[20].mxu0 %vm1485_vm5, %v1479_v56 }
 0x156   : > { %v823_v21 = vpop.permute.xlu1 %822  ;;  %v3855_v5 = vpop.permute.xlu0 %3854 }
 0x157   : > { %v3857_v26 = vunpack.i.h.bf16 %v3855_v5  ;;  %v3856_v27 = vunpack.i.l.bf16 %v3855_v5  ;;  %v856_v14 = vmul.f32 %v823_v21, %v599_v11 }
 0x159   : > { %v1428_v20 = vsel %vm1402_vm3, %v850_v48, %v3857_v26  ;;  %v1427_v7 = vsel %vm1402_vm3, %v849_v39, %v3856_v27 }
 0x15a   : > { %v3860_v36 = vpop.permute.xlu1 %3859  ;;  %v3865_v50 = vpop.permute.xlu0 %3864 }
 0x15b   : > { %v3867_v19 = vunpack.i.h.bf16 %v3865_v50  ;;  %v3866_v17 = vunpack.i.l.bf16 %v3865_v50  ;;  %v3862_v15 = vunpack.i.h.bf16 %v3860_v36  ;;  %v3861_v25 = vunpack.i.l.bf16 %v3860_v36 }
 0x15d   : > { %v1460_v49 = vsel %vm1435_vm4, %v1427_v7, %v3866_v17  ;;  %v1461_v45 = vsel %vm1435_vm4, %v1428_v20, %v3867_v19  ;;  %v1430_v8 = vsel %vm1402_vm3, %v852_v28, %v3862_v15  ;;  %v1429_v38 = vsel %vm1402_vm3, %v851_v33, %v3861_v25 }
 0x15e   : > { %v1480_v16 = vpack.c.bf16 %v1461_v45, %v1460_v49  ;;  %v3870_v13 = vpop.permute.xlu1 %3869  ;;  %v3875_v41 = vpop.permute.xlu0 %3874 }
 0x15f   : > { %v3872_v43 = vunpack.i.h.bf16 %v3870_v13  ;;  %v3871_v46 = vunpack.i.l.bf16 %v3870_v13  ;;  %v3877_v3 = vunpack.i.h.bf16 %v3875_v41  ;;  %v3876_v59 = vunpack.i.l.bf16 %v3875_v41 }
 0x160   : > { %3634 = vmatprep.mubr.msk.bf16.mxu0 %vm1485_vm5, %v1480_v16 }
 0x161   : > { %v1462_v6 = vsel %vm1435_vm4, %v1429_v38, %v3871_v46  ;;  %v1463_v63 = vsel %vm1435_vm4, %v1430_v8, %v3872_v43  ;;  %v1432_v56 = vsel %vm1402_vm3, %v854_v10, %v3877_v3  ;;  %v1431_v9 = vsel %vm1402_vm3, %v853_v34, %v3876_v59 }
 0x162   : > { %v1481_v47 = vpack.c.bf16 %v1463_v63, %v1462_v6  ;;  %v3880_v1 = vpop.permute.xlu1 %3879  ;;  %v3885_v57 = vpop.permute.xlu0 %3884 }
 0x163   : > { %v3887_v40 = vunpack.i.h.bf16 %v3885_v57  ;;  %v3886_v54 = vunpack.i.l.bf16 %v3885_v57  ;;  %v3882_v32 = vunpack.i.h.bf16 %v3880_v1  ;;  %v3881_v61 = vunpack.i.l.bf16 %v3880_v1 }
 0x164   : > { %3635 = vmatmul.mubr.msk.bf16.gmra.mrb[24].mxu0 %vm1485_vm5, %v1481_v47 }
 0x165   : > { %v1464_v44 = vsel %vm1435_vm4, %v1431_v9, %v3886_v54  ;;  %v1465_v55 = vsel %vm1435_vm4, %v1432_v56, %v3887_v40  ;;  %v1434_v58 = vsel %vm1402_vm3, %v856_v14, %v3882_v32  ;;  %v1433_v52 = vsel %vm1402_vm3, %v855_v12, %v3881_v61 }
 0x166   : > { %v1482_v60 = vpack.c.bf16 %v1465_v55, %v1464_v44  ;;  %v3890_v5 = vpop.permute.xlu1 %3889  ;;  %v4970_v24 = vpop.permute.xlu0 %2165 }
 0x167   : > { %v3892_v30 = vunpack.i.h.bf16 %v3890_v5  ;;  %v3891_v2 = vunpack.i.l.bf16 %v3890_v5 }
 0x168   : > { %3638 = vmatprep.mubr.msk.bf16.mxu0 %vm1485_vm5, %v1482_v60 }
 0x169   : > { %v1466_v26 = vsel %vm1435_vm4, %v1433_v52, %v3891_v2  ;;  %v1467_v27 = vsel %vm1435_vm4, %v1434_v58, %v3892_v30 }
 0x16a   : > { %v1483_v53 = vpack.c.bf16 %v1467_v27, %v1466_v26  ;;  %v4972_v31 = vpop.permute.xlu0 %2175  ;;  %v2171_v27 = vpop.permute.xlu1 %2170 }
 0x16c   : > { %3639 = vmatmul.mubr.msk.bf16.gmra.mrb[28].mxu0 %vm1485_vm5, %v1483_v53 }
 0x16e   : > { %v4974_v21 = vpop.permute.xlu0 %2185 }
 0x172   : > { %v4976_v39 = vpop.permute.xlu0 %2195 }
 0x176   : > { %v4978_v62 = vpop.permute.xlu0 %2205 }
 0x17a   : > { %v4984_v49 = vpop.permute.xlu0 %2215 }
 0x17e   : > { %v4989_v59 = vpop.permute.xlu0 %2225 }
 0x182   : > { %v5000_v44 = vpop.permute.xlu0 %2235 }
 0x1e4   : > { %v3612_v48 = vpop.f32.mrb[0].mxu0 }
 0x1e5   : > { %vm1701_vm6 = vcmp.gt.f32.partialorder %v3612_v48, 0.0  ;;  %v1733_v37 = vmul.f32 0.2, %v3612_v48  ;;  %v1572_v36 = vpop.f32.mrb[1].mxu0 }
 0x1e6   : > { %vm1699_vm8 = vcmp.gt.f32.partialorder %v1572_v36, 0.0  ;;  %v1731_v50 = vmul.f32 0.2, %v1572_v36  ;;  %v3613_v0 = vpop.f32.mrb[2].mxu0 }
 0x1e7   : > { %v1765_v18 = vsel %vm1701_vm6, %v3612_v48, %v1733_v37  ;;  %vm1702_vm9 = vcmp.gt.f32.partialorder %v3613_v0, 0.0  ;;  %v1734_v19 = vmul.f32 0.2, %v3613_v0  ;;  %v1575_v17 = vpop.f32.mrb[3].mxu0 }
 0x1e8   : > { %1798 = vst.msk [vmem:[#allocation2 + $0x10] sm:$0xff] %vm1795_vm7, %v1765_v18  ;;  %v1763_v20 = vsel %vm1699_vm8, %v1572_v36, %v1731_v50  ;;  %vm1700_vm10 = vcmp.gt.f32.partialorder %v1575_v17, 0.0  ;;  %v1732_v7 = vmul.f32 0.2, %v1575_v17 }
 0x1e9   : > { %1796 = vst.msk [vmem:[#allocation2] sm:$0xff] %vm1795_vm7, %v1763_v20  ;;  %v1766_v15 = vsel %vm1702_vm9, %v3613_v0, %v1734_v19 }
 0x1ea   : > { %1799 = vst.msk [vmem:[#allocation2 + $0x18] sm:$0xff] %vm1795_vm7, %v1766_v15  ;;  %v1764_v25 = vsel %vm1700_vm10, %v1575_v17, %v1732_v7  ;;  %v5020_v15 = vpop.permute.xlu0 %2005  ;;  %vm2449_vm10 = vcmask 1043456  }
 0x1eb   : > { %1797 = vst.msk [vmem:[#allocation2 + $0x8] sm:$0xff] %vm1795_vm7, %v1764_v25 }
 0x1ec   : > { %v3616_v4 = vpop.f32.mrb[4].mxu0 }
 0x1ed   : > { %vm1705_vm11 = vcmp.gt.f32.partialorder %v3616_v4, 0.0  ;;  %v1737_v45 = vmul.f32 0.2, %v3616_v4  ;;  %v1588_v33 = vpop.f32.mrb[5].mxu0 }
 0x1ee   : > { %vm1703_vm12 = vcmp.gt.f32.partialorder %v1588_v33, 0.0  ;;  %v1735_v28 = vmul.f32 0.2, %v1588_v33  ;;  %v3617_v29 = vpop.f32.mrb[6].mxu0 }
 0x1ef   : > { %v1769_v22 = vsel %vm1705_vm11, %v3616_v4, %v1737_v45  ;;  %vm1706_vm13 = vcmp.gt.f32.partialorder %v3617_v29, 0.0  ;;  %v1738_v16 = vmul.f32 0.2, %v3617_v29  ;;  %v1591_v13 = vpop.f32.mrb[7].mxu0 }
 0x1f0   : > { %1802 = vst.msk [vmem:[#allocation2 + $0x30] sm:$0xff] %vm1795_vm7, %v1769_v22  ;;  %v1767_v41 = vsel %vm1703_vm12, %v1588_v33, %v1735_v28  ;;  %vm1704_vm14 = vcmp.gt.f32.partialorder %v1591_v13, 0.0  ;;  %v1736_v35 = vmul.f32 0.2, %v1591_v13  ;;  %v4038_v28 = vld [vmem:[%s5558_s2] sm:$0xff]  }
 0x1f1   : > { %1800 = vst.msk [vmem:[#allocation2 + $0x20] sm:$0xff] %vm1795_vm7, %v1767_v41  ;;  %v1770_v51 = vsel %vm1706_vm13, %v3617_v29, %v1738_v16  ;;  %v1830_v42 = vld [vmem:[#allocation2 + $0x10] ss:$2 sm:$0xff]  ;;  %v1862_v43 = vld [vmem:[#allocation2 + $0x11] ss:$2 sm:$0xff]  ;;  %3642 = vmatprep.subr.bf16.mxu1 %v4038_v28 }
 0x1f2   : > { %1803 = vst.msk [vmem:[#allocation2 + $0x38] sm:$0xff] %vm1795_vm7, %v1770_v51  ;;  %v1768_v46 = vsel %vm1704_vm14, %v1591_v13, %v1736_v35  ;;  %v1828_v8 = vld [vmem:[#allocation2] ss:$2 sm:$0xff]  ;;  %v1860_v38 = vld [vmem:[#allocation2 + $0x1] ss:$2 sm:$0xff]  ;;  %v1892_v3 = vadd.f32 %v1862_v43, %v1830_v42  ;;  %v2181_v13 = vpop.permute.xlu1 %2180  ;;  %3643 = vmatpush3.bf16.msra.mxu1 %v4038_v28 }
 0x1f3   : > { %1801 = vst.msk [vmem:[#allocation2 + $0x28] sm:$0xff] %vm1795_vm7, %v1768_v46  ;;  %v1891_v6 = vadd.f32 %v1860_v38, %v1828_v8 }
 0x1f4   : > { %v3620_v63 = vpop.f32.mrb[8].mxu0  ;;  %v4992_v34 = vmul.f32 0.5, %v1892_v3 }
 0x1f5   : > { %vm1709_vm15 = vcmp.gt.f32.partialorder %v3620_v63, 0.0  ;;  %v1741_v10 = vmul.f32 0.2, %v3620_v63  ;;  %v1604_v47 = vpop.f32.mrb[9].mxu0  ;;  %v4994_v1 = vmul.f32 0.5, %v1891_v6 }
 0x1f6   : > { %vm1707_vm1 = vcmp.gt.f32.partialorder %v1604_v47, 0.0  ;;  %v1739_v57 = vmul.f32 0.2, %v1604_v47  ;;  %v3621_v23 = vpop.f32.mrb[10].mxu0  ;;  %v1940_v11 = vrot.slane %v4992_v34, 7  ;;  %v2100_v26 = vrot.slane %v4992_v34, 1 }
 0x1f7   : > { %v1773_v40 = vsel %vm1709_vm15, %v3620_v63, %v1741_v10  ;;  %vm1710_vm3 = vcmp.gt.f32.partialorder %v3621_v23, 0.0  ;;  %v1742_v54 = vmul.f32 0.2, %v3621_v23  ;;  %v1607_v56 = vpop.f32.mrb[11].mxu0  ;;  %v3893_v9 = vpack.i.bf16 %v4992_v34, %v4994_v1  ;;  %v2191_v34 = vpop.permute.xlu1 %2190 }
 0x1f8   : > { %1806 = vst.msk [vmem:[#allocation2 + $0x50] sm:$0xff] %vm1795_vm7, %v1773_v40  ;;  %v1771_v32 = vsel %vm1707_vm1, %v1604_v47, %v1739_v57  ;;  %vm1708_vm4 = vcmp.gt.f32.partialorder %v1607_v56, 0.0  ;;  %v1740_v61 = vmul.f32 0.2, %v1607_v56  ;;  %v1939_v60 = vrot.slane %v4994_v1, 7 }
 0x1f9   : > { %1804 = vst.msk [vmem:[#allocation2 + $0x40] sm:$0xff] %vm1795_vm7, %v1771_v32  ;;  %v1774_v55 = vsel %vm1710_vm3, %v3621_v23, %v1742_v54  ;;  %3894 = vrot.lane.b32.xlu0 %v3893_v9, %s4068_s21  ;;  %v1834_v12 = vld [vmem:[#allocation2 + $0x30] ss:$2 sm:$0xff]  ;;  %v1866_v14 = vld [vmem:[#allocation2 + $0x31] ss:$2 sm:$0xff]  ;;  %v2099_v52 = vrot.slane %v4994_v1, 1  ;;  %v5045_v54 = vpop.permute.xlu0 %2015 }
 0x1fa   : > { %1807 = vst.msk [vmem:[#allocation2 + $0x58] sm:$0xff] %vm1795_vm7, %v1774_v55  ;;  %v1772_v5 = vsel %vm1708_vm4, %v1607_v56, %v1740_v61  ;;  %v1832_v30 = vld [vmem:[#allocation2 + $0x20] ss:$2 sm:$0xff]  ;;  %v1864_v2 = vld [vmem:[#allocation2 + $0x21] ss:$2 sm:$0xff]  ;;  %v1894_v58 = vadd.f32 %v1866_v14, %v1834_v12  ;;  %v5014_v48 = vsel %vm536_vm0, %v1939_v60, %v1940_v11 }
 0x1fb   : > { %1805 = vst.msk [vmem:[#allocation2 + $0x48] sm:$0xff] %vm1795_vm7, %v1772_v5  ;;  %v1893_v53 = vadd.f32 %v1864_v2, %v1832_v30  ;;  %v2101_v20 = vsel %vm857_vm2, %v2099_v52, %v2100_v26  ;;  %v4039_v23 = vld [vmem:[%s5558_s2 + $0x8] ss:$0 sps:$4 sm:$0xff]  }
 0x1fc   : > { %v3624_v37 = vpop.f32.mrb[12].mxu0  ;;  %v5016_v36 = vmul.f32 0.5, %v1894_v58  ;;  %v2243_v8 = vmul.f32 %v4970_v24, %v2101_v20  ;;  %3713 = vmatprep.subr.msk.bf16.mxu1 %vm2449_vm10, %v4039_v23  ;;  %v2451_v32 = vsel %vm2449_vm10, %v4039_v23, 0  ;;  %v5062_v20 = vpop.permute.xlu1 %2200 }
 0x1fd   : > { %vm1713_vm5 = vcmp.gt.f32.partialorder %v3624_v37, 0.0  ;;  %v1745_v50 = vmul.f32 0.2, %v3624_v37  ;;  %v1620_v0 = vpop.f32.mrb[13].mxu0  ;;  %v1909_v18 = vmul.f32 0.5, %v1893_v53  ;;  %3645 = vmatpush3.bf16.msra.mxu1 %v2451_v32 }
 0x1fe   : > { %vm1711_vm6 = vcmp.gt.f32.partialorder %v1620_v0, 0.0  ;;  %v1743_v19 = vmul.f32 0.2, %v1620_v0  ;;  %v3625_v17 = vpop.f32.mrb[14].mxu0  ;;  %v1944_v7 = vrot.slane %v5016_v36, 7  ;;  %v2104_v47 = vrot.slane %v5016_v36, 1 }
 0x1ff   : > { %v1777_v25 = vsel %vm1713_vm5, %v3624_v37, %v1745_v50  ;;  %vm1714_vm8 = vcmp.gt.f32.partialorder %v3625_v17, 0.0  ;;  %v1746_v4 = vmul.f32 0.2, %v3625_v17  ;;  %v1623_v45 = vpop.f32.mrb[15].mxu0  ;;  %v3898_v33 = vpack.i.bf16 %v5016_v36, %v1909_v18  ;;  %v5057_v50 = vpop.permute.xlu0 %2025 }
 0x200   : > { %1810 = vst.msk [vmem:[#allocation2 + $0x70] sm:$0xff] %vm1795_vm7, %v1777_v25  ;;  %v1775_v29 = vsel %vm1711_vm6, %v1620_v0, %v1743_v19  ;;  %vm1712_vm9 = vcmp.gt.f32.partialorder %v1623_v45, 0.0  ;;  %v1744_v22 = vmul.f32 0.2, %v1623_v45  ;;  %v2102_v16 = vrot.slane %v1909_v18, 1 }
 0x201   : > { %1808 = vst.msk [vmem:[#allocation2 + $0x60] sm:$0xff] %vm1795_vm7, %v1775_v29  ;;  %v1778_v41 = vsel %vm1714_vm8, %v3625_v17, %v1746_v4  ;;  %3899 = vrot.lane.b32.xlu1 %v3898_v33, %s4068_s21  ;;  %v1838_v35 = vld [vmem:[#allocation2 + $0x50] ss:$2 sm:$0xff]  ;;  %v1870_v51 = vld [vmem:[#allocation2 + $0x51] ss:$2 sm:$0xff]  ;;  %v1942_v42 = vrot.slane %v1909_v18, 7 }
 0x202   : > { %1811 = vst.msk [vmem:[#allocation2 + $0x78] sm:$0xff] %vm1795_vm7, %v1778_v41  ;;  %v1776_v43 = vsel %vm1712_vm9, %v1623_v45, %v1744_v22  ;;  %v2103_v46 = vsel %vm857_vm2, %v2100_v26, %v2102_v16  ;;  %v1836_v38 = vld [vmem:[#allocation2 + $0x40] ss:$2 sm:$0xff]  ;;  %v1868_v3 = vld [vmem:[#allocation2 + $0x41] ss:$2 sm:$0xff]  ;;  %v1896_v6 = vadd.f32 %v1870_v51, %v1838_v35  ;;  %v2105_v55 = vsel %vm857_vm2, %v2102_v16, %v2104_v47  ;;  %v5079_v51 = vpop.permute.xlu1 %2210 }
 0x203   : > { %1809 = vst.msk [vmem:[#allocation2 + $0x68] sm:$0xff] %vm1795_vm7, %v1776_v43  ;;  %v2244_v63 = vmul.f32 %v2171_v27, %v2103_v46  ;;  %v1895_v10 = vadd.f32 %v1868_v3, %v1836_v38  ;;  %v5037_v57 = vsel %vm536_vm0, %v1940_v11, %v1942_v42  ;;  %v5043_v40 = vsel %vm536_vm0, %v1942_v42, %v1944_v7  ;;  %v2036_v28 = vpop.permute.xlu0 %2035 }
 0x204   : > { %v1912_v24 = vmul.f32 0.5, %v1896_v6  ;;  %v2245_v26 = vmul.f32 %v4972_v31, %v2105_v55 }
 0x205   : > { %v3903_v56 = vpack.i.bf16 %v2244_v63, %v2243_v8  ;;  %v1911_v9 = vmul.f32 0.5, %v1895_v10 }
 0x206   : > { %v1948_v61 = vrot.slane %v1912_v24, 7  ;;  %v2108_v18 = vrot.slane %v1912_v24, 1  ;;  %v5082_v38 = vpop.permute.xlu1 %2220 }
 0x207   : > { %3904 = vrot.lane.b32.xlu0 %v3903_v56, %s4069_s23  ;;  %v3908_v11 = vpack.i.bf16 %v1912_v24, %v1911_v9  ;;  %v2106_v12 = vrot.slane %v1911_v9, 1  ;;  %v1946_v14 = vrot.slane %v1911_v9, 7 }
 0x209   : > { %v2107_v5 = vsel %vm857_vm2, %v2104_v47, %v2106_v12  ;;  %v1842_v30 = vld [vmem:[#allocation2 + $0x70] ss:$2 sm:$0xff]  ;;  %v1874_v2 = vld [vmem:[#allocation2 + $0x71] ss:$2 sm:$0xff]  ;;  %v5051_v58 = vsel %vm536_vm0, %v1944_v7, %v1946_v14  ;;  %v5054_v52 = vsel %vm536_vm0, %v1946_v14, %v1948_v61  ;;  %v2109_v4 = vsel %vm857_vm2, %v2106_v12, %v2108_v18 }
 0x20a   : > { %v2246_v27 = vmul.f32 %v2181_v13, %v2107_v5  ;;  %v1840_v53 = vld [vmem:[#allocation2 + $0x60] ss:$2 sm:$0xff]  ;;  %v1872_v37 = vld [vmem:[#allocation2 + $0x61] ss:$2 sm:$0xff]  ;;  %v1898_v36 = vadd.f32 %v1874_v2, %v1842_v30  ;;  %v2247_v13 = vmul.f32 %v4974_v21, %v2109_v4  ;;  %v5088_v9 = vpop.permute.xlu1 %2230 }
 0x20b   : > { %3909 = vrot.lane.b32.xlu0 %v3908_v11, %s4068_s21  ;;  %v1897_v0 = vadd.f32 %v1872_v37, %v1840_v53 }
 0x20c   : > { %v3913_v19 = vpack.i.bf16 %v2246_v27, %v2245_v26  ;;  %v5060_v17 = vmul.f32 0.5, %v1898_v36 }
 0x20d   : > { %v1913_v7 = vmul.f32 0.5, %v1897_v0 }
 0x20e   : > { %3914 = vrot.lane.b32.xlu1 %v3913_v19, %s4069_s23  ;;  %v1952_v31 = vrot.slane %v5060_v17, 7  ;;  %v2112_v14 = vrot.slane %v5060_v17, 1 }
 0x20f   : > { %v3918_v25 = vpack.i.bf16 %v5060_v17, %v1913_v7  ;;  %v2110_v45 = vrot.slane %v1913_v7, 1  ;;  %v1950_v33 = vrot.slane %v1913_v7, 7 }
 0x211   : > { %v2111_v29 = vsel %vm857_vm2, %v2108_v18, %v2110_v45  ;;  %v1951_v22 = vsel %vm536_vm0, %v1948_v61, %v1950_v33  ;;  %v5073_v16 = vsel %vm536_vm0, %v1950_v33, %v1952_v31  ;;  %v2113_v0 = vsel %vm857_vm2, %v2110_v45, %v2112_v14 }
 0x212   : > { %3919 = vrot.lane.b32.xlu1 %v3918_v25, %s4068_s21  ;;  %v2248_v41 = vmul.f32 %v2191_v34, %v2111_v29  ;;  %v5077_v35 = vmul.f32 %v2036_v28, %v1951_v22  ;;  %v5090_v34 = vpop.permute.xlu1 %2240 }
 0x214   : > { %v3923_v42 = vpack.i.bf16 %v2248_v41, %v2247_v13 }
 0x216   : > { %3924 = vrot.lane.b32.xlu0 %v3923_v42, %s4069_s23  ;;  %v5098_v33 = vpop.permute.xlu1 %2010 }
 0x217   : > { %v3628_v43 = vpop.f32.mrb[16].mxu0 }
 0x218   : > { %vm1717_vm11 = vcmp.gt.f32.partialorder %v3628_v43, 0.0  ;;  %v1749_v46 = vmul.f32 0.2, %v3628_v43  ;;  %v1636_v8 = vpop.f32.mrb[17].mxu0 }
 0x219   : > { %vm1715_vm12 = vcmp.gt.f32.partialorder %v1636_v8, 0.0  ;;  %v1747_v3 = vmul.f32 0.2, %v1636_v8  ;;  %v3629_v6 = vpop.f32.mrb[18].mxu0 }
 0x21a   : > { %v1781_v63 = vsel %vm1717_vm11, %v3628_v43, %v1749_v46  ;;  %vm1718_vm13 = vcmp.gt.f32.partialorder %v3629_v6, 0.0  ;;  %v1750_v21 = vmul.f32 0.2, %v3629_v6  ;;  %v1639_v10 = vpop.f32.mrb[19].mxu0  ;;  %v2249_v43 = vmul.f32 %v4976_v39, %v2113_v0 }
 0x21b   : > { %1814 = vst.msk [vmem:[#allocation2 + $0x90] sm:$0xff] %vm1795_vm7, %v1781_v63  ;;  %v1779_v47 = vsel %vm1715_vm12, %v1636_v8, %v1747_v3  ;;  %vm1716_vm14 = vcmp.gt.f32.partialorder %v1639_v10, 0.0  ;;  %v1748_v23 = vmul.f32 0.2, %v1639_v10  ;;  %v5118_v63 = vpop.permute.xlu1 %2020 }
 0x21c   : > { %1812 = vst.msk [vmem:[#allocation2 + $0x80] sm:$0xff] %vm1795_vm7, %v1779_v47  ;;  %v1782_v24 = vsel %vm1718_vm13, %v3629_v6, %v1750_v21 }
 0x21d   : > { %1815 = vst.msk [vmem:[#allocation2 + $0x98] sm:$0xff] %vm1795_vm7, %v1782_v24  ;;  %v1780_v56 = vsel %vm1716_vm14, %v1639_v10, %v1748_v23  ;;  %vm2387_vm14 = vcmask 130048  }
 0x21e   : > { %1813 = vst.msk [vmem:[#allocation2 + $0x88] sm:$0xff] %vm1795_vm7, %v1780_v56 }
 0x224   : > { %v1846_v32 = vld [vmem:[#allocation2 + $0x90] ss:$2 sm:$0xff]  ;;  %v1878_v61 = vld [vmem:[#allocation2 + $0x91] ss:$2 sm:$0xff] }
 0x225   : > { %v1844_v11 = vld [vmem:[#allocation2 + $0x80] ss:$2 sm:$0xff]  ;;  %v1876_v55 = vld [vmem:[#allocation2 + $0x81] ss:$2 sm:$0xff]  ;;  %v1900_v12 = vadd.f32 %v1878_v61, %v1846_v32 }
 0x226   : > { %v1899_v5 = vadd.f32 %v1876_v55, %v1844_v11 }
 0x227   : > { %v3632_v30 = vpop.f32.mrb[20].mxu0  ;;  %v5093_v2 = vmul.f32 0.5, %v1900_v12 }
 0x228   : > { %vm1721_vm15 = vcmp.gt.f32.partialorder %v3632_v30, 0.0  ;;  %v1753_v26 = vmul.f32 0.2, %v3632_v30  ;;  %v1652_v27 = vpop.f32.mrb[21].mxu0  ;;  %v1915_v53 = vmul.f32 0.5, %v1899_v5 }
 0x229   : > { %vm1719_vm1 = vcmp.gt.f32.partialorder %v1652_v27, 0.0  ;;  %v1751_v37 = vmul.f32 0.2, %v1652_v27  ;;  %v3633_v36 = vpop.f32.mrb[22].mxu0  ;;  %v1956_v18 = vrot.slane %v5093_v2, 7  ;;  %v2116_v17 = vrot.slane %v5093_v2, 1 }
 0x22a   : > { %v1785_v19 = vsel %vm1721_vm15, %v3632_v30, %v1753_v26  ;;  %vm1722_vm3 = vcmp.gt.f32.partialorder %v3633_v36, 0.0  ;;  %v1754_v7 = vmul.f32 0.2, %v3633_v36  ;;  %v1655_v25 = vpop.f32.mrb[23].mxu0  ;;  %v3928_v4 = vpack.i.bf16 %v5093_v2, %v1915_v53 }
 0x22b   : > { %1818 = vst.msk [vmem:[#allocation2 + $0xb0] sm:$0xff] %vm1795_vm7, %v1785_v19  ;;  %v1783_v28 = vsel %vm1719_vm1, %v1652_v27, %v1751_v37  ;;  %vm1720_vm4 = vcmp.gt.f32.partialorder %v1655_v25, 0.0  ;;  %v1752_v29 = vmul.f32 0.2, %v1655_v25  ;;  %v2114_v22 = vrot.slane %v1915_v53, 1 }
 0x22c   : > { %1816 = vst.msk [vmem:[#allocation2 + $0xa0] sm:$0xff] %vm1795_vm7, %v1783_v28  ;;  %v1786_v13 = vsel %vm1722_vm3, %v3633_v36, %v1754_v7  ;;  %3929 = vrot.lane.b32.xlu0 %v3928_v4, %s4068_s21  ;;  %v1954_v45 = vrot.slane %v1915_v53, 7  ;;  %vm2424_vm15 = vcmask 195584  }
 0x22d   : > { %1819 = vst.msk [vmem:[#allocation2 + $0xb8] sm:$0xff] %vm1795_vm7, %v1786_v13  ;;  %v1784_v41 = vsel %vm1720_vm4, %v1655_v25, %v1752_v29  ;;  %v2115_v42 = vsel %vm857_vm2, %v2112_v14, %v2114_v22  ;;  %v2117_v14 = vsel %vm857_vm2, %v2114_v22, %v2116_v17 }
 0x22e   : > { %1817 = vst.msk [vmem:[#allocation2 + $0xa8] sm:$0xff] %vm1795_vm7, %v1784_v41  ;;  %v2250_v46 = vmul.f32 %v5062_v20, %v2115_v42  ;;  %v5111_v8 = vsel %vm536_vm0, %v1952_v31, %v1954_v45  ;;  %v5116_v3 = vsel %vm536_vm0, %v1954_v45, %v1956_v18  ;;  %v5122_v31 = vpop.permute.xlu1 %2030  ;;  %v2251_v29 = vmul.f32 %v4978_v62, %v2117_v14 }
 0x230   : > { %v3933_v6 = vpack.i.bf16 %v2250_v46, %v2249_v43 }
 0x232   : > { %3934 = vrot.lane.b32.xlu1 %v3933_v6, %s4069_s23  ;;  %v5137_v25 = vpop.permute.xlu1 %2040 }
 0x234   : > { %v1850_v21 = vld [vmem:[#allocation2 + $0xb0] ss:$2 sm:$0xff]  ;;  %v1882_v10 = vld [vmem:[#allocation2 + $0xb1] ss:$2 sm:$0xff] }
 0x235   : > { %v1848_v39 = vld [vmem:[#allocation2 + $0xa0] ss:$2 sm:$0xff]  ;;  %v1880_v47 = vld [vmem:[#allocation2 + $0xa1] ss:$2 sm:$0xff]  ;;  %v1902_v20 = vadd.f32 %v1882_v10, %v1850_v21  ;;  %v5154_v21 = vpop.permute.xlu0 %2045 }
 0x236   : > { %v1901_v23 = vadd.f32 %v1880_v47, %v1848_v39  ;;  %v5157_v10 = vpop.permute.xlu1 %2050 }
 0x237   : > { %v3636_v24 = vpop.f32.mrb[24].mxu0  ;;  %v5124_v56 = vmul.f32 0.5, %v1902_v20 }
 0x238   : > { %vm1725_vm5 = vcmp.gt.f32.partialorder %v3636_v24, 0.0  ;;  %v1757_v32 = vmul.f32 0.2, %v3636_v24  ;;  %v1668_v61 = vpop.f32.mrb[25].mxu0  ;;  %v5126_v11 = vmul.f32 0.5, %v1901_v23 }
 0x239   : > { %vm1723_vm6 = vcmp.gt.f32.partialorder %v1668_v61, 0.0  ;;  %v1755_v55 = vmul.f32 0.2, %v1668_v61  ;;  %v3637_v12 = vpop.f32.mrb[26].mxu0  ;;  %v1960_v5 = vrot.slane %v5124_v56, 7 }
 0x23a   : > { %v1789_v30 = vsel %vm1725_vm5, %v3636_v24, %v1757_v32  ;;  %vm1726_vm8 = vcmp.gt.f32.partialorder %v3637_v12, 0.0  ;;  %v1758_v26 = vmul.f32 0.2, %v3637_v12  ;;  %v1671_v27 = vpop.f32.mrb[27].mxu0  ;;  %v3938_v53 = vpack.i.bf16 %v5124_v56, %v5126_v11 }
 0x23b   : > { %1822 = vst.msk [vmem:[#allocation2 + $0xd0] sm:$0xff] %vm1795_vm7, %v1789_v30  ;;  %v1787_v37 = vsel %vm1723_vm6, %v1668_v61, %v1755_v55  ;;  %vm1724_vm9 = vcmp.gt.f32.partialorder %v1671_v27, 0.0  ;;  %v1756_v36 = vmul.f32 0.2, %v1671_v27  ;;  %v2118_v0 = vrot.slane %v5126_v11, 1  ;;  %v5164_v30 = vpop.permute.xlu0 %2055 }
 0x23c   : > { %1820 = vst.msk [vmem:[#allocation2 + $0xc0] sm:$0xff] %vm1795_vm7, %v1787_v37  ;;  %v1790_v19 = vsel %vm1726_vm8, %v3637_v12, %v1758_v26  ;;  %3939 = vrot.lane.b32.xlu1 %v3938_v53, %s4068_s21  ;;  %v1958_v7 = vrot.slane %v5126_v11, 7  ;;  %v2120_v12 = vrot.slane %v5124_v56, 1 }
 0x23d   : > { %1823 = vst.msk [vmem:[#allocation2 + $0xd8] sm:$0xff] %vm1795_vm7, %v1790_v19  ;;  %v1788_v4 = vsel %vm1724_vm9, %v1671_v27, %v1756_v36  ;;  %v2119_v28 = vsel %vm857_vm2, %v2116_v17, %v2118_v0  ;;  %v5166_v27 = vpop.permute.xlu1 %2060 }
 0x23e   : > { %1821 = vst.msk [vmem:[#allocation2 + $0xc8] sm:$0xff] %vm1795_vm7, %v1788_v4  ;;  %v2252_v22 = vmul.f32 %v5079_v51, %v2119_v28  ;;  %v5147_v13 = vsel %vm536_vm0, %v1956_v18, %v1958_v7  ;;  %v5152_v45 = vsel %vm536_vm0, %v1958_v7, %v1960_v5  ;;  %v2121_v36 = vsel %vm857_vm2, %v2118_v0, %v2120_v12 }
 0x23f   : > { %v3640_v41 = vpop.f32.mrb[28].mxu0 }
 0x240   : > { %vm1729_vm10 = vcmp.gt.f32.partialorder %v3640_v41, 0.0  ;;  %v1761_v42 = vmul.f32 0.2, %v3640_v41  ;;  %v1684_v43 = vpop.f32.mrb[29].mxu0  ;;  %v3943_v46 = vpack.i.bf16 %v2252_v22, %v2251_v29 }
 0x241   : > { %vm1727_vm11 = vcmp.gt.f32.partialorder %v1684_v43, 0.0  ;;  %v1759_v6 = vmul.f32 0.2, %v1684_v43  ;;  %v3641_v62 = vpop.f32.mrb[30].mxu0 }
 0x242   : > { %v1793_v51 = vsel %vm1729_vm10, %v3640_v41, %v1761_v42  ;;  %3944 = vrot.lane.b32.xlu0 %v3943_v46, %s4069_s23  ;;  %vm1730_vm12 = vcmp.gt.f32.partialorder %v3641_v62, 0.0  ;;  %v1762_v2 = vmul.f32 0.2, %v3641_v62  ;;  %v1687_v18 = vpop.f32.mrb[31].mxu0 }
 0x243   : > { %1826 = vst.msk [vmem:[#allocation2 + $0xf0] sm:$0xff] %vm1795_vm7, %v1793_v51  ;;  %v1791_v39 = vsel %vm1727_vm11, %v1684_v43, %v1759_v6  ;;  %vm1728_vm13 = vcmp.gt.f32.partialorder %v1687_v18, 0.0  ;;  %v1760_v47 = vmul.f32 0.2, %v1687_v18  ;;  %v2253_v43 = vmul.f32 %v4984_v49, %v2121_v36  ;;  %v5181_v51 = vpop.permute.xlu0 %2065 }
 0x244   : > { %1824 = vst.msk [vmem:[#allocation2 + $0xe0] sm:$0xff] %vm1795_vm7, %v1791_v39  ;;  %v1794_v20 = vsel %vm1730_vm12, %v3641_v62, %v1762_v2  ;;  %v1854_v17 = vld [vmem:[#allocation2 + $0xd0] ss:$2 sm:$0xff]  ;;  %v1886_v23 = vld [vmem:[#allocation2 + $0xd1] ss:$2 sm:$0xff] }
 0x245   : > { %1827 = vst.msk [vmem:[#allocation2 + $0xf8] sm:$0xff] %vm1795_vm7, %v1794_v20  ;;  %v1792_v24 = vsel %vm1728_vm13, %v1687_v18, %v1760_v47  ;;  %v1852_v32 = vld [vmem:[#allocation2 + $0xc0] ss:$2 sm:$0xff]  ;;  %v1884_v61 = vld [vmem:[#allocation2 + $0xc1] ss:$2 sm:$0xff]  ;;  %v1904_v11 = vadd.f32 %v1886_v23, %v1854_v17  ;;  %v5183_v18 = vpop.permute.xlu1 %2070 }
 0x246   : > { %1825 = vst.msk [vmem:[#allocation2 + $0xe8] sm:$0xff] %vm1795_vm7, %v1792_v24  ;;  %v1903_v55 = vadd.f32 %v1884_v61, %v1852_v32 }
 0x247   : > { %v1920_v14 = vmul.f32 0.5, %v1904_v11  ;;  %v2076_v61 = vpop.permute.xlu0 %2075 }
 0x248   : > { %v1919_v26 = vmul.f32 0.5, %v1903_v55 }
 0x249   : > { %v1964_v53 = vrot.slane %v1920_v14, 7  ;;  %v2124_v22 = vrot.slane %v1920_v14, 1 }
 0x24a   : > { %v3948_v37 = vpack.i.bf16 %v1920_v14, %v1919_v26  ;;  %v2122_v19 = vrot.slane %v1919_v26, 1  ;;  %v1962_v7 = vrot.slane %v1919_v26, 7  ;;  %v2081_v26 = vpop.permute.xlu1 %2080 }
 0x24c   : > { %3949 = vrot.lane.b32.xlu0 %v3948_v37, %s4068_s21  ;;  %v2123_v4 = vsel %vm857_vm2, %v2120_v12, %v2122_v19  ;;  %v1858_v28 = vld [vmem:[#allocation2 + $0xf0] ss:$2 sm:$0xff]  ;;  %v1890_v29 = vld [vmem:[#allocation2 + $0xf1] ss:$2 sm:$0xff]  ;;  %v5174_v41 = vsel %vm536_vm0, %v1960_v5, %v1962_v7  ;;  %v5177_v42 = vsel %vm536_vm0, %v1962_v7, %v1964_v53  ;;  %v2125_v5 = vsel %vm857_vm2, %v2122_v19, %v2124_v22 }
 0x24d   : > { %v2254_v0 = vmul.f32 %v5082_v38, %v2123_v4  ;;  %v1856_v46 = vld [vmem:[#allocation2 + $0xe0] ss:$2 sm:$0xff]  ;;  %v1888_v6 = vld [vmem:[#allocation2 + $0xe1] ss:$2 sm:$0xff]  ;;  %v1906_v62 = vadd.f32 %v1890_v29, %v1858_v28  ;;  %v2255_v32 = vmul.f32 %v4989_v59, %v2125_v5  ;;  %v2700_v5 = vld [vmem:[%s5566_s10 + $0x38] sm:$0xff] }
 0x24e   : > { %v1905_v2 = vadd.f32 %v1888_v6, %v1856_v46  ;;  %v2778_v29 = vld [vmem:[%s5567_s11 + $0x28] sm:$0xff]  ;;  %v2693_v6 = vld [vmem:[%s5566_s10] sm:$0xff] }
 0x24f   : > { %v3953_v39 = vpack.i.bf16 %v2254_v0, %v2253_v43  ;;  %v1922_v56 = vmul.f32 0.5, %v1906_v62  ;;  %v2780_v43 = vld [vmem:[%s5567_s11 + $0x38] sm:$0xff]  ;;  %v2779_v0 = vld [vmem:[%s5567_s11 + $0x30] sm:$0xff]  ;;  %v2694_v46 = vld [vmem:[%s5566_s10 + $0x8] sm:$0xff] }
 0x250   : > { %v1921_v47 = vmul.f32 0.5, %v1905_v2  ;;  %v2696_v62 = vld [vmem:[%s5566_s10 + $0x18] sm:$0xff]  ;;  %v2695_v2 = vld [vmem:[%s5566_s10 + $0x10] sm:$0xff] }
 0x251   : > { %3954 = vrot.lane.b32.xlu1 %v3953_v39, %s4069_s23  ;;  %v2128_v20 = vrot.slane %v1922_v56, 1  ;;  %v1968_v17 = vrot.slane %v1922_v56, 7  ;;  %v2698_v39 = vld [vmem:[%s5566_s10 + $0x28] sm:$0xff] }
 0x252   : > { %v3958_v49 = vpack.i.bf16 %v1922_v56, %v1921_v47  ;;  %v2126_v23 = vrot.slane %v1921_v47, 1  ;;  %v1966_v38 = vrot.slane %v1921_v47, 7 }
 0x253   : > { %v2146_v24 = vsel %vm857_vm2, %v2128_v20, %v1922_v56  ;;  %v2697_v56 = vld [vmem:[%s5566_s10 + $0x20] sm:$0xff] }
 0x254   : > { %v2129_v11 = vsel %vm857_vm2, %v2126_v23, %v2128_v20  ;;  %v2258_v55 = vmul.f32 %v5090_v34, %v2146_v24  ;;  %v2127_v12 = vsel %vm857_vm2, %v2124_v22, %v2126_v23  ;;  %v1967_v14 = vsel %vm536_vm0, %v1964_v53, %v1966_v38  ;;  %v2774_v34 = vld [vmem:[%s5567_s11 + $0x8] sm:$0xff]  ;;  %v2775_v53 = vld [vmem:[%s5567_s11 + $0x10] sm:$0xff]  ;;  %v2777_v22 = vld [vmem:[%s5567_s11 + $0x20] sm:$0xff] }
 0x255   : > { %3959 = vrot.lane.b32.xlu1 %v3958_v49, %s4068_s21  ;;  %v2257_v37 = vmul.f32 %v5000_v44, %v2129_v11  ;;  %v2256_v36 = vmul.f32 %v5088_v9, %v2127_v12  ;;  %v1969_v19 = vsel %vm536_vm0, %v1966_v38, %v1968_v17  ;;  %v5197_v7 = vmul.f32 %v2076_v61, %v1967_v14  ;;  %v2773_v44 = vld [vmem:[%s5567_s11] sm:$0xff]  ;;  %v2776_v9 = vld [vmem:[%s5567_s11 + $0x18] sm:$0xff]  ;;  %v2699_v20 = vld [vmem:[%s5566_s10 + $0x30] sm:$0xff]  ;;  %s469_s21 = scalar_lea.vmem %s5570_s14, %s3505_s18 }
 0x256   : > { %v5199_v59 = vmul.f32 %v2081_v26, %v1969_v19  ;;  %v1986_v17 = vsel %vm536_vm0, %v4994_v1, %v1939_v60 }
 0x257   : > { %v3968_v4 = vpack.i.bf16 %v2258_v55, %v2257_v37  ;;  %v3963_v28 = vpack.i.bf16 %v2256_v36, %v2255_v32  ;;  %v2083_v24 = vmul.f32 %v5020_v15, %v1986_v17  ;;  %v2084_v32 = vmul.f32 %v5098_v33, %v5014_v48 }
 0x258   : > { %v2085_v48 = vmul.f32 %v5045_v54, %v5037_v57  ;;  %v2086_v15 = vmul.f32 %v5118_v63, %v5043_v40  ;;  %v2087_v57 = vmul.f32 %v5057_v50, %v5051_v58  ;;  %v2088_v40 = vmul.f32 %v5122_v31, %v5054_v52 }
 0x259   : > { %3969 = vrot.lane.b32.xlu1 %v3968_v4, %s4069_s23  ;;  %3964 = vrot.lane.b32.xlu0 %v3963_v28, %s4069_s23  ;;  %v2090_v52 = vmul.f32 %v5137_v25, %v5073_v16  ;;  %v2091_v16 = vmul.f32 %v5154_v21, %v5111_v8  ;;  %v2092_v25 = vmul.f32 %v5157_v10, %v5116_v3 }
 0x25a   : > { %v2093_v3 = vmul.f32 %v5164_v30, %v5147_v13  ;;  %v2094_v21 = vmul.f32 %v5166_v27, %v5152_v45  ;;  %v2095_v45 = vmul.f32 %v5181_v51, %v5174_v41  ;;  %v2096_v27 = vmul.f32 %v5183_v18, %v5177_v42 }
 0x25d   : > { %2788 = vperm.xlu1 %3732, %v2774_v34   ;;  %2783 = vperm.xlu0 %3731, %v2773_v44  }
 0x261   : > { %2798 = vperm.xlu1 %3732, %v2776_v9   ;;  %2793 = vperm.xlu0 %3731, %v2775_v53  }
 0x265   : > { %2808 = vperm.xlu1 %3732, %v2778_v29   ;;  %2803 = vperm.xlu0 %3731, %v2777_v22  }
 0x269   : > { %2818 = vperm.xlu1 %3732, %v2780_v43   ;;  %2813 = vperm.xlu0 %3731, %v2779_v0  }
 0x26b   : > { %v3895_v47 = vpop.permute.xlu0 %3894 }
 0x26c   : > { %v3897_v49 = vunpack.i.h.bf16 %v3895_v47  ;;  %v3896_v23 = vunpack.i.l.bf16 %v3895_v47 }
 0x26d   : > { %2708 = vperm.xlu1 %3732, %v2694_v46   ;;  %2703 = vperm.xlu0 %3731, %v2693_v6  }
 0x26e   : > { %v2371_v12 = vsel %vm1795_vm7, %v2083_v24, %v3896_v23  ;;  %v2372_v14 = vsel %vm1795_vm7, %v2084_v32, %v3897_v49 }
 0x271   : > { %2718 = vperm.xlu1 %3732, %v2696_v62   ;;  %2713 = vperm.xlu0 %3731, %v2695_v2  }
 0x273   : > { %v3900_v55 = vpop.permute.xlu1 %3899 }
 0x274   : > { %v3902_v37 = vunpack.i.h.bf16 %v3900_v55  ;;  %v3901_v36 = vunpack.i.l.bf16 %v3900_v55 }
 0x275   : > { %2728 = vperm.xlu1 %3732, %v2698_v39   ;;  %2723 = vperm.xlu0 %3731, %v2697_v56  }
 0x276   : > { %v2373_v28 = vsel %vm1795_vm7, %v2085_v48, %v3901_v36  ;;  %v2374_v34 = vsel %vm1795_vm7, %v2086_v15, %v3902_v37 }
 0x279   : > { %v3905_v38 = vpop.permute.xlu0 %3904  ;;  %2738 = vperm.xlu1 %3732, %v2700_v5   ;;  %2733 = vperm.xlu0 %3731, %v2699_v20  }
 0x27a   : > { %v3907_v61 = vunpack.i.h.bf16 %v3905_v38  ;;  %v3906_v11 = vunpack.i.l.bf16 %v3905_v38 }
 0x27c   : > { %v2388_v1 = vsel %vm2387_vm14, %v2371_v12, %v3906_v11  ;;  %v2389_v60 = vsel %vm2387_vm14, %v2372_v14, %v3907_v61 }
 0x27d   : > { %v2404_v26 = vpack.c.bf16 %v2389_v60, %v2388_v1  ;;  %v3910_v44 = vpop.permute.xlu0 %3909 }
 0x27e   : > { %v3912_v22 = vunpack.i.h.bf16 %v3910_v44  ;;  %v3911_v43 = vunpack.i.l.bf16 %v3910_v44 }
 0x27f   : > { %3646 = vmatprep.mubr.msk.bf16.mxu1 %vm2424_vm15, %v2404_v26 }
 0x280   : > { %v3915_v33 = vpop.permute.xlu1 %3914  ;;  %v2375_v46 = vsel %vm1795_vm7, %v2087_v57, %v3911_v43  ;;  %v2376_v6 = vsel %vm1795_vm7, %v2088_v40, %v3912_v22 }
 0x281   : > { %v3917_v19 = vunpack.i.h.bf16 %v3915_v33  ;;  %v3916_v4 = vunpack.i.l.bf16 %v3915_v33 }
 0x283   : > { %v2391_v9 = vsel %vm2387_vm14, %v2374_v34, %v3917_v19  ;;  %v2390_v53 = vsel %vm2387_vm14, %v2373_v28, %v3916_v4 }
 0x284   : > { %v2405_v29 = vpack.c.bf16 %v2391_v9, %v2390_v53  ;;  %v3920_v56 = vpop.permute.xlu1 %3919 }
 0x285   : > { %v3922_v47 = vunpack.i.h.bf16 %v3920_v56  ;;  %v3921_v58 = vunpack.i.l.bf16 %v3920_v56 }
 0x286   : > { %3647 = vmatmul.mubr.msk.bf16.vlgmr.msra.gmra.mrb[0].mxu1 %vm2424_vm15, %v2405_v29 }
 0x287   : > { %v2377_v20 = vsel %vm1795_vm7, %v5077_v35, %v3921_v58  ;;  %v2378_v17 = vsel %vm1795_vm7, %v2090_v52, %v3922_v47 }
 0x288   : > { %v3925_v54 = vpop.permute.xlu0 %3924 }
 0x289   : > { %v3927_v63 = vunpack.i.h.bf16 %v3925_v54  ;;  %v3926_v0 = vunpack.i.l.bf16 %v3925_v54 }
 0x28b   : > { %v2393_v62 = vsel %vm2387_vm14, %v2376_v6, %v3927_v63  ;;  %v2392_v2 = vsel %vm2387_vm14, %v2375_v46, %v3926_v0 }
 0x28c   : > { %v2406_v39 = vpack.c.bf16 %v2393_v62, %v2392_v2 }
 0x28e   : > { %3650 = vmatprep.mubr.msk.bf16.mxu1 %vm2424_vm15, %v2406_v39 }
 0x29e   : > { %v3930_v24 = vpop.permute.xlu0 %3929 }
 0x29f   : > { %v3932_v32 = vunpack.i.h.bf16 %v3930_v24  ;;  %v3931_v61 = vunpack.i.l.bf16 %v3930_v24 }
 0x2a1   : > { %v2379_v12 = vsel %vm1795_vm7, %v2091_v16, %v3931_v61  ;;  %v2380_v14 = vsel %vm1795_vm7, %v2092_v25, %v3932_v32 }
 0x2a4   : > { %v3935_v50 = vpop.permute.xlu1 %3934 }
 0x2a5   : > { %v3937_v31 = vunpack.i.h.bf16 %v3935_v50  ;;  %v3936_v5 = vunpack.i.l.bf16 %v3935_v50 }
 0x2a7   : > { %v2395_v49 = vsel %vm2387_vm14, %v2378_v17, %v3937_v31  ;;  %v2394_v23 = vsel %vm2387_vm14, %v2377_v20, %v3936_v5 }
 0x2a8   : > { %v2407_v38 = vpack.c.bf16 %v2395_v49, %v2394_v23 }
 0x2aa   : > { %3651 = vmatmul.mubr.msk.bf16.gmra.mrb[4].mxu1 %vm2424_vm15, %v2407_v38 }
 0x2ae   : > { %v3940_v37 = vpop.permute.xlu1 %3939 }
 0x2af   : > { %v3942_v36 = vunpack.i.h.bf16 %v3940_v37  ;;  %v3941_v8 = vunpack.i.l.bf16 %v3940_v37 }
 0x2b1   : > { %v2381_v33 = vsel %vm1795_vm7, %v2093_v3, %v3941_v8  ;;  %v2382_v19 = vsel %vm1795_vm7, %v2094_v21, %v3942_v36 }
 0x2b4   : > { %v3945_v11 = vpop.permute.xlu0 %3944 }
 0x2b5   : > { %v3947_v35 = vunpack.i.h.bf16 %v3945_v11  ;;  %v3946_v55 = vunpack.i.l.bf16 %v3945_v11 }
 0x2b7   : > { %v2397_v1 = vsel %vm2387_vm14, %v2380_v14, %v3947_v35  ;;  %v2396_v60 = vsel %vm2387_vm14, %v2379_v12, %v3946_v55 }
 0x2b8   : > { %v2408_v26 = vpack.c.bf16 %v2397_v1, %v2396_v60 }
 0x2ba   : > { %3654 = vmatprep.mubr.msk.bf16.mxu1 %vm2424_vm15, %v2408_v26 }
 0x2be   : > { %v3950_v4 = vpop.permute.xlu0 %3949 }
 0x2bf   : > { %v3952_v53 = vunpack.i.h.bf16 %v3950_v4  ;;  %v3951_v29 = vunpack.i.l.bf16 %v3950_v4 }
 0x2c1   : > { %v2383_v0 = vsel %vm1795_vm7, %v2095_v45, %v3951_v29  ;;  %v2384_v46 = vsel %vm1795_vm7, %v2096_v27, %v3952_v53  ;;  %v4040_v27 = vld [vmem:[%s5559_s3] sm:$0xff]  }
 0x2c2   : > { %3662 = vmatprep.subr.bf16.mxu1 %v4040_v27 }
 0x2c3   : > { %v3955_v10 = vpop.permute.xlu1 %3954  ;;  %3663 = vmatpush3.bf16.msra.mxu1 %v4040_v27 }
 0x2c4   : > { %v3957_v48 = vunpack.i.h.bf16 %v3955_v10  ;;  %v3956_v15 = vunpack.i.l.bf16 %v3955_v10 }
 0x2c6   : > { %v2399_v28 = vsel %vm2387_vm14, %v2382_v19, %v3957_v48  ;;  %v2398_v34 = vsel %vm2387_vm14, %v2381_v33, %v3956_v15 }
 0x2c7   : > { %v2409_v44 = vpack.c.bf16 %v2399_v28, %v2398_v34  ;;  %v3960_v9 = vpop.permute.xlu1 %3959 }
 0x2c8   : > { %v3962_v13 = vunpack.i.h.bf16 %v3960_v9  ;;  %v3961_v30 = vunpack.i.l.bf16 %v3960_v9 }
 0x2c9   : > { %3655 = vmatmul.mubr.msk.bf16.gmra.mrb[8].mxu1 %vm2424_vm15, %v2409_v44 }
 0x2ca   : > { %v2385_v6 = vsel %vm1795_vm7, %v5197_v7, %v3961_v30  ;;  %v2386_v62 = vsel %vm1795_vm7, %v5199_v59, %v3962_v13 }
 0x2cb   : > { %v3970_v22 = vpop.permute.xlu1 %3969  ;;  %v3965_v43 = vpop.permute.xlu0 %3964 }
 0x2cc   : > { %v3972_v57 = vunpack.i.h.bf16 %v3970_v22  ;;  %v3971_v40 = vunpack.i.l.bf16 %v3970_v22  ;;  %v3967_v54 = vunpack.i.h.bf16 %v3965_v43  ;;  %v3966_v63 = vunpack.i.l.bf16 %v3965_v43 }
 0x2ce   : > { %v2402_v41 = vsel %vm2387_vm14, %v2385_v6, %v3971_v40  ;;  %v2403_v42 = vsel %vm2387_vm14, %v2386_v62, %v3972_v57  ;;  %v2401_v51 = vsel %vm2387_vm14, %v2384_v46, %v3967_v54  ;;  %v2400_v18 = vsel %vm2387_vm14, %v2383_v0, %v3966_v63  ;;  %v4041_v54 = vld [vmem:[%s5559_s3 + $0x8] sm:$0xff]  }
 0x2cf   : > { %v2411_v2 = vpack.c.bf16 %v2403_v42, %v2402_v41  ;;  %v2410_v39 = vpack.c.bf16 %v2401_v51, %v2400_v18  ;;  %3664 = vmatprep.subr.bf16.mxu1 %v4041_v54 }
 0x2d0   : > { %3665 = vmatpush3.bf16.msra.mxu1 %v4041_v54 }
 0x2d1   : > { %3658 = vmatprep.mubr.msk.bf16.mxu1 %vm2424_vm15, %v2410_v39 }
 0x2d2   : > { %3659 = vmatmul.mubr.msk.bf16.gmra.mrb[12].mxu1 %vm2424_vm15, %v2411_v2 }
 0x2dc   : > { %v2789_v63 = vpop.permute.xlu1 %2788  ;;  %v2784_v0 = vpop.permute.xlu0 %2783 }
 0x359   : > { %v3648_v56 = vpop.f32.mrb[0].mxu1 }
 0x35a   : > { %vm2552_vm1 = vcmp.gt.f32.partialorder %v3648_v56, 0.0  ;;  %v2568_v7 = vmul.f32 0.2, %v3648_v56  ;;  %v2487_v47 = vpop.f32.mrb[1].mxu1 }
 0x35b   : > { %vm2550_vm3 = vcmp.gt.f32.partialorder %v2487_v47, 0.0  ;;  %v2566_v59 = vmul.f32 0.2, %v2487_v47  ;;  %v3649_v58 = vpop.f32.mrb[2].mxu1 }
 0x35c   : > { %v2584_v52 = vsel %vm2552_vm1, %v3648_v56, %v2568_v7  ;;  %vm2553_vm7 = vcmp.gt.f32.partialorder %v3649_v58, 0.0  ;;  %v2569_v50 = vmul.f32 0.2, %v3649_v58  ;;  %v2490_v31 = vpop.f32.mrb[3].mxu1 }
 0x35d   : > { %2600 = vst.msk [vmem:[#allocation3 + $0x10] sm:$0xff] %vm2387_vm14, %v2584_v52  ;;  %v2582_v5 = vsel %vm2550_vm3, %v2487_v47, %v2566_v59  ;;  %vm2551_vm4 = vcmp.gt.f32.partialorder %v2490_v31, 0.0  ;;  %v2567_v20 = vmul.f32 0.2, %v2490_v31 }
 0x35e   : > { %2598 = vst.msk [vmem:[#allocation3] sm:$0xff] %vm2387_vm14, %v2582_v5  ;;  %v2585_v17 = vsel %vm2553_vm7, %v3649_v58, %v2569_v50 }
 0x35f   : > { %2601 = vst.msk [vmem:[#allocation3 + $0x18] sm:$0xff] %vm2387_vm14, %v2585_v17  ;;  %v2583_v49 = vsel %vm2551_vm4, %v2490_v31, %v2567_v20  ;;  %vm2893_vm4 = vcmask 261120  }
 0x360   : > { %2599 = vst.msk [vmem:[#allocation3 + $0x8] sm:$0xff] %vm2387_vm14, %v2583_v49 }
 0x366   : > { %v2616_v23 = vld [vmem:[#allocation3 + $0x10] ss:$2 sm:$0xff]  ;;  %v2632_v38 = vld [vmem:[#allocation3 + $0x11] ss:$2 sm:$0xff] }
 0x367   : > { %v2614_v24 = vld [vmem:[#allocation3] ss:$2 sm:$0xff]  ;;  %v2630_v32 = vld [vmem:[#allocation3 + $0x1] ss:$2 sm:$0xff]  ;;  %v2646_v61 = vadd.f32 %v2632_v38, %v2616_v23  ;;  %v4042_v23 = vld [vmem:[%s5559_s3 + $0x10] sm:$0xff]  }
 0x368   : > { %v2645_v16 = vadd.f32 %v2630_v32, %v2614_v24  ;;  %3666 = vmatprep.subr.bf16.mxu1 %v4042_v23 }
 0x369   : > { %v2654_v25 = vmul.f32 0.5, %v2646_v61  ;;  %3667 = vmatpush3.bf16.msra.mxu1 %v4042_v23 }
 0x36a   : > { %v5327_v11 = vmul.f32 0.5, %v2645_v16 }
 0x36b   : > { %v2670_v35 = vrot.slane %v2654_v25, 7  ;;  %v2750_v29 = vrot.slane %v2654_v25, 1 }
 0x36c   : > { %v3973_v55 = vpack.i.bf16 %v2654_v25, %v5327_v11  ;;  %v2669_v12 = vrot.slane %v5327_v11, 7  ;;  %v2749_v53 = vrot.slane %v5327_v11, 1 }
 0x36e   : > { %3974 = vrot.lane.b32.xlu0 %v3973_v55, %s4069_s23  ;;  %v5335_v14 = vsel %vm536_vm0, %v2669_v12, %v2670_v35  ;;  %v2751_v43 = vsel %vm857_vm2, %v2749_v53, %v2750_v29 }
 0x36f   : > { %v2821_v41 = vmul.f32 %v2784_v0, %v2751_v43 }
 0x37d   : > { %v3652_v1 = vpop.f32.mrb[4].mxu1 }
 0x37e   : > { %vm2556_vm5 = vcmp.gt.f32.partialorder %v3652_v1, 0.0  ;;  %v2572_v60 = vmul.f32 0.2, %v3652_v1  ;;  %v2503_v26 = vpop.f32.mrb[5].mxu1 }
 0x37f   : > { %vm2554_vm6 = vcmp.gt.f32.partialorder %v2503_v26, 0.0  ;;  %v2570_v37 = vmul.f32 0.2, %v2503_v26  ;;  %v3653_v36 = vpop.f32.mrb[6].mxu1 }
 0x380   : > { %v2588_v8 = vsel %vm2556_vm5, %v3652_v1, %v2572_v60  ;;  %vm2557_vm8 = vcmp.gt.f32.partialorder %v3653_v36, 0.0  ;;  %v2573_v3 = vmul.f32 0.2, %v3653_v36  ;;  %v2506_v21 = vpop.f32.mrb[7].mxu1  ;;  %vm2930_vm5 = vcmask 392192  }
 0x381   : > { %2604 = vst.msk [vmem:[#allocation3 + $0x30] sm:$0xff] %vm2387_vm14, %v2588_v8  ;;  %v2586_v10 = vsel %vm2554_vm6, %v2503_v26, %v2570_v37  ;;  %vm2555_vm9 = vcmp.gt.f32.partialorder %v2506_v21, 0.0  ;;  %v2571_v48 = vmul.f32 0.2, %v2506_v21 }
 0x382   : > { %2602 = vst.msk [vmem:[#allocation3 + $0x20] sm:$0xff] %vm2387_vm14, %v2586_v10  ;;  %v2589_v15 = vsel %vm2557_vm8, %v3653_v36, %v2573_v3  ;;  %v2799_v10 = vpop.permute.xlu1 %2798 }
 0x383   : > { %2605 = vst.msk [vmem:[#allocation3 + $0x38] sm:$0xff] %vm2387_vm14, %v2589_v15  ;;  %v2587_v33 = vsel %vm2555_vm9, %v2506_v21, %v2571_v48 }
 0x384   : > { %2603 = vst.msk [vmem:[#allocation3 + $0x28] sm:$0xff] %vm2387_vm14, %v2587_v33  ;;  %v2794_v33 = vpop.permute.xlu0 %2793 }
 0x388   : > { %v2804_v0 = vpop.permute.xlu0 %2803 }
 0x38a   : > { %v2620_v19 = vld [vmem:[#allocation3 + $0x30] ss:$2 sm:$0xff]  ;;  %v2636_v4 = vld [vmem:[#allocation3 + $0x31] ss:$2 sm:$0xff] }
 0x38b   : > { %v2618_v28 = vld [vmem:[#allocation3 + $0x20] ss:$2 sm:$0xff]  ;;  %v2634_v34 = vld [vmem:[#allocation3 + $0x21] ss:$2 sm:$0xff]  ;;  %v2648_v44 = vadd.f32 %v2636_v4, %v2620_v19 }
 0x38c   : > { %v2647_v9 = vadd.f32 %v2634_v34, %v2618_v28 }
 0x38d   : > { %v5342_v13 = vmul.f32 0.5, %v2648_v44 }
 0x38e   : > { %v5344_v30 = vmul.f32 0.5, %v2647_v9 }
 0x38f   : > { %v2674_v45 = vrot.slane %v5342_v13, 7  ;;  %v2754_v21 = vrot.slane %v5342_v13, 1 }
 0x390   : > { %v3978_v22 = vpack.i.bf16 %v5342_v13, %v5344_v30  ;;  %v2752_v57 = vrot.slane %v5344_v30, 1  ;;  %v2672_v40 = vrot.slane %v5344_v30, 7 }
 0x392   : > { %3979 = vrot.lane.b32.xlu1 %v3978_v22, %s4069_s23  ;;  %v2753_v46 = vsel %vm857_vm2, %v2750_v29, %v2752_v57  ;;  %v5363_v6 = vsel %vm536_vm0, %v2670_v35, %v2672_v40  ;;  %v5368_v62 = vsel %vm536_vm0, %v2672_v40, %v2674_v45  ;;  %v2755_v4 = vsel %vm857_vm2, %v2752_v57, %v2754_v21  ;;  %v2809_v57 = vpop.permute.xlu1 %2808 }
 0x393   : > { %v2822_v42 = vmul.f32 %v2789_v63, %v2753_v46  ;;  %v2823_v29 = vmul.f32 %v2794_v33, %v2755_v4 }
 0x395   : > { %v3983_v51 = vpack.i.bf16 %v2822_v42, %v2821_v41 }
 0x397   : > { %3984 = vrot.lane.b32.xlu0 %v3983_v51, %s4070_s19 }
 0x39c   : > { %v3656_v18 = vpop.f32.mrb[8].mxu1 }
 0x39d   : > { %vm2560_vm10 = vcmp.gt.f32.partialorder %v3656_v18, 0.0  ;;  %v2576_v2 = vmul.f32 0.2, %v3656_v18  ;;  %v2519_v39 = vpop.f32.mrb[9].mxu1 }
 0x39e   : > { %vm2558_vm11 = vcmp.gt.f32.partialorder %v2519_v39, 0.0  ;;  %v2574_v56 = vmul.f32 0.2, %v2519_v39  ;;  %v3657_v7 = vpop.f32.mrb[10].mxu1 }
 0x39f   : > { %v2592_v47 = vsel %vm2560_vm10, %v3656_v18, %v2576_v2  ;;  %vm2561_vm12 = vcmp.gt.f32.partialorder %v3657_v7, 0.0  ;;  %v2577_v59 = vmul.f32 0.2, %v3657_v7  ;;  %v2522_v58 = vpop.f32.mrb[11].mxu1 }
 0x3a0   : > { %2608 = vst.msk [vmem:[#allocation3 + $0x50] sm:$0xff] %vm2387_vm14, %v2592_v47  ;;  %v2590_v52 = vsel %vm2558_vm11, %v2519_v39, %v2574_v56  ;;  %vm2559_vm13 = vcmp.gt.f32.partialorder %v2522_v58, 0.0  ;;  %v2575_v50 = vmul.f32 0.2, %v2522_v58  ;;  %v2819_v47 = vpop.permute.xlu1 %2818 }
 0x3a1   : > { %2606 = vst.msk [vmem:[#allocation3 + $0x40] sm:$0xff] %vm2387_vm14, %v2590_v52  ;;  %v2593_v31 = vsel %vm2561_vm12, %v3657_v7, %v2577_v59 }
 0x3a2   : > { %2609 = vst.msk [vmem:[#allocation3 + $0x58] sm:$0xff] %vm2387_vm14, %v2593_v31  ;;  %v2591_v5 = vsel %vm2559_vm13, %v2522_v58, %v2575_v50  ;;  %v2814_v58 = vpop.permute.xlu0 %2813 }
 0x3a3   : > { %2607 = vst.msk [vmem:[#allocation3 + $0x48] sm:$0xff] %vm2387_vm14, %v2591_v5 }
 0x3a5   : > { %v3660_v20 = vpop.f32.mrb[12].mxu1 }
 0x3a6   : > { %vm2564_vm15 = vcmp.gt.f32.partialorder %v3660_v20, 0.0  ;;  %v2580_v17 = vmul.f32 0.2, %v3660_v20  ;;  %v2535_v49 = vpop.f32.mrb[13].mxu1 }
 0x3a7   : > { %vm2562_vm1 = vcmp.gt.f32.partialorder %v2535_v49, 0.0  ;;  %v2578_v38 = vmul.f32 0.2, %v2535_v49  ;;  %v3661_v24 = vpop.f32.mrb[14].mxu1 }
 0x3a8   : > { %v2596_v32 = vsel %vm2564_vm15, %v3660_v20, %v2580_v17  ;;  %vm2565_vm3 = vcmp.gt.f32.partialorder %v3661_v24, 0.0  ;;  %v2581_v61 = vmul.f32 0.2, %v3661_v24  ;;  %v2538_v16 = vpop.f32.mrb[15].mxu1 }
 0x3a9   : > { %2612 = vst.msk [vmem:[#allocation3 + $0x70] sm:$0xff] %vm2387_vm14, %v2596_v32  ;;  %v2594_v25 = vsel %vm2562_vm1, %v2535_v49, %v2578_v38  ;;  %vm2563_vm7 = vcmp.gt.f32.partialorder %v2538_v16, 0.0  ;;  %v2579_v35 = vmul.f32 0.2, %v2538_v16  ;;  %v2624_v55 = vld [vmem:[#allocation3 + $0x50] ss:$2 sm:$0xff] }
 0x3aa   : > { %2610 = vst.msk [vmem:[#allocation3 + $0x60] sm:$0xff] %vm2387_vm14, %v2594_v25  ;;  %v2597_v1 = vsel %vm2565_vm3, %v3661_v24, %v2581_v61  ;;  %v2622_v60 = vld [vmem:[#allocation3 + $0x40] ss:$2 sm:$0xff]  ;;  %v2638_v26 = vld [vmem:[#allocation3 + $0x41] ss:$2 sm:$0xff]  ;;  %v3121_v25 = vld [vmem:[%s5569_s13 + $0x10] sm:$0xff] }
 0x3ab   : > { %v2640_v37 = vld [vmem:[#allocation3 + $0x51] ss:$2 sm:$0xff]  ;;  %2613 = vst.msk [vmem:[#allocation3 + $0x78] sm:$0xff] %vm2387_vm14, %v2597_v1  ;;  %v2595_v36 = vsel %vm2563_vm7, %v2538_v16, %v2579_v35  ;;  %v2649_v8 = vadd.f32 %v2638_v26, %v2622_v60  ;;  %v3120_v32 = vld [vmem:[%s5569_s13 + $0x8] sm:$0xff]  ;;  %v3119_v61 = vld [vmem:[%s5569_s13] sm:$0xff]  ;;  %v2704_v26 = vpop.permute.xlu0 %2703  ;;  %vm3179_vm1 = vcmask 523264  }
 0x3ac   : > { %v2650_v3 = vadd.f32 %v2640_v37, %v2624_v55  ;;  %2611 = vst.msk [vmem:[#allocation3 + $0x68] sm:$0xff] %vm2387_vm14, %v2595_v36  ;;  %v3122_v16 = vld [vmem:[%s5569_s13 + $0x18] sm:$0xff]  ;;  %v3080_v35 = vld [vmem:[%s5568_s12 + $0x8] sm:$0xff]  ;;  %v3079_v55 = vld [vmem:[%s5568_s12] sm:$0xff]  ;;  %vm3234_vm3 = vcmask 785408  }
 0x3ad   : > { %v2657_v48 = vmul.f32 0.5, %v2649_v8  ;;  %v3082_v1 = vld [vmem:[%s5568_s12 + $0x18] sm:$0xff]  ;;  %v3081_v60 = vld [vmem:[%s5568_s12 + $0x10] sm:$0xff] }
 0x3ae   : > { %v2658_v15 = vmul.f32 0.5, %v2650_v3 }
 0x3af   : > { %v2756_v28 = vrot.slane %v2657_v48, 1  ;;  %v2676_v34 = vrot.slane %v2657_v48, 7  ;;  %v2714_v37 = vpop.permute.xlu0 %2713 }
 0x3b0   : > { %v3988_v19 = vpack.i.bf16 %v2658_v15, %v2657_v48  ;;  %v2678_v44 = vrot.slane %v2658_v15, 7  ;;  %v2758_v42 = vrot.slane %v2658_v15, 1  ;;  %v2709_v15 = vpop.permute.xlu1 %2708 }
 0x3b1   : > { %v2757_v9 = vsel %vm857_vm2, %v2754_v21, %v2756_v28  ;;  %v5391_v53 = vsel %vm536_vm0, %v2674_v45, %v2676_v34  ;;  %v2692_v21 = vsel %vm536_vm0, %v5327_v11, %v2669_v12 }
 0x3b2   : > { %3989 = vrot.lane.b32.xlu0 %v3988_v19, %s4069_s23  ;;  %v2824_v27 = vmul.f32 %v2799_v10, %v2757_v9  ;;  %v2628_v22 = vld [vmem:[#allocation3 + $0x70] ss:$2 sm:$0xff]  ;;  %v2644_v43 = vld [vmem:[#allocation3 + $0x71] ss:$2 sm:$0xff]  ;;  %v5394_v30 = vsel %vm536_vm0, %v2676_v34, %v2678_v44  ;;  %v2759_v56 = vsel %vm857_vm2, %v2756_v28, %v2758_v42  ;;  %v2741_v33 = vmul.f32 %v2704_v26, %v2692_v21 }
 0x3b3   : > { %v2626_v40 = vld [vmem:[#allocation3 + $0x60] ss:$2 sm:$0xff]  ;;  %v2642_v54 = vld [vmem:[#allocation3 + $0x61] ss:$2 sm:$0xff]  ;;  %v2652_v63 = vadd.f32 %v2644_v43, %v2628_v22  ;;  %v2825_v17 = vmul.f32 %v2804_v0, %v2759_v56  ;;  %v2724_v36 = vpop.permute.xlu0 %2723  ;;  %v2742_v19 = vmul.f32 %v2709_v15, %v5335_v14 }
 0x3b4   : > { %v3993_v46 = vpack.i.bf16 %v2824_v27, %v2823_v29  ;;  %v2651_v41 = vadd.f32 %v2642_v54, %v2626_v40  ;;  %v2719_v12 = vpop.permute.xlu1 %2718 }
 0x3b5   : > { %v2660_v51 = vmul.f32 0.5, %v2652_v63  ;;  %v2744_v54 = vmul.f32 %v2719_v12, %v5368_v62  ;;  %v2743_v63 = vmul.f32 %v2714_v37, %v5363_v6 }
 0x3b6   : > { %3994 = vrot.lane.b32.xlu1 %v3993_v46, %s4070_s19  ;;  %v2659_v13 = vmul.f32 0.5, %v2651_v41 }
 0x3b7   : > { %v2762_v45 = vrot.slane %v2660_v51, 1  ;;  %v2682_v18 = vrot.slane %v2660_v51, 7  ;;  %v2734_v8 = vpop.permute.xlu0 %2733 }
 0x3b8   : > { %v3998_v2 = vpack.i.bf16 %v2660_v51, %v2659_v13  ;;  %v2760_v39 = vrot.slane %v2659_v13, 1  ;;  %v2680_v7 = vrot.slane %v2659_v13, 7  ;;  %v2729_v22 = vpop.permute.xlu1 %2728 }
 0x3b9   : > { %v2772_v59 = vsel %vm857_vm2, %v2762_v45, %v2660_v51 }
 0x3ba   : > { %3999 = vrot.lane.b32.xlu1 %v3998_v2, %s4069_s23  ;;  %v2763_v52 = vsel %vm857_vm2, %v2760_v39, %v2762_v45  ;;  %v2828_v50 = vmul.f32 %v2819_v47, %v2772_v59  ;;  %v2761_v31 = vsel %vm857_vm2, %v2758_v42, %v2760_v39  ;;  %v5403_v5 = vsel %vm536_vm0, %v2678_v44, %v2680_v7 }
 0x3bb   : > { %v2827_v20 = vmul.f32 %v2814_v58, %v2763_v52  ;;  %v2826_v49 = vmul.f32 %v2809_v57, %v2761_v31  ;;  %v5406_v23 = vsel %vm536_vm0, %v2680_v7, %v2682_v18  ;;  %v2745_v47 = vmul.f32 %v2724_v36, %v5391_v53 }
 0x3bc   : > { %v2739_v43 = vpop.permute.xlu1 %2738  ;;  %v2746_v59 = vmul.f32 %v2729_v22, %v5394_v30  ;;  %v2747_v58 = vmul.f32 %v2734_v8, %v5403_v5 }
 0x3bd   : > { %v4008_v38 = vpack.i.bf16 %v2828_v50, %v2827_v20  ;;  %v4003_v24 = vpack.i.bf16 %v2826_v49, %v2825_v17  ;;  %v2748_v52 = vmul.f32 %v2739_v43, %v5406_v23 }
 0x3bf   : > { %4009 = vrot.lane.b32.xlu1 %v4008_v38, %s4070_s19  ;;  %4004 = vrot.lane.b32.xlu0 %v4003_v24, %s4070_s19 }
 0x3c3   : > { %3130 = vperm.xlu1 %3732, %v3120_v32   ;;  %3125 = vperm.xlu0 %3731, %v3119_v61  }
 0x3c7   : > { %3140 = vperm.xlu1 %3732, %v3122_v16   ;;  %3135 = vperm.xlu0 %3731, %v3121_v25  }
 0x3cb   : > { %3090 = vperm.xlu1 %3732, %v3080_v35   ;;  %3085 = vperm.xlu0 %3731, %v3079_v55   ;;  %v4043_v55 = vld [vmem:[%s5560_s4] sm:$0xff]  }
 0x3cc   : > { %3676 = vmatprep.subr.bf16.mxu1 %v4043_v55 }
 0x3cf   : > { %3100 = vperm.xlu1 %3732, %v3082_v1   ;;  %3095 = vperm.xlu0 %3731, %v3081_v60  }
 0x3e0   : > { %v3975_v3 = vpop.permute.xlu0 %3974 }
 0x3e1   : > { %v3977_v10 = vunpack.i.h.bf16 %v3975_v3  ;;  %v3976_v48 = vunpack.i.l.bf16 %v3975_v3 }
 0x3e3   : > { %v2886_v44 = vsel %vm2387_vm14, %v2742_v19, %v3977_v10  ;;  %v2885_v9 = vsel %vm2387_vm14, %v2741_v33, %v3976_v48 }
 0x404   : > { %v3980_v14 = vpop.permute.xlu1 %3979 }
 0x405   : > { %v3982_v57 = vunpack.i.h.bf16 %v3980_v14  ;;  %v3981_v40 = vunpack.i.l.bf16 %v3980_v14 }
 0x407   : > { %v2888_v42 = vsel %vm2387_vm14, %v2744_v54, %v3982_v57  ;;  %v2887_v51 = vsel %vm2387_vm14, %v2743_v63, %v3981_v40 }
 0x409   : > { %v3985_v4 = vpop.permute.xlu0 %3984 }
 0x40a   : > { %v3987_v28 = vunpack.i.h.bf16 %v3985_v4  ;;  %v3986_v34 = vunpack.i.l.bf16 %v3985_v4 }
 0x40c   : > { %v2894_v29 = vsel %vm2893_vm4, %v2885_v9, %v3986_v34  ;;  %v2895_v27 = vsel %vm2893_vm4, %v2886_v44, %v3987_v28  ;;  %v4044_v34 = vld [vmem:[%s5560_s4 + $0x8] sm:$0xff]   ;;  %v4045_v44 = vld [vmem:[%s5560_s4 + $0x10] sm:$0xff]  }
 0x40d   : > { %v2902_v11 = vpack.c.bf16 %v2895_v27, %v2894_v29 }
 0x40f   : > { %3668 = vmatprep.mubr.msk.bf16.mxu1 %vm2930_vm5, %v2902_v11 }
 0x424   : > { %v3990_v18 = vpop.permute.xlu0 %3989 }
 0x425   : > { %v3992_v56 = vunpack.i.h.bf16 %v3990_v18  ;;  %v3991_v62 = vunpack.i.l.bf16 %v3990_v18 }
 0x427   : > { %v2890_v24 = vsel %vm2387_vm14, %v2746_v59, %v3992_v56  ;;  %v2889_v32 = vsel %vm2387_vm14, %v2745_v47, %v3991_v62 }
 0x428   : > { %v3995_v0 = vpop.permute.xlu1 %3994 }
 0x429   : > { %v3997_v46 = vunpack.i.h.bf16 %v3995_v0  ;;  %v3996_v41 = vunpack.i.l.bf16 %v3995_v0  ;;  %v4046_v0 = vld [vmem:[%s5560_s4 + $0x18] sm:$0xff]  }
 0x42b   : > { %v2897_v13 = vsel %vm2893_vm4, %v2888_v42, %v3997_v46  ;;  %v2896_v45 = vsel %vm2893_vm4, %v2887_v51, %v3996_v41 }
 0x42c   : > { %v2903_v2 = vpack.c.bf16 %v2897_v13, %v2896_v45  ;;  %v4000_v39 = vpop.permute.xlu1 %3999 }
 0x42d   : > { %v4002_v7 = vunpack.i.h.bf16 %v4000_v39  ;;  %v4001_v6 = vunpack.i.l.bf16 %v4000_v39 }
 0x42e   : > { %3669 = vmatmul.mubr.msk.bf16.vlgmr.msra.gmra.mrb[16].mxu1 %vm2930_vm5, %v2903_v2  ;;  %v4047_v2 = vld [vmem:[%s5560_s4 + $0x20] sm:$0xff]  }
 0x42f   : > { %v2891_v61 = vsel %vm2387_vm14, %v2747_v58, %v4001_v6  ;;  %v2892_v53 = vsel %vm2387_vm14, %v2748_v52, %v4002_v7  ;;  %3677 = vmatpush3.bf16.msra.mxu1 %v4043_v55 }
 0x430   : > { %3678 = vmatprep.subr.bf16.mxu1 %v4044_v34 }
 0x431   : > { %v4010_v50 = vpop.permute.xlu1 %4009  ;;  %v4005_v31 = vpop.permute.xlu0 %4004 }
 0x432   : > { %v4012_v20 = vunpack.i.h.bf16 %v4010_v50  ;;  %v4011_v17 = vunpack.i.l.bf16 %v4010_v50  ;;  %v4007_v49 = vunpack.i.h.bf16 %v4005_v31  ;;  %v4006_v38 = vunpack.i.l.bf16 %v4005_v31 }
 0x433   : > { %3679 = vmatpush3.bf16.msra.mxu1 %v4044_v34 }
 0x434   : > { %v2900_v30 = vsel %vm2893_vm4, %v2891_v61, %v4011_v17  ;;  %v2901_v5 = vsel %vm2893_vm4, %v2892_v53, %v4012_v20  ;;  %v2899_v23 = vsel %vm2893_vm4, %v2890_v24, %v4007_v49  ;;  %v2898_v16 = vsel %vm2893_vm4, %v2889_v32, %v4006_v38  ;;  %3680 = vmatprep.subr.bf16.mxu1 %v4045_v44  ;;  %v4048_v49 = vld [vmem:[%s5560_s4 + $0x28] sm:$0xff]  }
 0x435   : > { %v2905_v25 = vpack.c.bf16 %v2901_v5, %v2900_v30  ;;  %v2904_v35 = vpack.c.bf16 %v2899_v23, %v2898_v16 }
 0x437   : > { %3672 = vmatprep.mubr.msk.bf16.mxu1 %vm2930_vm5, %v2904_v35  ;;  %3681 = vmatpush3.bf16.msra.mxu1 %v4045_v44 }
 0x438   : > { %3673 = vmatmul.mubr.msk.bf16.gmra.mrb[20].mxu1 %vm2930_vm5, %v2905_v25  ;;  %3682 = vmatprep.subr.bf16.mxu1 %v4046_v0 }
 0x43b   : > { %3683 = vmatpush3.bf16.msra.mxu1 %v4046_v0 }
 0x43c   : > { %3684 = vmatprep.subr.bf16.mxu1 %v4047_v2 }
 0x43f   : > { %3685 = vmatpush3.bf16.msra.mxu1 %v4047_v2 }
 0x440   : > { %3686 = vmatprep.subr.bf16.mxu1 %v4048_v49 }
 0x442   : > { %v3131_v6 = vpop.permute.xlu1 %3130  ;;  %v3126_v52 = vpop.permute.xlu0 %3125 }
 0x443   : > { %3687 = vmatpush3.bf16.msra.mxu1 %v4048_v49 }
 0x446   : > { %v3141_v23 = vpop.permute.xlu1 %3140  ;;  %v3136_v25 = vpop.permute.xlu0 %3135 }
 0x501   : > { %v3670_v1 = vpop.f32.mrb[16].mxu1 }
 0x502   : > { %vm3010_vm6 = vcmp.gt.f32.partialorder %v3670_v1, 0.0  ;;  %v3018_v60 = vmul.f32 0.2, %v3670_v1  ;;  %v2977_v26 = vpop.f32.mrb[17].mxu1 }
 0x503   : > { %vm3008_vm8 = vcmp.gt.f32.partialorder %v2977_v26, 0.0  ;;  %v3016_v37 = vmul.f32 0.2, %v2977_v26  ;;  %v3671_v36 = vpop.f32.mrb[18].mxu1 }
 0x504   : > { %v3026_v8 = vsel %vm3010_vm6, %v3670_v1, %v3018_v60  ;;  %vm3011_vm9 = vcmp.gt.f32.partialorder %v3671_v36, 0.0  ;;  %v3019_v3 = vmul.f32 0.2, %v3671_v36  ;;  %v2980_v21 = vpop.f32.mrb[19].mxu1  ;;  %vm4073_vm6 = vmmov 0  }
 0x505   : > { %3034 = vst.msk [vmem:[#allocation4 + $0x10] sm:$0xff] %vm2893_vm4, %v3026_v8  ;;  %v3024_v10 = vsel %vm3008_vm8, %v2977_v26, %v3016_v37  ;;  %vm3009_vm10 = vcmp.gt.f32.partialorder %v2980_v21, 0.0  ;;  %v3017_v48 = vmul.f32 0.2, %v2980_v21 }
 0x506   : > { %3032 = vst.msk [vmem:[#allocation4] sm:$0xff] %vm2893_vm4, %v3024_v10  ;;  %v3027_v15 = vsel %vm3011_vm9, %v3671_v36, %v3019_v3  ;;  %v3091_v10 = vpop.permute.xlu1 %3090 }
 0x507   : > { %3035 = vst.msk [vmem:[#allocation4 + $0x18] sm:$0xff] %vm2893_vm4, %v3027_v15  ;;  %v3025_v33 = vsel %vm3009_vm10, %v2980_v21, %v3017_v48  ;;  %v3086_v48 = vpop.permute.xlu0 %3085 }
 0x508   : > { %3033 = vst.msk [vmem:[#allocation4 + $0x8] sm:$0xff] %vm2893_vm4, %v3025_v33 }
 0x50a   : > { %v3101_v15 = vpop.permute.xlu1 %3100 }
 0x50b   : > { %v3674_v19 = vpop.f32.mrb[20].mxu1  ;;  %v3096_v33 = vpop.permute.xlu0 %3095 }
 0x50c   : > { %vm3014_vm11 = vcmp.gt.f32.partialorder %v3674_v19, 0.0  ;;  %v3022_v4 = vmul.f32 0.2, %v3674_v19  ;;  %v2993_v28 = vpop.f32.mrb[21].mxu1 }
 0x50d   : > { %vm3012_vm12 = vcmp.gt.f32.partialorder %v2993_v28, 0.0  ;;  %v3020_v9 = vmul.f32 0.2, %v2993_v28  ;;  %v3675_v29 = vpop.f32.mrb[22].mxu1 }
 0x50e   : > { %v3030_v27 = vsel %vm3014_vm11, %v3674_v19, %v3022_v4  ;;  %vm3015_vm13 = vcmp.gt.f32.partialorder %v3675_v29, 0.0  ;;  %v3023_v11 = vmul.f32 0.2, %v3675_v29  ;;  %v2996_v12 = vpop.f32.mrb[23].mxu1  ;;  %v3042_v22 = vld [vmem:[#allocation4 + $0x10] ss:$2 sm:$0xff] }
 0x50f   : > { %3038 = vst.msk [vmem:[#allocation4 + $0x30] sm:$0xff] %vm2893_vm4, %v3030_v27  ;;  %v3028_v43 = vsel %vm3012_vm12, %v2993_v28, %v3020_v9  ;;  %vm3013_vm15 = vcmp.gt.f32.partialorder %v2996_v12, 0.0  ;;  %v3021_v14 = vmul.f32 0.2, %v2996_v12  ;;  %v3040_v57 = vld [vmem:[#allocation4] ss:$2 sm:$0xff] }
 0x510   : > { %3036 = vst.msk [vmem:[#allocation4 + $0x20] sm:$0xff] %vm2893_vm4, %v3028_v43  ;;  %v3031_v40 = vsel %vm3015_vm13, %v3675_v29, %v3023_v11  ;;  %v3048_v54 = vld [vmem:[#allocation4 + $0x1] ss:$2 sm:$0xff]  ;;  %v3050_v63 = vld [vmem:[#allocation4 + $0x11] ss:$2 sm:$0xff] }
 0x511   : > { %3039 = vst.msk [vmem:[#allocation4 + $0x38] sm:$0xff] %vm2893_vm4, %v3031_v40  ;;  %v3029_v46 = vsel %vm3013_vm15, %v2996_v12, %v3021_v14  ;;  %v3055_v41 = vadd.f32 %v3048_v54, %v3040_v57  ;;  %v3056_v42 = vadd.f32 %v3050_v63, %v3042_v22 }
 0x512   : > { %3037 = vst.msk [vmem:[#allocation4 + $0x28] sm:$0xff] %vm2893_vm4, %v3029_v46 }
 0x513   : > { %v3059_v51 = vmul.f32 0.5, %v3055_v41  ;;  %v3060_v13 = vmul.f32 0.5, %v3056_v42 }
 0x515   : > { %v4013_v45 = vpack.i.bf16 %v3060_v13, %v3059_v51  ;;  %v3067_v18 = vrot.slane %v3059_v51, 7  ;;  %v3068_v39 = vrot.slane %v3060_v13, 7  ;;  %v3107_v31 = vrot.slane %v3059_v51, 1 }
 0x516   : > { %v3108_v20 = vrot.slane %v3060_v13, 1 }
 0x517   : > { %4014 = vrot.lane.b32.xlu0 %v4013_v45, %s4070_s19  ;;  %v3069_v7 = vsel %vm536_vm0, %v3067_v18, %v3068_v39  ;;  %v3078_v28 = vsel %vm536_vm0, %v3059_v51, %v3067_v18 }
 0x518   : > { %v3046_v56 = vld [vmem:[#allocation4 + $0x30] ss:$2 sm:$0xff]  ;;  %v3054_v62 = vld [vmem:[#allocation4 + $0x31] ss:$2 sm:$0xff]  ;;  %v3109_v30 = vsel %vm857_vm2, %v3107_v31, %v3108_v20  ;;  %v3103_v27 = vmul.f32 %v3086_v48, %v3078_v28  ;;  %v3104_v11 = vmul.f32 %v3091_v10, %v3069_v7  ;;  %v4050_v7 = vld [vmem:[%s5561_s5 + $0x8] sm:$0xff]  }
 0x519   : > { %v3044_v47 = vld [vmem:[#allocation4 + $0x20] ss:$2 sm:$0xff]  ;;  %v3052_v59 = vld [vmem:[#allocation4 + $0x21] ss:$2 sm:$0xff]  ;;  %v3058_v58 = vadd.f32 %v3054_v62, %v3046_v56  ;;  %v3143_v37 = vmul.f32 %v3126_v52, %v3109_v30  ;;  %v4072_v62 = vmov 0.0   ;;  %v4055_v52 = vld [vmem:[%s5561_s5 + $0x30] sm:$0xff]  }
 0x51a   : > { %v3057_v50 = vadd.f32 %v3052_v59, %v3044_v47  ;;  %v4049_v56 = vld [vmem:[%s5561_s5] sm:$0xff]   ;;  %3692 = vmatprep.subr.bf16.mxu0 %v4072_v62  ;;  %v4052_v47 = vld [vmem:[%s5561_s5 + $0x18] sm:$0xff]   ;;  %3708 = vmatprep.mubr.msk.bf16.mxu0 %vm4073_vm6, %v4072_v62 }
 0x51b   : > { %v3062_v17 = vmul.f32 0.5, %v3058_v58  ;;  %3693 = vmatpush3.bf16.msra.mxu0 %v4049_v56  ;;  %v4053_v59 = vld [vmem:[%s5561_s5 + $0x20] sm:$0xff]   ;;  %v4054_v58 = vld [vmem:[%s5561_s5 + $0x28] sm:$0xff]  }
 0x51c   : > { %v3061_v38 = vmul.f32 0.5, %v3057_v50  ;;  %3694 = vmatprep.subr.bf16.mxu0 %v4072_v62  ;;  %v4056_v50 = vld [vmem:[%s5561_s5 + $0x38] sm:$0xff]  }
 0x51d   : > { %v3112_v24 = vrot.slane %v3062_v17, 1  ;;  %v3072_v32 = vrot.slane %v3062_v17, 7 }
 0x51e   : > { %v4018_v61 = vpack.i.bf16 %v3062_v17, %v3061_v38  ;;  %v3110_v53 = vrot.slane %v3061_v38, 1  ;;  %v3070_v5 = vrot.slane %v3061_v38, 7 }
 0x51f   : > { %v3118_v16 = vsel %vm857_vm2, %v3112_v24, %v3062_v17  ;;  %3695 = vmatpush3.bf16.msra.mxu0 %v4050_v7 }
 0x520   : > { %4019 = vrot.lane.b32.xlu1 %v4018_v61, %s4070_s19  ;;  %v3113_v35 = vsel %vm857_vm2, %v3110_v53, %v3112_v24  ;;  %v3146_v55 = vmul.f32 %v3141_v23, %v3118_v16  ;;  %v3111_v1 = vsel %vm857_vm2, %v3108_v20, %v3110_v53  ;;  %v3071_v60 = vsel %vm536_vm0, %v3068_v39, %v3070_v5 }
 0x521   : > { %v3145_v26 = vmul.f32 %v3136_v25, %v3113_v35  ;;  %v3144_v36 = vmul.f32 %v3131_v6, %v3111_v1  ;;  %v3073_v8 = vsel %vm536_vm0, %v3070_v5, %v3072_v32  ;;  %v3105_v12 = vmul.f32 %v3096_v33, %v3071_v60  ;;  %v4051_v6 = vld [vmem:[%s5561_s5 + $0x10] sm:$0xff]   ;;  %3696 = vmatprep.subr.bf16.mxu0 %v4072_v62 }
 0x522   : > { %v3106_v22 = vmul.f32 %v3101_v15, %v3073_v8 }
 0x523   : > { %v4028_v3 = vpack.i.bf16 %v3146_v55, %v3145_v26  ;;  %v4023_v21 = vpack.i.bf16 %v3144_v36, %v3143_v37  ;;  %3697 = vmatpush3.bf16.msra.mxu0 %v4051_v6 }
 0x524   : > { %3698 = vmatprep.subr.bf16.mxu0 %v4072_v62 }
 0x525   : > { %4029 = vrot.lane.b32.xlu1 %v4028_v3, %s4071_s17  ;;  %4024 = vrot.lane.b32.xlu0 %v4023_v21, %s4071_s17 }
 0x527   : > { %3699 = vmatpush3.bf16.msra.mxu0 %v4052_v47 }
 0x528   : > { %3700 = vmatprep.subr.bf16.mxu0 %v4072_v62 }
 0x52b   : > { %3701 = vmatpush3.bf16.msra.mxu0 %v4053_v59 }
 0x52c   : > { %3702 = vmatprep.subr.bf16.mxu0 %v4072_v62 }
 0x52f   : > { %3703 = vmatpush3.bf16.msra.mxu0 %v4054_v58 }
 0x530   : > { %3704 = vmatprep.subr.bf16.mxu0 %v4072_v62 }
 0x533   : > { %3705 = vmatpush3.bf16.msra.mxu0 %v4055_v52 }
 0x534   : > { %3706 = vmatprep.subr.bf16.mxu0 %v4072_v62 }
 0x537   : > { %3707 = vmatpush3.bf16.msra.mxu0 %v4056_v50 }
 0x589   : > { %v4015_v19 = vpop.permute.xlu0 %4014 }
 0x58a   : > { %v4017_v34 = vunpack.i.h.bf16 %v4015_v19  ;;  %v4016_v44 = vunpack.i.l.bf16 %v4015_v19 }
 0x58c   : > { %v3176_v0 = vsel %vm2893_vm4, %v3104_v11, %v4017_v34  ;;  %v3175_v46 = vsel %vm2893_vm4, %v3103_v27, %v4016_v44 }
 0x592   : > { %v4020_v4 = vpop.permute.xlu1 %4019 }
 0x593   : > { %v4022_v9 = vunpack.i.h.bf16 %v4020_v4  ;;  %v4021_v29 = vunpack.i.l.bf16 %v4020_v4 }
 0x595   : > { %v3177_v41 = vsel %vm2893_vm4, %v3105_v12, %v4021_v29  ;;  %v3178_v42 = vsel %vm2893_vm4, %v3106_v22, %v4022_v9 }
 0x597   : > { %v4030_v43 = vpop.permute.xlu1 %4029  ;;  %v4025_v14 = vpop.permute.xlu0 %4024 }
 0x598   : > { %v4032_v57 = vunpack.i.h.bf16 %v4030_v43  ;;  %v4031_v40 = vunpack.i.l.bf16 %v4030_v43  ;;  %v4027_v54 = vunpack.i.h.bf16 %v4025_v14  ;;  %v4026_v63 = vunpack.i.l.bf16 %v4025_v14 }
 0x59a   : > { %v3182_v51 = vsel %vm3179_vm1, %v3177_v41, %v4031_v40  ;;  %v3183_v13 = vsel %vm3179_vm1, %v3178_v42, %v4032_v57  ;;  %v3181_v45 = vsel %vm3179_vm1, %v3176_v0, %v4027_v54  ;;  %v3180_v18 = vsel %vm3179_vm1, %v3175_v46, %v4026_v63 }
 0x59b   : > { %v3185_v2 = vpack.c.bf16 %v3183_v13, %v3182_v51  ;;  %v3184_v39 = vpack.c.bf16 %v3181_v45, %v3180_v18 }
 0x59d   : > { %3688 = vmatprep.mubr.msk.bf16.mxu1 %vm3234_vm3, %v3184_v39 }
 0x59e   : > { %3689 = vmatmul.mubr.msk.bf16.vlgmr.msra.gmra.mrb[24].mxu1 %vm3234_vm3, %v3185_v2 }
 0x671   : > { %v3690_v31 = vpop.f32.mrb[24].mxu1 }
 0x672   : > { %vm3292_vm0 = vcmp.gt.f32.partialorder %v3690_v31, 0.0  ;;  %v3296_v20 = vmul.f32 0.2, %v3690_v31  ;;  %v3275_v17 = vpop.f32.mrb[25].mxu1 }
 0x673   : > { %vm3290_vm7 = vcmp.gt.f32.partialorder %v3275_v17, 0.0  ;;  %v3294_v49 = vmul.f32 0.2, %v3275_v17  ;;  %v3691_v38 = vpop.f32.mrb[26].mxu1 }
 0x674   : > { %v3300_v24 = vsel %vm3292_vm0, %v3690_v31, %v3296_v20  ;;  %vm3293_vm4 = vcmp.gt.f32.partialorder %v3691_v38, 0.0  ;;  %v3297_v32 = vmul.f32 0.2, %v3691_v38  ;;  %v3278_v61 = vpop.f32.mrb[27].mxu1 }
 0x675   : > { %3304 = vst.msk [vmem:[#allocation5 + $0x10] sm:$0xff] %vm3179_vm1, %v3300_v24  ;;  %v3298_v53 = vsel %vm3290_vm7, %v3275_v17, %v3294_v49  ;;  %vm3291_vm5 = vcmp.gt.f32.partialorder %v3278_v61, 0.0  ;;  %v3295_v30 = vmul.f32 0.2, %v3278_v61 }
 0x676   : > { %3302 = vst.msk [vmem:[#allocation5] sm:$0xff] %vm3179_vm1, %v3298_v53  ;;  %v3301_v5 = vsel %vm3293_vm4, %v3691_v38, %v3297_v32 }
 0x677   : > { %3305 = vst.msk [vmem:[#allocation5 + $0x18] sm:$0xff] %vm3179_vm1, %v3301_v5  ;;  %v3299_v23 = vsel %vm3291_vm5, %v3278_v61, %v3295_v30 }
 0x678   : > { %3303 = vst.msk [vmem:[#allocation5 + $0x8] sm:$0xff] %vm3179_vm1, %v3299_v23 }
 0x67e   : > { %v3308_v16 = vld [vmem:[#allocation5 + $0x10] ss:$2 sm:$0xff]  ;;  %v3312_v25 = vld [vmem:[#allocation5 + $0x11] ss:$2 sm:$0xff] }
 0x67f   : > { %v3306_v35 = vld [vmem:[#allocation5] ss:$2 sm:$0xff]  ;;  %v3310_v55 = vld [vmem:[#allocation5 + $0x1] ss:$2 sm:$0xff]  ;;  %v3314_v1 = vadd.f32 %v3312_v25, %v3308_v16 }
 0x680   : > { %v3313_v60 = vadd.f32 %v3310_v55, %v3306_v35 }
 0x681   : > { %v3316_v26 = vmul.f32 0.5, %v3314_v1 }
 0x682   : > { %v3315_v37 = vmul.f32 0.5, %v3313_v60 }
 0x683   : > { %v3320_v36 = vrot.slane %v3316_v26, 1 }
 0x684   : > { %v3319_v8 = vrot.slane %v3315_v37, 1 }
 0x685   : > { %v3323_v3 = vsel %vm857_vm2, %v3320_v36, %v3316_v26 }
 0x686   : > { %v3321_v21 = vsel %vm857_vm2, %v3319_v8, %v3320_v36 }
 0x687   : > { %v4033_v10 = vpack.i.bf16 %v3323_v3, %v3321_v21 }
 0x689   : > { %4034 = vrot.lane.b32.xlu0 %v4033_v10, %s4071_s17 }
 0x6fb   : > { %v4035_v48 = vpop.permute.xlu0 %4034 }
 0x6fc   : > { %v4037_v15 = vunpack.i.h.bf16 %v4035_v48  ;;  %v4036_v33 = vunpack.i.l.bf16 %v4035_v48 }
 0x6fe   : > { %v3332_v19 = vsel %vm3179_vm1, %v3316_v26, %v4037_v15  ;;  %v3331_v4 = vsel %vm3179_vm1, %v3315_v37, %v4036_v33 }
 0x6ff   : > { %v3333_v28 = vpack.c.bf16 %v3332_v19, %v3331_v4 }
 0x701   : > { %3709 = vmatmul.mubr.bf16.vlgmr.msra.gmra.mrb[32].mxu0 %v3333_v28 }
 0x7d4   : > { %v3432_v34 = vpop.f32.mrb[32].mxu0 }
 0x7d5   : > { %3439 = vst.msk [vmem:[%s469_s21] sm:$0xff] %vm2387_vm14, %v3432_v34  ;;  %v3710_v44 = vpop.f32.mrb[33].mxu0 }
 0x7d6   : > { %v3435_v9 = vpop.f32.mrb[34].mxu0 }
 0x7d7   : > { %3440 = vst.msk [vmem:[%s469_s21 + $0x8] sm:$0xff] %vm2387_vm14, %v3435_v9  ;;  %v3711_v29 = vpop.f32.mrb[35].mxu0 }
 0x7d8 PF: > { %s24_s29 = sadd.s32 1, %s4063_s29  }
 0x7d9   : > { %p21_p5 = scmp.ge.s32.totalorder %s24_s29, 4  }
 0x7db   :  { %23 = sbr.rel (!%p21_p5) target bundleno = 1 (0x1), region = 162 }

</bundles_post_ra>
